<compile_context>
chip_gen: v5e
topology: v5e:2x2
jax: 0.10.0
libtpu: 0.0.40
codegen_flags: <defaults>
</compile_context>

<pallas_src>
import functools

import jax
import jax.numpy as jnp
from jax.experimental import pallas as pl
from jax.experimental.pallas import tpu as pltpu

EPS = 1e-5
QMAX = 255.0  # bits = 8
# (Cin, Cout, K, stride) for the 6 Conv1d layers
CONV_SPECS = ((20, 32, 7, 3), (32, 64, 5, 2), (64, 64, 3, 1),
              (64, 64, 3, 1), (64, 64, 3, 1), (64, 64, 3, 1))
# number of ELU applications after conv layers 0..4 (layer 3 has ELU twice);
# the final (6th) conv has no quant/BN/ELU after it.
ELU_COUNTS = (1, 1, 1, 2, 1)
NUM_CLASSES = 8
LPAD = 24          # 8-aligned row block per (batch[, parity]) in activation scratch


def _conv_lengths(l):
    outs = []
    for (_ci, _co, k, s) in CONV_SPECS:
        l = (l - k) // s + 1
        outs.append(l)
    return tuple(outs)


# ----------------------------- fused Pallas kernel ---------------------------

def _fused_kernel(x0_ref, w0_ref, wm_ref, vec_ref, o_ref,
                  act0, act1, act2, act3, act4, *, batch, l_in):
    NB = batch * LPAD
    acts = (act0, act1, act2, act3, act4)
    louts = _conv_lengths(l_in)

    # static row offsets of each packed conv weight inside wm_ref
    w_offs, off = [], 0
    for i in range(1, len(CONV_SPECS)):
        w_offs.append(off)
        off += CONV_SPECS[i][2] * CONV_SPECS[i][0]          # K * Cin rows
    lin_off = off

    def vec(row, c):                                        # (1, c) per-channel vector
        return vec_ref[pl.ds(row, 1), 0:c]

    def quant_bn_elu(y, valid_blocks, li):
        # fake-quant: GLOBAL min/max over the valid rows of the stacked block
        mins = [jnp.min(y[s:s + n]) for s, n in valid_blocks]
        maxs = [jnp.max(y[s:s + n]) for s, n in valid_blocks]
        x_min = functools.reduce(jnp.minimum, mins)
        x_max = functools.reduce(jnp.maximum, maxs)
        rng = x_max - x_min
        scl = jnp.where(rng != 0.0, rng / QMAX, 1.0)
        inv_scl = 1.0 / scl           # exact scalar reciprocal (keeps round() boundaries)
        z = jnp.clip(jnp.round((y - x_min) * inv_scl), 0.0, QMAX) * scl + x_min
        c = y.shape[1]
        z = z * vec(3 * li + 1, c) + vec(3 * li + 2, c)     # folded BatchNorm
        for _ in range(ELU_COUNTS[li]):
            z = jnp.where(z > 0.0, z, jnp.exp(z) - 1.0)     # ELU
        # TODO(synk): Dropout omitted (eval-mode identity).
        return z

    # keep never-written padding rows finite & deterministic (5 tiny stores)
    for a in acts:
        a[...] = jnp.zeros(a.shape, a.dtype)

    # ---------------- conv0: one batch-folded MXU dot ----------------
    # x0 rows are host-packed as [b0-even | b1-even | b0-odd | b1-odd] LPAD-row
    # blocks, so the output lands directly in the parity-deinterleaved layout
    # that makes the stride-2 conv1 tap reads contiguous.
    y0 = jnp.dot(x0_ref[...], w0_ref[...], preferred_element_type=jnp.float32)
    y0 = y0 + vec(0, CONV_SPECS[0][1])
    n_even = (louts[0] + 1) // 2
    n_odd = louts[0] // 2
    blocks0 = ([(b * LPAD, n_even) for b in range(batch)]
               + [(NB + b * LPAD, n_odd) for b in range(batch)])
    act0[pl.ds(0, 2 * NB), :] = quant_bn_elu(y0, blocks0, 0)

    def stacked(lo):
        return [(b * LPAD, lo) for b in range(batch)]

    # ---------------- conv1 (K=5, stride 2): contiguous deinterleaved taps ----
    cin1, cout1, k1, _ = CONV_SPECS[1]
    acc = jnp.zeros((NB, cout1), jnp.float32)
    for k in range(k1):
        off1 = (k % 2) * NB + (k // 2)          # parity block base + in-block shift
        acc = acc + jnp.dot(act0[pl.ds(off1, NB), :],
                            wm_ref[pl.ds(w_offs[0] + k * cin1, cin1), :],
                            preferred_element_type=jnp.float32)
    act1[pl.ds(0, NB), :] = quant_bn_elu(acc + vec(3, cout1), stacked(louts[1]), 1)

    # ---------------- conv2..conv4 (K=3, stride 1): slab-shift taps ----------
    for li in range(2, 5):
        cin_l, cout_l, k_l, _ = CONV_SPECS[li]
        src = acts[li - 1]
        acc = jnp.zeros((NB, cout_l), jnp.float32)
        for k in range(k_l):
            acc = acc + jnp.dot(src[pl.ds(k, NB), :],
                                wm_ref[pl.ds(w_offs[li - 1] + k * cin_l, cin_l), :],
                                preferred_element_type=jnp.float32)
        acts[li][pl.ds(0, NB), :] = quant_bn_elu(acc + vec(3 * li, cout_l),
                                                 stacked(louts[li]), li)

    # ---------------- conv5 (no quant/BN/ELU) + mean pool + linear head ------
    cin5, cout5, k5, _ = CONV_SPECS[5]
    acc = jnp.zeros((NB, cout5), jnp.float32)
    for k in range(k5):
        acc = acc + jnp.dot(act4[pl.ds(k, NB), :],
                            wm_ref[pl.ds(w_offs[4] + k * cin5, cin5), :],
                            preferred_element_type=jnp.float32)
    y5 = acc + vec(15, cout5)
    lo5 = louts[5]
    pooled = jnp.concatenate(
        [jnp.sum(y5[b * LPAD:b * LPAD + lo5], axis=0, keepdims=True) * (1.0 / lo5)
         for b in range(batch)], axis=0)                               # (B, 64)
    lin_w = wm_ref[pl.ds(lin_off, cout5), 0:NUM_CLASSES]               # (64, 8)
    o_ref[...] = (jnp.dot(pooled, lin_w, preferred_element_type=jnp.float32)
                  + vec(16, NUM_CLASSES))


# ------------------------------- wrappers -------------------------------------

def prepare_params(params):
    """One-time packing into 3 dense operands (plus the per-call im2col LHS)."""
    cin0, cout0, k0, _ = CONV_SPECS[0]
    w0 = jnp.transpose(params['conv_w'][0], (2, 1, 0)).reshape(k0 * cin0, cout0)

    blocks = []
    for i in range(1, len(CONV_SPECS)):
        w = jnp.transpose(params['conv_w'][i], (2, 1, 0))      # (K, Cin, Cout)
        blocks.append(w.reshape(-1, w.shape[-1]))              # (K*Cin, 64)
    lw = params['lin_w'].T                                     # (64, 8)
    blocks.append(jnp.pad(lw, ((0, 0), (0, 64 - NUM_CLASSES))))
    wmat = jnp.concatenate(blocks, axis=0).astype(jnp.float32)  # (992, 64)

    def pad64(v):
        return jnp.pad(v.astype(jnp.float32), (0, 64 - v.shape[0]))

    rows = []
    for i in range(len(ELU_COUNTS)):
        gamma, beta, mean, var = params['bn'][i]
        s = gamma / jnp.sqrt(var + EPS)
        rows += [pad64(params['conv_b'][i]), pad64(s), pad64(beta - mean * s)]
    rows.append(pad64(params['conv_b'][5]))                    # conv5 bias (row 15)
    rows.append(pad64(params['lin_b']))                        # linear bias (row 16)
    vecs = jnp.stack(rows, axis=0)                             # (17, 64)
    return {'w0': w0.astype(jnp.float32), 'wmat': wmat, 'vecs': vecs}


def model_forward(x_ncl, packed):
    # x_ncl: PyTorch-style (B, Cin, L) input.
    B, cin, L = x_ncl.shape
    louts = _conv_lengths(L)
    k0, s0 = CONV_SPECS[0][2], CONV_SPECS[0][3]
    n_even, n_odd = (louts[0] + 1) // 2, louts[0] // 2
    assert n_even <= LPAD and max(louts[1:]) <= LPAD
    NB = B * LPAD

    # Host prep: conv0 im2col with rows ordered [b-even blocks | b-odd blocks],
    # padded to LPAD rows per block (zeros).  (B, L, Cin) -> (2*NB, K*Cin).
    x_blc = jnp.transpose(x_ncl, (0, 2, 1)).astype(jnp.float32)
    idx = (s0 * jnp.arange(louts[0]))[:, None] + jnp.arange(k0)[None, :]
    patches = x_blc[:, idx, :].reshape(B, louts[0], k0 * cin)
    even = jnp.pad(patches[:, 0::2, :], ((0, 0), (0, LPAD - n_even), (0, 0)))
    odd = jnp.pad(patches[:, 1::2, :], ((0, 0), (0, LPAD - n_odd), (0, 0)))
    x0 = jnp.concatenate([even.reshape(NB, k0 * cin),
                          odd.reshape(NB, k0 * cin)], axis=0)

    kernel = functools.partial(_fused_kernel, batch=B, l_in=L)
    return pl.pallas_call(
        kernel,
        out_shape=jax.ShapeDtypeStruct((B, NUM_CLASSES), jnp.float32),
        scratch_shapes=[
            pltpu.VMEM((2 * NB + 8, CONV_SPECS[0][1]), jnp.float32),  # act0 (deinterleaved)
            pltpu.VMEM((NB + 8, 64), jnp.float32),                    # act1
            pltpu.VMEM((NB + 8, 64), jnp.float32),                    # act2
            pltpu.VMEM((NB + 8, 64), jnp.float32),                    # act3
            pltpu.VMEM((NB + 8, 64), jnp.float32),                    # act4
        ],
    )(x0, packed['w0'], packed['wmat'], packed['vecs'])


# ------------------------------ reference -----------------------------------

def reference_forward(x_ncl, params):
    h = x_ncl.astype(jnp.float32)
    for i, (_cin, _cout, _k, stride) in enumerate(CONV_SPECS):
        w = params['conv_w'][i]        # (Cout, Cin, K)
        b = params['conv_b'][i]
        h = jax.lax.conv_general_dilated(
            h, w, window_strides=(stride,), padding='VALID',
            dimension_numbers=('NCH', 'OIH', 'NCH')) + b[None, :, None]
        if i < len(ELU_COUNTS):
            x_min = jnp.min(h)
            x_max = jnp.max(h)
            rng = x_max - x_min
            scale = jnp.where(rng != 0.0, rng / QMAX, 1.0)
            h = jnp.clip(jnp.round((h - x_min) / scale), 0.0, QMAX) * scale + x_min
            gamma, beta, mean, var = params['bn'][i]
            h = (h - mean[None, :, None]) / jnp.sqrt(var[None, :, None] + EPS) \
                * gamma[None, :, None] + beta[None, :, None]
            for _ in range(ELU_COUNTS[i]):
                h = jnp.where(h > 0.0, h, jnp.exp(h) - 1.0)
    pooled = jnp.mean(h, axis=2)
    return pooled @ params['lin_w'].T + params['lin_b']


# ------------------------------- params --------------------------------------

def init_params(key):
    params = {'conv_w': [], 'conv_b': [], 'bn': []}
    keys = iter(jax.random.split(key, 64))
    for (cin, cout, k, _stride) in CONV_SPECS:
        fan_in = cin * k
        params['conv_w'].append(
            jax.random.normal(next(keys), (cout, cin, k), jnp.float32)
            * (fan_in ** -0.5))
        params['conv_b'].append(
            0.05 * jax.random.normal(next(keys), (cout,), jnp.float32))
    for c in (32, 64, 64, 64, 64):
        gamma = 1.0 + 0.1 * jax.random.normal(next(keys), (c,), jnp.float32)
        beta = 0.05 * jax.random.normal(next(keys), (c,), jnp.float32)
        mean = 0.1 * jax.random.normal(next(keys), (c,), jnp.float32)
        var = 1.0 + 0.2 * jax.random.uniform(next(keys), (c,), jnp.float32)
        params['bn'].append((gamma, beta, mean, var))
    params['lin_w'] = jax.random.normal(
        next(keys), (NUM_CLASSES, 64), jnp.float32) * (64 ** -0.5)
    params['lin_b'] = 0.05 * jax.random.normal(
        next(keys), (NUM_CLASSES,), jnp.float32)
    return params


if __name__ == "__main__":
    root = jax.random.PRNGKey(0)
    pkey, xkey = jax.random.split(root)
    params = init_params(pkey)
    packed = prepare_params(params)

    B, C_IN, L = 2, 20, 128
    x = jax.random.normal(xkey, (B, C_IN, L), jnp.float32)   # PyTorch NCW input

    out = jax.jit(model_forward)(x, packed)
    out = jax.block_until_ready(out)
    assert out.shape == (B, NUM_CLASSES), out.shape

    ref = reference_forward(x, params)
    # round() in the fake-quant is boundary-sensitive to tiny accumulation-order
    # differences between the kernel and lax.conv, so use a modest tolerance.
    max_err = float(jnp.max(jnp.abs(out - ref)))
    assert max_err < 5e-2, f"max abs err {max_err}"
    print("KERNEL_OK")
</pallas_src>

<mosaic_0001>
module attributes {stable_mosaic.version = 11 : i64} {
  func.func @_fused_kernel(%arg0: memref<96x140xf32, #tpu.memory_space<vmem>>, %arg1: memref<140x32xf32, #tpu.memory_space<vmem>>, %arg2: memref<992x64xf32, #tpu.memory_space<vmem>>, %arg3: memref<17x64xf32, #tpu.memory_space<vmem>>, %arg4: memref<2x8xf32, #tpu.memory_space<vmem>>, %arg5: memref<104x32xf32, #tpu.memory_space<vmem>>, %arg6: memref<56x64xf32, #tpu.memory_space<vmem>>, %arg7: memref<56x64xf32, #tpu.memory_space<vmem>>, %arg8: memref<56x64xf32, #tpu.memory_space<vmem>>, %arg9: memref<56x64xf32, #tpu.memory_space<vmem>>) attributes {dimension_semantics = [], scalar_prefetch = 0 : i64, scratch_operands = 5 : i64, tpu.core_type = #tpu.core_type<tc>} {
    %cst = arith.constant 0.000000e+00 : f32
    %0 = vector.broadcast %cst : f32 to vector<104x32xf32>
    %c0 = arith.constant 0 : index
    %c0_0 = arith.constant 0 : index
    %1 = vector.load %arg5[%c0, %c0_0] : memref<104x32xf32, #tpu.memory_space<vmem>>, vector<104x32xf32>
    tpu.vector_store %arg5[%c0, %c0_0], %0 {strides = array<i32>} : memref<104x32xf32, #tpu.memory_space<vmem>>, vector<104x32xf32>,
    %cst_1 = arith.constant 0.000000e+00 : f32
    %2 = vector.broadcast %cst_1 : f32 to vector<56x64xf32>
    %c0_2 = arith.constant 0 : index
    %c0_3 = arith.constant 0 : index
    %3 = vector.load %arg6[%c0_2, %c0_3] : memref<56x64xf32, #tpu.memory_space<vmem>>, vector<56x64xf32>
    tpu.vector_store %arg6[%c0_2, %c0_3], %2 {strides = array<i32>} : memref<56x64xf32, #tpu.memory_space<vmem>>, vector<56x64xf32>,
    %cst_4 = arith.constant 0.000000e+00 : f32
    %4 = vector.broadcast %cst_4 : f32 to vector<56x64xf32>
    %c0_5 = arith.constant 0 : index
    %c0_6 = arith.constant 0 : index
    %5 = vector.load %arg7[%c0_5, %c0_6] : memref<56x64xf32, #tpu.memory_space<vmem>>, vector<56x64xf32>
    tpu.vector_store %arg7[%c0_5, %c0_6], %4 {strides = array<i32>} : memref<56x64xf32, #tpu.memory_space<vmem>>, vector<56x64xf32>,
    %cst_7 = arith.constant 0.000000e+00 : f32
    %6 = vector.broadcast %cst_7 : f32 to vector<56x64xf32>
    %c0_8 = arith.constant 0 : index
    %c0_9 = arith.constant 0 : index
    %7 = vector.load %arg8[%c0_8, %c0_9] : memref<56x64xf32, #tpu.memory_space<vmem>>, vector<56x64xf32>
    tpu.vector_store %arg8[%c0_8, %c0_9], %6 {strides = array<i32>} : memref<56x64xf32, #tpu.memory_space<vmem>>, vector<56x64xf32>,
    %cst_10 = arith.constant 0.000000e+00 : f32
    %8 = vector.broadcast %cst_10 : f32 to vector<56x64xf32>
    %c0_11 = arith.constant 0 : index
    %c0_12 = arith.constant 0 : index
    %9 = vector.load %arg9[%c0_11, %c0_12] : memref<56x64xf32, #tpu.memory_space<vmem>>, vector<56x64xf32>
    tpu.vector_store %arg9[%c0_11, %c0_12], %8 {strides = array<i32>} : memref<56x64xf32, #tpu.memory_space<vmem>>, vector<56x64xf32>,
    %c0_13 = arith.constant 0 : index
    %c0_14 = arith.constant 0 : index
    %10 = vector.load %arg0[%c0_13, %c0_14] : memref<96x140xf32, #tpu.memory_space<vmem>>, vector<96x140xf32>
    %c0_15 = arith.constant 0 : index
    %c0_16 = arith.constant 0 : index
    %11 = vector.load %arg1[%c0_15, %c0_16] : memref<140x32xf32, #tpu.memory_space<vmem>>, vector<140x32xf32>
    %cst_17 = arith.constant dense<0.000000e+00> : vector<96x32xf32>
    %12 = tpu.matmul %10, %11, %cst_17 {dimension_numbers = #tpu.dot_dimension_numbers<[1], [0], [0], [1], [0, 0, 1, 1], [], []>} : vector<96x140xf32>, vector<140x32xf32>, vector<96x32xf32> -> vector<96x32xf32>
    %c0_18 = arith.constant 0 : index
    %c0_19 = arith.constant 0 : index
    %13 = vector.load %arg3[%c0_18, %c0_19] : memref<17x64xf32, #tpu.memory_space<vmem>>, vector<1x32xf32>
    %14 = vector.broadcast %13 : vector<1x32xf32> to vector<96x32xf32>
    %15 = arith.addf %12, %14 : vector<96x32xf32>
    %16 = vector.extract_strided_slice %15 {offsets = [0, 0], sizes = [21, 32], strides = [1, 1]} : vector<96x32xf32> to vector<21x32xf32>
    %17 = vector.shape_cast %16 : vector<21x32xf32> to vector<1x21x32xf32>
    %cst_20 = arith.constant dense<0x7F800000> : vector<1xf32>
    %18 = vector.multi_reduction <minimumf>, %17, %cst_20 [1, 2] : vector<1x21x32xf32> to vector<1xf32>
    %19 = vector.shape_cast %18 : vector<1xf32> to vector<1x1x1xf32>
    %20 = vector.extract %19[0, 0, 0] : f32 from vector<1x1x1xf32>
    %21 = vector.extract_strided_slice %15 {offsets = [24, 0], sizes = [21, 32], strides = [1, 1]} : vector<96x32xf32> to vector<21x32xf32>
    %22 = vector.shape_cast %21 : vector<21x32xf32> to vector<1x21x32xf32>
    %cst_21 = arith.constant dense<0x7F800000> : vector<1xf32>
    %23 = vector.multi_reduction <minimumf>, %22, %cst_21 [1, 2] : vector<1x21x32xf32> to vector<1xf32>
    %24 = vector.shape_cast %23 : vector<1xf32> to vector<1x1x1xf32>
    %25 = vector.extract %24[0, 0, 0] : f32 from vector<1x1x1xf32>
    %26 = vector.extract_strided_slice %15 {offsets = [48, 0], sizes = [20, 32], strides = [1, 1]} : vector<96x32xf32> to vector<20x32xf32>
    %27 = vector.shape_cast %26 : vector<20x32xf32> to vector<1x20x32xf32>
    %cst_22 = arith.constant dense<0x7F800000> : vector<1xf32>
    %28 = vector.multi_reduction <minimumf>, %27, %cst_22 [1, 2] : vector<1x20x32xf32> to vector<1xf32>
    %29 = vector.shape_cast %28 : vector<1xf32> to vector<1x1x1xf32>
    %30 = vector.extract %29[0, 0, 0] : f32 from vector<1x1x1xf32>
    %31 = vector.extract_strided_slice %15 {offsets = [72, 0], sizes = [20, 32], strides = [1, 1]} : vector<96x32xf32> to vector<20x32xf32>
    %32 = vector.shape_cast %31 : vector<20x32xf32> to vector<1x20x32xf32>
    %cst_23 = arith.constant dense<0x7F800000> : vector<1xf32>
    %33 = vector.multi_reduction <minimumf>, %32, %cst_23 [1, 2] : vector<1x20x32xf32> to vector<1xf32>
    %34 = vector.shape_cast %33 : vector<1xf32> to vector<1x1x1xf32>
    %35 = vector.extract %34[0, 0, 0] : f32 from vector<1x1x1xf32>
    %36 = vector.extract_strided_slice %15 {offsets = [0, 0], sizes = [21, 32], strides = [1, 1]} : vector<96x32xf32> to vector<21x32xf32>
    %37 = vector.shape_cast %36 : vector<21x32xf32> to vector<1x21x32xf32>
    %cst_24 = arith.constant dense<0xFF800000> : vector<1xf32>
    %38 = vector.multi_reduction <maximumf>, %37, %cst_24 [1, 2] : vector<1x21x32xf32> to vector<1xf32>
    %39 = vector.shape_cast %38 : vector<1xf32> to vector<1x1x1xf32>
    %40 = vector.extract %39[0, 0, 0] : f32 from vector<1x1x1xf32>
    %41 = vector.extract_strided_slice %15 {offsets = [24, 0], sizes = [21, 32], strides = [1, 1]} : vector<96x32xf32> to vector<21x32xf32>
    %42 = vector.shape_cast %41 : vector<21x32xf32> to vector<1x21x32xf32>
    %cst_25 = arith.constant dense<0xFF800000> : vector<1xf32>
    %43 = vector.multi_reduction <maximumf>, %42, %cst_25 [1, 2] : vector<1x21x32xf32> to vector<1xf32>
    %44 = vector.shape_cast %43 : vector<1xf32> to vector<1x1x1xf32>
    %45 = vector.extract %44[0, 0, 0] : f32 from vector<1x1x1xf32>
    %46 = vector.extract_strided_slice %15 {offsets = [48, 0], sizes = [20, 32], strides = [1, 1]} : vector<96x32xf32> to vector<20x32xf32>
    %47 = vector.shape_cast %46 : vector<20x32xf32> to vector<1x20x32xf32>
    %cst_26 = arith.constant dense<0xFF800000> : vector<1xf32>
    %48 = vector.multi_reduction <maximumf>, %47, %cst_26 [1, 2] : vector<1x20x32xf32> to vector<1xf32>
    %49 = vector.shape_cast %48 : vector<1xf32> to vector<1x1x1xf32>
    %50 = vector.extract %49[0, 0, 0] : f32 from vector<1x1x1xf32>
    %51 = vector.extract_strided_slice %15 {offsets = [72, 0], sizes = [20, 32], strides = [1, 1]} : vector<96x32xf32> to vector<20x32xf32>
    %52 = vector.shape_cast %51 : vector<20x32xf32> to vector<1x20x32xf32>
    %cst_27 = arith.constant dense<0xFF800000> : vector<1xf32>
    %53 = vector.multi_reduction <maximumf>, %52, %cst_27 [1, 2] : vector<1x20x32xf32> to vector<1xf32>
    %54 = vector.shape_cast %53 : vector<1xf32> to vector<1x1x1xf32>
    %55 = vector.extract %54[0, 0, 0] : f32 from vector<1x1x1xf32>
    %56 = arith.minimumf %20, %25 : f32
    %57 = arith.minimumf %56, %30 : f32
    %58 = arith.minimumf %57, %35 : f32
    %59 = arith.maximumf %40, %45 : f32
    %60 = arith.maximumf %59, %50 : f32
    %61 = arith.maximumf %60, %55 : f32
    %62 = arith.subf %61, %58 : f32
    %cst_28 = arith.constant 0.000000e+00 : f32
    %63 = arith.cmpf one, %62, %cst_28 : f32
    %cst_29 = arith.constant 2.550000e+02 : f32
    %64 = arith.divf %62, %cst_29 : f32
    %cst_30 = arith.constant 1.000000e+00 : f32
    %65 = arith.select %63, %64, %cst_30 : f32
    %cst_31 = arith.constant 1.000000e+00 : f32
    %66 = arith.divf %cst_31, %65 : f32
    %67 = vector.broadcast %58 : f32 to vector<96x32xf32>
    %68 = arith.subf %15, %67 : vector<96x32xf32>
    %69 = vector.broadcast %66 : f32 to vector<96x32xf32>
    %70 = arith.mulf %68, %69 : vector<96x32xf32>
    %71 = math.roundeven %70 : vector<96x32xf32>
    %cst_32 = arith.constant 0.000000e+00 : f32
    %cst_33 = arith.constant 2.550000e+02 : f32
    %72 = vector.broadcast %cst_32 : f32 to vector<96x32xf32>
    %73 = arith.maximumf %72, %71 : vector<96x32xf32>
    %74 = vector.broadcast %cst_33 : f32 to vector<96x32xf32>
    %75 = arith.minimumf %74, %73 : vector<96x32xf32>
    %76 = vector.broadcast %65 : f32 to vector<96x32xf32>
    %77 = arith.mulf %75, %76 : vector<96x32xf32>
    %78 = vector.broadcast %58 : f32 to vector<96x32xf32>
    %79 = arith.addf %77, %78 : vector<96x32xf32>
    %c1 = arith.constant 1 : index
    %c0_34 = arith.constant 0 : index
    %80 = vector.load %arg3[%c1, %c0_34] : memref<17x64xf32, #tpu.memory_space<vmem>>, vector<1x32xf32>
    %81 = vector.broadcast %80 : vector<1x32xf32> to vector<96x32xf32>
    %82 = arith.mulf %79, %81 : vector<96x32xf32>
    %c2 = arith.constant 2 : index
    %c0_35 = arith.constant 0 : index
    %83 = vector.load %arg3[%c2, %c0_35] : memref<17x64xf32, #tpu.memory_space<vmem>>, vector<1x32xf32>
    %84 = vector.broadcast %83 : vector<1x32xf32> to vector<96x32xf32>
    %85 = arith.addf %82, %84 : vector<96x32xf32>
    %cst_36 = arith.constant 0.000000e+00 : f32
    %86 = vector.broadcast %cst_36 : f32 to vector<96x32xf32>
    %87 = arith.cmpf ogt, %85, %86 : vector<96x32xf32>
    %88 = math.exp %85 : vector<96x32xf32>
    %cst_37 = arith.constant 1.000000e+00 : f32
    %89 = vector.broadcast %cst_37 : f32 to vector<96x32xf32>
    %90 = arith.subf %88, %89 : vector<96x32xf32>
    %91 = arith.select %87, %85, %90 : vector<96x32xi1>, vector<96x32xf32>
    %c0_38 = arith.constant 0 : index
    %c0_39 = arith.constant 0 : index
    %92 = vector.load %arg5[%c0_38, %c0_39] : memref<104x32xf32, #tpu.memory_space<vmem>>, vector<96x32xf32>
    tpu.vector_store %arg5[%c0_38, %c0_39], %91 {strides = array<i32>} : memref<104x32xf32, #tpu.memory_space<vmem>>, vector<96x32xf32>,
    %cst_40 = arith.constant 0.000000e+00 : f32
    %93 = vector.broadcast %cst_40 : f32 to vector<48x64xf32>
    %c0_41 = arith.constant 0 : index
    %c0_42 = arith.constant 0 : index
    %94 = vector.load %arg5[%c0_41, %c0_42] : memref<104x32xf32, #tpu.memory_space<vmem>>, vector<48x32xf32>
    %c0_43 = arith.constant 0 : index
    %c0_44 = arith.constant 0 : index
    %95 = vector.load %arg2[%c0_43, %c0_44] : memref<992x64xf32, #tpu.memory_space<vmem>>, vector<32x64xf32>
    %cst_45 = arith.constant dense<0.000000e+00> : vector<48x64xf32>
    %96 = tpu.matmul %94, %95, %cst_45 {dimension_numbers = #tpu.dot_dimension_numbers<[1], [0], [0], [1], [0, 0, 1, 1], [], []>} : vector<48x32xf32>, vector<32x64xf32>, vector<48x64xf32> -> vector<48x64xf32>
    %97 = arith.addf %93, %96 : vector<48x64xf32>
    %c48 = arith.constant 48 : index
    %c0_46 = arith.constant 0 : index
    %98 = vector.load %arg5[%c48, %c0_46] : memref<104x32xf32, #tpu.memory_space<vmem>>, vector<48x32xf32>
    %c32 = arith.constant 32 : index
    %c0_47 = arith.constant 0 : index
    %99 = vector.load %arg2[%c32, %c0_47] : memref<992x64xf32, #tpu.memory_space<vmem>>, vector<32x64xf32>
    %cst_48 = arith.constant dense<0.000000e+00> : vector<48x64xf32>
    %100 = tpu.matmul %98, %99, %cst_48 {dimension_numbers = #tpu.dot_dimension_numbers<[1], [0], [0], [1], [0, 0, 1, 1], [], []>} : vector<48x32xf32>, vector<32x64xf32>, vector<48x64xf32> -> vector<48x64xf32>
    %101 = arith.addf %97, %100 : vector<48x64xf32>
    %c1_49 = arith.constant 1 : index
    %c0_50 = arith.constant 0 : index
    %102 = vector.load %arg5[%c1_49, %c0_50] : memref<104x32xf32, #tpu.memory_space<vmem>>, vector<48x32xf32>
    %c64 = arith.constant 64 : index
    %c0_51 = arith.constant 0 : index
    %103 = vector.load %arg2[%c64, %c0_51] : memref<992x64xf32, #tpu.memory_space<vmem>>, vector<32x64xf32>
    %cst_52 = arith.constant dense<0.000000e+00> : vector<48x64xf32>
    %104 = tpu.matmul %102, %103, %cst_52 {dimension_numbers = #tpu.dot_dimension_numbers<[1], [0], [0], [1], [0, 0, 1, 1], [], []>} : vector<48x32xf32>, vector<32x64xf32>, vector<48x64xf32> -> vector<48x64xf32>
    %105 = arith.addf %101, %104 : vector<48x64xf32>
    %c49 = arith.constant 49 : index
    %c0_53 = arith.constant 0 : index
    %106 = vector.load %arg5[%c49, %c0_53] : memref<104x32xf32, #tpu.memory_space<vmem>>, vector<48x32xf32>
    %c96 = arith.constant 96 : index
    %c0_54 = arith.constant 0 : index
    %107 = vector.load %arg2[%c96, %c0_54] : memref<992x64xf32, #tpu.memory_space<vmem>>, vector<32x64xf32>
    %cst_55 = arith.constant dense<0.000000e+00> : vector<48x64xf32>
    %108 = tpu.matmul %106, %107, %cst_55 {dimension_numbers = #tpu.dot_dimension_numbers<[1], [0], [0], [1], [0, 0, 1, 1], [], []>} : vector<48x32xf32>, vector<32x64xf32>, vector<48x64xf32> -> vector<48x64xf32>
    %109 = arith.addf %105, %108 : vector<48x64xf32>
    %c2_56 = arith.constant 2 : index
    %c0_57 = arith.constant 0 : index
    %110 = vector.load %arg5[%c2_56, %c0_57] : memref<104x32xf32, #tpu.memory_space<vmem>>, vector<48x32xf32>
    %c128 = arith.constant 128 : index
    %c0_58 = arith.constant 0 : index
    %111 = vector.load %arg2[%c128, %c0_58] : memref<992x64xf32, #tpu.memory_space<vmem>>, vector<32x64xf32>
    %cst_59 = arith.constant dense<0.000000e+00> : vector<48x64xf32>
    %112 = tpu.matmul %110, %111, %cst_59 {dimension_numbers = #tpu.dot_dimension_numbers<[1], [0], [0], [1], [0, 0, 1, 1], [], []>} : vector<48x32xf32>, vector<32x64xf32>, vector<48x64xf32> -> vector<48x64xf32>
    %113 = arith.addf %109, %112 : vector<48x64xf32>
    %c3 = arith.constant 3 : index
    %c0_60 = arith.constant 0 : index
    %114 = vector.load %arg3[%c3, %c0_60] : memref<17x64xf32, #tpu.memory_space<vmem>>, vector<1x64xf32>
    %115 = vector.broadcast %114 : vector<1x64xf32> to vector<48x64xf32>
    %116 = arith.addf %113, %115 : vector<48x64xf32>
    %117 = vector.extract_strided_slice %116 {offsets = [0, 0], sizes = [19, 64], strides = [1, 1]} : vector<48x64xf32> to vector<19x64xf32>
    %118 = vector.shape_cast %117 : vector<19x64xf32> to vector<1x19x64xf32>
    %cst_61 = arith.constant dense<0x7F800000> : vector<1xf32>
    %119 = vector.multi_reduction <minimumf>, %118, %cst_61 [1, 2] : vector<1x19x64xf32> to vector<1xf32>
    %120 = vector.shape_cast %119 : vector<1xf32> to vector<1x1x1xf32>
    %121 = vector.extract %120[0, 0, 0] : f32 from vector<1x1x1xf32>
    %122 = vector.extract_strided_slice %116 {offsets = [24, 0], sizes = [19, 64], strides = [1, 1]} : vector<48x64xf32> to vector<19x64xf32>
    %123 = vector.shape_cast %122 : vector<19x64xf32> to vector<1x19x64xf32>
    %cst_62 = arith.constant dense<0x7F800000> : vector<1xf32>
    %124 = vector.multi_reduction <minimumf>, %123, %cst_62 [1, 2] : vector<1x19x64xf32> to vector<1xf32>
    %125 = vector.shape_cast %124 : vector<1xf32> to vector<1x1x1xf32>
    %126 = vector.extract %125[0, 0, 0] : f32 from vector<1x1x1xf32>
    %127 = vector.extract_strided_slice %116 {offsets = [0, 0], sizes = [19, 64], strides = [1, 1]} : vector<48x64xf32> to vector<19x64xf32>
    %128 = vector.shape_cast %127 : vector<19x64xf32> to vector<1x19x64xf32>
    %cst_63 = arith.constant dense<0xFF800000> : vector<1xf32>
    %129 = vector.multi_reduction <maximumf>, %128, %cst_63 [1, 2] : vector<1x19x64xf32> to vector<1xf32>
    %130 = vector.shape_cast %129 : vector<1xf32> to vector<1x1x1xf32>
    %131 = vector.extract %130[0, 0, 0] : f32 from vector<1x1x1xf32>
    %132 = vector.extract_strided_slice %116 {offsets = [24, 0], sizes = [19, 64], strides = [1, 1]} : vector<48x64xf32> to vector<19x64xf32>
    %133 = vector.shape_cast %132 : vector<19x64xf32> to vector<1x19x64xf32>
    %cst_64 = arith.constant dense<0xFF800000> : vector<1xf32>
    %134 = vector.multi_reduction <maximumf>, %133, %cst_64 [1, 2] : vector<1x19x64xf32> to vector<1xf32>
    %135 = vector.shape_cast %134 : vector<1xf32> to vector<1x1x1xf32>
    %136 = vector.extract %135[0, 0, 0] : f32 from vector<1x1x1xf32>
    %137 = arith.minimumf %121, %126 : f32
    %138 = arith.maximumf %131, %136 : f32
    %139 = arith.subf %138, %137 : f32
    %cst_65 = arith.constant 0.000000e+00 : f32
    %140 = arith.cmpf one, %139, %cst_65 : f32
    %cst_66 = arith.constant 2.550000e+02 : f32
    %141 = arith.divf %139, %cst_66 : f32
    %cst_67 = arith.constant 1.000000e+00 : f32
    %142 = arith.select %140, %141, %cst_67 : f32
    %cst_68 = arith.constant 1.000000e+00 : f32
    %143 = arith.divf %cst_68, %142 : f32
    %144 = vector.broadcast %137 : f32 to vector<48x64xf32>
    %145 = arith.subf %116, %144 : vector<48x64xf32>
    %146 = vector.broadcast %143 : f32 to vector<48x64xf32>
    %147 = arith.mulf %145, %146 : vector<48x64xf32>
    %148 = math.roundeven %147 : vector<48x64xf32>
    %cst_69 = arith.constant 0.000000e+00 : f32
    %cst_70 = arith.constant 2.550000e+02 : f32
    %149 = vector.broadcast %cst_69 : f32 to vector<48x64xf32>
    %150 = arith.maximumf %149, %148 : vector<48x64xf32>
    %151 = vector.broadcast %cst_70 : f32 to vector<48x64xf32>
    %152 = arith.minimumf %151, %150 : vector<48x64xf32>
    %153 = vector.broadcast %142 : f32 to vector<48x64xf32>
    %154 = arith.mulf %152, %153 : vector<48x64xf32>
    %155 = vector.broadcast %137 : f32 to vector<48x64xf32>
    %156 = arith.addf %154, %155 : vector<48x64xf32>
    %c4 = arith.constant 4 : index
    %c0_71 = arith.constant 0 : index
    %157 = vector.load %arg3[%c4, %c0_71] : memref<17x64xf32, #tpu.memory_space<vmem>>, vector<1x64xf32>
    %158 = vector.broadcast %157 : vector<1x64xf32> to vector<48x64xf32>
    %159 = arith.mulf %156, %158 : vector<48x64xf32>
    %c5 = arith.constant 5 : index
    %c0_72 = arith.constant 0 : index
    %160 = vector.load %arg3[%c5, %c0_72] : memref<17x64xf32, #tpu.memory_space<vmem>>, vector<1x64xf32>
    %161 = vector.broadcast %160 : vector<1x64xf32> to vector<48x64xf32>
    %162 = arith.addf %159, %161 : vector<48x64xf32>
    %cst_73 = arith.constant 0.000000e+00 : f32
    %163 = vector.broadcast %cst_73 : f32 to vector<48x64xf32>
    %164 = arith.cmpf ogt, %162, %163 : vector<48x64xf32>
    %165 = math.exp %162 : vector<48x64xf32>
    %cst_74 = arith.constant 1.000000e+00 : f32
    %166 = vector.broadcast %cst_74 : f32 to vector<48x64xf32>
    %167 = arith.subf %165, %166 : vector<48x64xf32>
    %168 = arith.select %164, %162, %167 : vector<48x64xi1>, vector<48x64xf32>
    %c0_75 = arith.constant 0 : index
    %c0_76 = arith.constant 0 : index
    %169 = vector.load %arg6[%c0_75, %c0_76] : memref<56x64xf32, #tpu.memory_space<vmem>>, vector<48x64xf32>
    tpu.vector_store %arg6[%c0_75, %c0_76], %168 {strides = array<i32>} : memref<56x64xf32, #tpu.memory_space<vmem>>, vector<48x64xf32>,
    %cst_77 = arith.constant 0.000000e+00 : f32
    %170 = vector.broadcast %cst_77 : f32 to vector<48x64xf32>
    %c0_78 = arith.constant 0 : index
    %c0_79 = arith.constant 0 : index
    %171 = vector.load %arg6[%c0_78, %c0_79] : memref<56x64xf32, #tpu.memory_space<vmem>>, vector<48x64xf32>
    %c160 = arith.constant 160 : index
    %c0_80 = arith.constant 0 : index
    %172 = vector.load %arg2[%c160, %c0_80] : memref<992x64xf32, #tpu.memory_space<vmem>>, vector<64x64xf32>
    %cst_81 = arith.constant dense<0.000000e+00> : vector<48x64xf32>
    %173 = tpu.matmul %171, %172, %cst_81 {dimension_numbers = #tpu.dot_dimension_numbers<[1], [0], [0], [1], [0, 0, 1, 1], [], []>} : vector<48x64xf32>, vector<64x64xf32>, vector<48x64xf32> -> vector<48x64xf32>
    %174 = arith.addf %170, %173 : vector<48x64xf32>
    %c1_82 = arith.constant 1 : index
    %c0_83 = arith.constant 0 : index
    %175 = vector.load %arg6[%c1_82, %c0_83] : memref<56x64xf32, #tpu.memory_space<vmem>>, vector<48x64xf32>
    %c224 = arith.constant 224 : index
    %c0_84 = arith.constant 0 : index
    %176 = vector.load %arg2[%c224, %c0_84] : memref<992x64xf32, #tpu.memory_space<vmem>>, vector<64x64xf32>
    %cst_85 = arith.constant dense<0.000000e+00> : vector<48x64xf32>
    %177 = tpu.matmul %175, %176, %cst_85 {dimension_numbers = #tpu.dot_dimension_numbers<[1], [0], [0], [1], [0, 0, 1, 1], [], []>} : vector<48x64xf32>, vector<64x64xf32>, vector<48x64xf32> -> vector<48x64xf32>
    %178 = arith.addf %174, %177 : vector<48x64xf32>
    %c2_86 = arith.constant 2 : index
    %c0_87 = arith.constant 0 : index
    %179 = vector.load %arg6[%c2_86, %c0_87] : memref<56x64xf32, #tpu.memory_space<vmem>>, vector<48x64xf32>
    %c288 = arith.constant 288 : index
    %c0_88 = arith.constant 0 : index
    %180 = vector.load %arg2[%c288, %c0_88] : memref<992x64xf32, #tpu.memory_space<vmem>>, vector<64x64xf32>
    %cst_89 = arith.constant dense<0.000000e+00> : vector<48x64xf32>
    %181 = tpu.matmul %179, %180, %cst_89 {dimension_numbers = #tpu.dot_dimension_numbers<[1], [0], [0], [1], [0, 0, 1, 1], [], []>} : vector<48x64xf32>, vector<64x64xf32>, vector<48x64xf32> -> vector<48x64xf32>
    %182 = arith.addf %178, %181 : vector<48x64xf32>
    %c6 = arith.constant 6 : index
    %c0_90 = arith.constant 0 : index
    %183 = vector.load %arg3[%c6, %c0_90] : memref<17x64xf32, #tpu.memory_space<vmem>>, vector<1x64xf32>
    %184 = vector.broadcast %183 : vector<1x64xf32> to vector<48x64xf32>
    %185 = arith.addf %182, %184 : vector<48x64xf32>
    %186 = vector.extract_strided_slice %185 {offsets = [0, 0], sizes = [17, 64], strides = [1, 1]} : vector<48x64xf32> to vector<17x64xf32>
    %187 = vector.shape_cast %186 : vector<17x64xf32> to vector<1x17x64xf32>
    %cst_91 = arith.constant dense<0x7F800000> : vector<1xf32>
    %188 = vector.multi_reduction <minimumf>, %187, %cst_91 [1, 2] : vector<1x17x64xf32> to vector<1xf32>
    %189 = vector.shape_cast %188 : vector<1xf32> to vector<1x1x1xf32>
    %190 = vector.extract %189[0, 0, 0] : f32 from vector<1x1x1xf32>
    %191 = vector.extract_strided_slice %185 {offsets = [24, 0], sizes = [17, 64], strides = [1, 1]} : vector<48x64xf32> to vector<17x64xf32>
    %192 = vector.shape_cast %191 : vector<17x64xf32> to vector<1x17x64xf32>
    %cst_92 = arith.constant dense<0x7F800000> : vector<1xf32>
    %193 = vector.multi_reduction <minimumf>, %192, %cst_92 [1, 2] : vector<1x17x64xf32> to vector<1xf32>
    %194 = vector.shape_cast %193 : vector<1xf32> to vector<1x1x1xf32>
    %195 = vector.extract %194[0, 0, 0] : f32 from vector<1x1x1xf32>
    %196 = vector.extract_strided_slice %185 {offsets = [0, 0], sizes = [17, 64], strides = [1, 1]} : vector<48x64xf32> to vector<17x64xf32>
    %197 = vector.shape_cast %196 : vector<17x64xf32> to vector<1x17x64xf32>
    %cst_93 = arith.constant dense<0xFF800000> : vector<1xf32>
    %198 = vector.multi_reduction <maximumf>, %197, %cst_93 [1, 2] : vector<1x17x64xf32> to vector<1xf32>
    %199 = vector.shape_cast %198 : vector<1xf32> to vector<1x1x1xf32>
    %200 = vector.extract %199[0, 0, 0] : f32 from vector<1x1x1xf32>
    %201 = vector.extract_strided_slice %185 {offsets = [24, 0], sizes = [17, 64], strides = [1, 1]} : vector<48x64xf32> to vector<17x64xf32>
    %202 = vector.shape_cast %201 : vector<17x64xf32> to vector<1x17x64xf32>
    %cst_94 = arith.constant dense<0xFF800000> : vector<1xf32>
    %203 = vector.multi_reduction <maximumf>, %202, %cst_94 [1, 2] : vector<1x17x64xf32> to vector<1xf32>
    %204 = vector.shape_cast %203 : vector<1xf32> to vector<1x1x1xf32>
    %205 = vector.extract %204[0, 0, 0] : f32 from vector<1x1x1xf32>
    %206 = arith.minimumf %190, %195 : f32
    %207 = arith.maximumf %200, %205 : f32
    %208 = arith.subf %207, %206 : f32
    %cst_95 = arith.constant 0.000000e+00 : f32
    %209 = arith.cmpf one, %208, %cst_95 : f32
    %cst_96 = arith.constant 2.550000e+02 : f32
    %210 = arith.divf %208, %cst_96 : f32
    %cst_97 = arith.constant 1.000000e+00 : f32
    %211 = arith.select %209, %210, %cst_97 : f32
    %cst_98 = arith.constant 1.000000e+00 : f32
    %212 = arith.divf %cst_98, %211 : f32
    %213 = vector.broadcast %206 : f32 to vector<48x64xf32>
    %214 = arith.subf %185, %213 : vector<48x64xf32>
    %215 = vector.broadcast %212 : f32 to vector<48x64xf32>
    %216 = arith.mulf %214, %215 : vector<48x64xf32>
    %217 = math.roundeven %216 : vector<48x64xf32>
    %cst_99 = arith.constant 0.000000e+00 : f32
    %cst_100 = arith.constant 2.550000e+02 : f32
    %218 = vector.broadcast %cst_99 : f32 to vector<48x64xf32>
    %219 = arith.maximumf %218, %217 : vector<48x64xf32>
    %220 = vector.broadcast %cst_100 : f32 to vector<48x64xf32>
    %221 = arith.minimumf %220, %219 : vector<48x64xf32>
    %222 = vector.broadcast %211 : f32 to vector<48x64xf32>
    %223 = arith.mulf %221, %222 : vector<48x64xf32>
    %224 = vector.broadcast %206 : f32 to vector<48x64xf32>
    %225 = arith.addf %223, %224 : vector<48x64xf32>
    %c7 = arith.constant 7 : index
    %c0_101 = arith.constant 0 : index
    %226 = vector.load %arg3[%c7, %c0_101] : memref<17x64xf32, #tpu.memory_space<vmem>>, vector<1x64xf32>
    %227 = vector.broadcast %226 : vector<1x64xf32> to vector<48x64xf32>
    %228 = arith.mulf %225, %227 : vector<48x64xf32>
    %c8 = arith.constant 8 : index
    %c0_102 = arith.constant 0 : index
    %229 = vector.load %arg3[%c8, %c0_102] : memref<17x64xf32, #tpu.memory_space<vmem>>, vector<1x64xf32>
    %230 = vector.broadcast %229 : vector<1x64xf32> to vector<48x64xf32>
    %231 = arith.addf %228, %230 : vector<48x64xf32>
    %cst_103 = arith.constant 0.000000e+00 : f32
    %232 = vector.broadcast %cst_103 : f32 to vector<48x64xf32>
    %233 = arith.cmpf ogt, %231, %232 : vector<48x64xf32>
    %234 = math.exp %231 : vector<48x64xf32>
    %cst_104 = arith.constant 1.000000e+00 : f32
    %235 = vector.broadcast %cst_104 : f32 to vector<48x64xf32>
    %236 = arith.subf %234, %235 : vector<48x64xf32>
    %237 = arith.select %233, %231, %236 : vector<48x64xi1>, vector<48x64xf32>
    %c0_105 = arith.constant 0 : index
    %c0_106 = arith.constant 0 : index
    %238 = vector.load %arg7[%c0_105, %c0_106] : memref<56x64xf32, #tpu.memory_space<vmem>>, vector<48x64xf32>
    tpu.vector_store %arg7[%c0_105, %c0_106], %237 {strides = array<i32>} : memref<56x64xf32, #tpu.memory_space<vmem>>, vector<48x64xf32>,
    %cst_107 = arith.constant 0.000000e+00 : f32
    %239 = vector.broadcast %cst_107 : f32 to vector<48x64xf32>
    %c0_108 = arith.constant 0 : index
    %c0_109 = arith.constant 0 : index
    %240 = vector.load %arg7[%c0_108, %c0_109] : memref<56x64xf32, #tpu.memory_space<vmem>>, vector<48x64xf32>
    %c352 = arith.constant 352 : index
    %c0_110 = arith.constant 0 : index
    %241 = vector.load %arg2[%c352, %c0_110] : memref<992x64xf32, #tpu.memory_space<vmem>>, vector<64x64xf32>
    %cst_111 = arith.constant dense<0.000000e+00> : vector<48x64xf32>
    %242 = tpu.matmul %240, %241, %cst_111 {dimension_numbers = #tpu.dot_dimension_numbers<[1], [0], [0], [1], [0, 0, 1, 1], [], []>} : vector<48x64xf32>, vector<64x64xf32>, vector<48x64xf32> -> vector<48x64xf32>
    %243 = arith.addf %239, %242 : vector<48x64xf32>
    %c1_112 = arith.constant 1 : index
    %c0_113 = arith.constant 0 : index
    %244 = vector.load %arg7[%c1_112, %c0_113] : memref<56x64xf32, #tpu.memory_space<vmem>>, vector<48x64xf32>
    %c416 = arith.constant 416 : index
    %c0_114 = arith.constant 0 : index
    %245 = vector.load %arg2[%c416, %c0_114] : memref<992x64xf32, #tpu.memory_space<vmem>>, vector<64x64xf32>
    %cst_115 = arith.constant dense<0.000000e+00> : vector<48x64xf32>
    %246 = tpu.matmul %244, %245, %cst_115 {dimension_numbers = #tpu.dot_dimension_numbers<[1], [0], [0], [1], [0, 0, 1, 1], [], []>} : vector<48x64xf32>, vector<64x64xf32>, vector<48x64xf32> -> vector<48x64xf32>
    %247 = arith.addf %243, %246 : vector<48x64xf32>
    %c2_116 = arith.constant 2 : index
    %c0_117 = arith.constant 0 : index
    %248 = vector.load %arg7[%c2_116, %c0_117] : memref<56x64xf32, #tpu.memory_space<vmem>>, vector<48x64xf32>
    %c480 = arith.constant 480 : index
    %c0_118 = arith.constant 0 : index
    %249 = vector.load %arg2[%c480, %c0_118] : memref<992x64xf32, #tpu.memory_space<vmem>>, vector<64x64xf32>
    %cst_119 = arith.constant dense<0.000000e+00> : vector<48x64xf32>
    %250 = tpu.matmul %248, %249, %cst_119 {dimension_numbers = #tpu.dot_dimension_numbers<[1], [0], [0], [1], [0, 0, 1, 1], [], []>} : vector<48x64xf32>, vector<64x64xf32>, vector<48x64xf32> -> vector<48x64xf32>
    %251 = arith.addf %247, %250 : vector<48x64xf32>
    %c9 = arith.constant 9 : index
    %c0_120 = arith.constant 0 : index
    %252 = vector.load %arg3[%c9, %c0_120] : memref<17x64xf32, #tpu.memory_space<vmem>>, vector<1x64xf32>
    %253 = vector.broadcast %252 : vector<1x64xf32> to vector<48x64xf32>
    %254 = arith.addf %251, %253 : vector<48x64xf32>
    %255 = vector.extract_strided_slice %254 {offsets = [0, 0], sizes = [15, 64], strides = [1, 1]} : vector<48x64xf32> to vector<15x64xf32>
    %256 = vector.shape_cast %255 : vector<15x64xf32> to vector<1x15x64xf32>
    %cst_121 = arith.constant dense<0x7F800000> : vector<1xf32>
    %257 = vector.multi_reduction <minimumf>, %256, %cst_121 [1, 2] : vector<1x15x64xf32> to vector<1xf32>
    %258 = vector.shape_cast %257 : vector<1xf32> to vector<1x1x1xf32>
    %259 = vector.extract %258[0, 0, 0] : f32 from vector<1x1x1xf32>
    %260 = vector.extract_strided_slice %254 {offsets = [24, 0], sizes = [15, 64], strides = [1, 1]} : vector<48x64xf32> to vector<15x64xf32>
    %261 = vector.shape_cast %260 : vector<15x64xf32> to vector<1x15x64xf32>
    %cst_122 = arith.constant dense<0x7F800000> : vector<1xf32>
    %262 = vector.multi_reduction <minimumf>, %261, %cst_122 [1, 2] : vector<1x15x64xf32> to vector<1xf32>
    %263 = vector.shape_cast %262 : vector<1xf32> to vector<1x1x1xf32>
    %264 = vector.extract %263[0, 0, 0] : f32 from vector<1x1x1xf32>
    %265 = vector.extract_strided_slice %254 {offsets = [0, 0], sizes = [15, 64], strides = [1, 1]} : vector<48x64xf32> to vector<15x64xf32>
    %266 = vector.shape_cast %265 : vector<15x64xf32> to vector<1x15x64xf32>
    %cst_123 = arith.constant dense<0xFF800000> : vector<1xf32>
    %267 = vector.multi_reduction <maximumf>, %266, %cst_123 [1, 2] : vector<1x15x64xf32> to vector<1xf32>
    %268 = vector.shape_cast %267 : vector<1xf32> to vector<1x1x1xf32>
    %269 = vector.extract %268[0, 0, 0] : f32 from vector<1x1x1xf32>
    %270 = vector.extract_strided_slice %254 {offsets = [24, 0], sizes = [15, 64], strides = [1, 1]} : vector<48x64xf32> to vector<15x64xf32>
    %271 = vector.shape_cast %270 : vector<15x64xf32> to vector<1x15x64xf32>
    %cst_124 = arith.constant dense<0xFF800000> : vector<1xf32>
    %272 = vector.multi_reduction <maximumf>, %271, %cst_124 [1, 2] : vector<1x15x64xf32> to vector<1xf32>
    %273 = vector.shape_cast %272 : vector<1xf32> to vector<1x1x1xf32>
    %274 = vector.extract %273[0, 0, 0] : f32 from vector<1x1x1xf32>
    %275 = arith.minimumf %259, %264 : f32
    %276 = arith.maximumf %269, %274 : f32
    %277 = arith.subf %276, %275 : f32
    %cst_125 = arith.constant 0.000000e+00 : f32
    %278 = arith.cmpf one, %277, %cst_125 : f32
    %cst_126 = arith.constant 2.550000e+02 : f32
    %279 = arith.divf %277, %cst_126 : f32
    %cst_127 = arith.constant 1.000000e+00 : f32
    %280 = arith.select %278, %279, %cst_127 : f32
    %cst_128 = arith.constant 1.000000e+00 : f32
    %281 = arith.divf %cst_128, %280 : f32
    %282 = vector.broadcast %275 : f32 to vector<48x64xf32>
    %283 = arith.subf %254, %282 : vector<48x64xf32>
    %284 = vector.broadcast %281 : f32 to vector<48x64xf32>
    %285 = arith.mulf %283, %284 : vector<48x64xf32>
    %286 = math.roundeven %285 : vector<48x64xf32>
    %cst_129 = arith.constant 0.000000e+00 : f32
    %cst_130 = arith.constant 2.550000e+02 : f32
    %287 = vector.broadcast %cst_129 : f32 to vector<48x64xf32>
    %288 = arith.maximumf %287, %286 : vector<48x64xf32>
    %289 = vector.broadcast %cst_130 : f32 to vector<48x64xf32>
    %290 = arith.minimumf %289, %288 : vector<48x64xf32>
    %291 = vector.broadcast %280 : f32 to vector<48x64xf32>
    %292 = arith.mulf %290, %291 : vector<48x64xf32>
    %293 = vector.broadcast %275 : f32 to vector<48x64xf32>
    %294 = arith.addf %292, %293 : vector<48x64xf32>
    %c10 = arith.constant 10 : index
    %c0_131 = arith.constant 0 : index
    %295 = vector.load %arg3[%c10, %c0_131] : memref<17x64xf32, #tpu.memory_space<vmem>>, vector<1x64xf32>
    %296 = vector.broadcast %295 : vector<1x64xf32> to vector<48x64xf32>
    %297 = arith.mulf %294, %296 : vector<48x64xf32>
    %c11 = arith.constant 11 : index
    %c0_132 = arith.constant 0 : index
    %298 = vector.load %arg3[%c11, %c0_132] : memref<17x64xf32, #tpu.memory_space<vmem>>, vector<1x64xf32>
    %299 = vector.broadcast %298 : vector<1x64xf32> to vector<48x64xf32>
    %300 = arith.addf %297, %299 : vector<48x64xf32>
    %cst_133 = arith.constant 0.000000e+00 : f32
    %301 = vector.broadcast %cst_133 : f32 to vector<48x64xf32>
    %302 = arith.cmpf ogt, %300, %301 : vector<48x64xf32>
    %303 = math.exp %300 : vector<48x64xf32>
    %cst_134 = arith.constant 1.000000e+00 : f32
    %304 = vector.broadcast %cst_134 : f32 to vector<48x64xf32>
    %305 = arith.subf %303, %304 : vector<48x64xf32>
    %306 = arith.select %302, %300, %305 : vector<48x64xi1>, vector<48x64xf32>
    %cst_135 = arith.constant 0.000000e+00 : f32
    %307 = vector.broadcast %cst_135 : f32 to vector<48x64xf32>
    %308 = arith.cmpf ogt, %306, %307 : vector<48x64xf32>
    %309 = math.exp %306 : vector<48x64xf32>
    %cst_136 = arith.constant 1.000000e+00 : f32
    %310 = vector.broadcast %cst_136 : f32 to vector<48x64xf32>
    %311 = arith.subf %309, %310 : vector<48x64xf32>
    %312 = arith.select %308, %306, %311 : vector<48x64xi1>, vector<48x64xf32>
    %c0_137 = arith.constant 0 : index
    %c0_138 = arith.constant 0 : index
    %313 = vector.load %arg8[%c0_137, %c0_138] : memref<56x64xf32, #tpu.memory_space<vmem>>, vector<48x64xf32>
    tpu.vector_store %arg8[%c0_137, %c0_138], %312 {strides = array<i32>} : memref<56x64xf32, #tpu.memory_space<vmem>>, vector<48x64xf32>,
    %cst_139 = arith.constant 0.000000e+00 : f32
    %314 = vector.broadcast %cst_139 : f32 to vector<48x64xf32>
    %c0_140 = arith.constant 0 : index
    %c0_141 = arith.constant 0 : index
    %315 = vector.load %arg8[%c0_140, %c0_141] : memref<56x64xf32, #tpu.memory_space<vmem>>, vector<48x64xf32>
    %c544 = arith.constant 544 : index
    %c0_142 = arith.constant 0 : index
    %316 = vector.load %arg2[%c544, %c0_142] : memref<992x64xf32, #tpu.memory_space<vmem>>, vector<64x64xf32>
    %cst_143 = arith.constant dense<0.000000e+00> : vector<48x64xf32>
    %317 = tpu.matmul %315, %316, %cst_143 {dimension_numbers = #tpu.dot_dimension_numbers<[1], [0], [0], [1], [0, 0, 1, 1], [], []>} : vector<48x64xf32>, vector<64x64xf32>, vector<48x64xf32> -> vector<48x64xf32>
    %318 = arith.addf %314, %317 : vector<48x64xf32>
    %c1_144 = arith.constant 1 : index
    %c0_145 = arith.constant 0 : index
    %319 = vector.load %arg8[%c1_144, %c0_145] : memref<56x64xf32, #tpu.memory_space<vmem>>, vector<48x64xf32>
    %c608 = arith.constant 608 : index
    %c0_146 = arith.constant 0 : index
    %320 = vector.load %arg2[%c608, %c0_146] : memref<992x64xf32, #tpu.memory_space<vmem>>, vector<64x64xf32>
    %cst_147 = arith.constant dense<0.000000e+00> : vector<48x64xf32>
    %321 = tpu.matmul %319, %320, %cst_147 {dimension_numbers = #tpu.dot_dimension_numbers<[1], [0], [0], [1], [0, 0, 1, 1], [], []>} : vector<48x64xf32>, vector<64x64xf32>, vector<48x64xf32> -> vector<48x64xf32>
    %322 = arith.addf %318, %321 : vector<48x64xf32>
    %c2_148 = arith.constant 2 : index
    %c0_149 = arith.constant 0 : index
    %323 = vector.load %arg8[%c2_148, %c0_149] : memref<56x64xf32, #tpu.memory_space<vmem>>, vector<48x64xf32>
    %c672 = arith.constant 672 : index
    %c0_150 = arith.constant 0 : index
    %324 = vector.load %arg2[%c672, %c0_150] : memref<992x64xf32, #tpu.memory_space<vmem>>, vector<64x64xf32>
    %cst_151 = arith.constant dense<0.000000e+00> : vector<48x64xf32>
    %325 = tpu.matmul %323, %324, %cst_151 {dimension_numbers = #tpu.dot_dimension_numbers<[1], [0], [0], [1], [0, 0, 1, 1], [], []>} : vector<48x64xf32>, vector<64x64xf32>, vector<48x64xf32> -> vector<48x64xf32>
    %326 = arith.addf %322, %325 : vector<48x64xf32>
    %c12 = arith.constant 12 : index
    %c0_152 = arith.constant 0 : index
    %327 = vector.load %arg3[%c12, %c0_152] : memref<17x64xf32, #tpu.memory_space<vmem>>, vector<1x64xf32>
    %328 = vector.broadcast %327 : vector<1x64xf32> to vector<48x64xf32>
    %329 = arith.addf %326, %328 : vector<48x64xf32>
    %330 = vector.extract_strided_slice %329 {offsets = [0, 0], sizes = [13, 64], strides = [1, 1]} : vector<48x64xf32> to vector<13x64xf32>
    %331 = vector.shape_cast %330 : vector<13x64xf32> to vector<1x13x64xf32>
    %cst_153 = arith.constant dense<0x7F800000> : vector<1xf32>
    %332 = vector.multi_reduction <minimumf>, %331, %cst_153 [1, 2] : vector<1x13x64xf32> to vector<1xf32>
    %333 = vector.shape_cast %332 : vector<1xf32> to vector<1x1x1xf32>
    %334 = vector.extract %333[0, 0, 0] : f32 from vector<1x1x1xf32>
    %335 = vector.extract_strided_slice %329 {offsets = [24, 0], sizes = [13, 64], strides = [1, 1]} : vector<48x64xf32> to vector<13x64xf32>
    %336 = vector.shape_cast %335 : vector<13x64xf32> to vector<1x13x64xf32>
    %cst_154 = arith.constant dense<0x7F800000> : vector<1xf32>
    %337 = vector.multi_reduction <minimumf>, %336, %cst_154 [1, 2] : vector<1x13x64xf32> to vector<1xf32>
    %338 = vector.shape_cast %337 : vector<1xf32> to vector<1x1x1xf32>
    %339 = vector.extract %338[0, 0, 0] : f32 from vector<1x1x1xf32>
    %340 = vector.extract_strided_slice %329 {offsets = [0, 0], sizes = [13, 64], strides = [1, 1]} : vector<48x64xf32> to vector<13x64xf32>
    %341 = vector.shape_cast %340 : vector<13x64xf32> to vector<1x13x64xf32>
    %cst_155 = arith.constant dense<0xFF800000> : vector<1xf32>
    %342 = vector.multi_reduction <maximumf>, %341, %cst_155 [1, 2] : vector<1x13x64xf32> to vector<1xf32>
    %343 = vector.shape_cast %342 : vector<1xf32> to vector<1x1x1xf32>
    %344 = vector.extract %343[0, 0, 0] : f32 from vector<1x1x1xf32>
    %345 = vector.extract_strided_slice %329 {offsets = [24, 0], sizes = [13, 64], strides = [1, 1]} : vector<48x64xf32> to vector<13x64xf32>
    %346 = vector.shape_cast %345 : vector<13x64xf32> to vector<1x13x64xf32>
    %cst_156 = arith.constant dense<0xFF800000> : vector<1xf32>
    %347 = vector.multi_reduction <maximumf>, %346, %cst_156 [1, 2] : vector<1x13x64xf32> to vector<1xf32>
    %348 = vector.shape_cast %347 : vector<1xf32> to vector<1x1x1xf32>
    %349 = vector.extract %348[0, 0, 0] : f32 from vector<1x1x1xf32>
    %350 = arith.minimumf %334, %339 : f32
    %351 = arith.maximumf %344, %349 : f32
    %352 = arith.subf %351, %350 : f32
    %cst_157 = arith.constant 0.000000e+00 : f32
    %353 = arith.cmpf one, %352, %cst_157 : f32
    %cst_158 = arith.constant 2.550000e+02 : f32
    %354 = arith.divf %352, %cst_158 : f32
    %cst_159 = arith.constant 1.000000e+00 : f32
    %355 = arith.select %353, %354, %cst_159 : f32
    %cst_160 = arith.constant 1.000000e+00 : f32
    %356 = arith.divf %cst_160, %355 : f32
    %357 = vector.broadcast %350 : f32 to vector<48x64xf32>
    %358 = arith.subf %329, %357 : vector<48x64xf32>
    %359 = vector.broadcast %356 : f32 to vector<48x64xf32>
    %360 = arith.mulf %358, %359 : vector<48x64xf32>
    %361 = math.roundeven %360 : vector<48x64xf32>
    %cst_161 = arith.constant 0.000000e+00 : f32
    %cst_162 = arith.constant 2.550000e+02 : f32
    %362 = vector.broadcast %cst_161 : f32 to vector<48x64xf32>
    %363 = arith.maximumf %362, %361 : vector<48x64xf32>
    %364 = vector.broadcast %cst_162 : f32 to vector<48x64xf32>
    %365 = arith.minimumf %364, %363 : vector<48x64xf32>
    %366 = vector.broadcast %355 : f32 to vector<48x64xf32>
    %367 = arith.mulf %365, %366 : vector<48x64xf32>
    %368 = vector.broadcast %350 : f32 to vector<48x64xf32>
    %369 = arith.addf %367, %368 : vector<48x64xf32>
    %c13 = arith.constant 13 : index
    %c0_163 = arith.constant 0 : index
    %370 = vector.load %arg3[%c13, %c0_163] : memref<17x64xf32, #tpu.memory_space<vmem>>, vector<1x64xf32>
    %371 = vector.broadcast %370 : vector<1x64xf32> to vector<48x64xf32>
    %372 = arith.mulf %369, %371 : vector<48x64xf32>
    %c14 = arith.constant 14 : index
    %c0_164 = arith.constant 0 : index
    %373 = vector.load %arg3[%c14, %c0_164] : memref<17x64xf32, #tpu.memory_space<vmem>>, vector<1x64xf32>
    %374 = vector.broadcast %373 : vector<1x64xf32> to vector<48x64xf32>
    %375 = arith.addf %372, %374 : vector<48x64xf32>
    %cst_165 = arith.constant 0.000000e+00 : f32
    %376 = vector.broadcast %cst_165 : f32 to vector<48x64xf32>
    %377 = arith.cmpf ogt, %375, %376 : vector<48x64xf32>
    %378 = math.exp %375 : vector<48x64xf32>
    %cst_166 = arith.constant 1.000000e+00 : f32
    %379 = vector.broadcast %cst_166 : f32 to vector<48x64xf32>
    %380 = arith.subf %378, %379 : vector<48x64xf32>
    %381 = arith.select %377, %375, %380 : vector<48x64xi1>, vector<48x64xf32>
    %c0_167 = arith.constant 0 : index
    %c0_168 = arith.constant 0 : index
    %382 = vector.load %arg9[%c0_167, %c0_168] : memref<56x64xf32, #tpu.memory_space<vmem>>, vector<48x64xf32>
    tpu.vector_store %arg9[%c0_167, %c0_168], %381 {strides = array<i32>} : memref<56x64xf32, #tpu.memory_space<vmem>>, vector<48x64xf32>,
    %cst_169 = arith.constant 0.000000e+00 : f32
    %383 = vector.broadcast %cst_169 : f32 to vector<48x64xf32>
    %c0_170 = arith.constant 0 : index
    %c0_171 = arith.constant 0 : index
    %384 = vector.load %arg9[%c0_170, %c0_171] : memref<56x64xf32, #tpu.memory_space<vmem>>, vector<48x64xf32>
    %c736 = arith.constant 736 : index
    %c0_172 = arith.constant 0 : index
    %385 = vector.load %arg2[%c736, %c0_172] : memref<992x64xf32, #tpu.memory_space<vmem>>, vector<64x64xf32>
    %cst_173 = arith.constant dense<0.000000e+00> : vector<48x64xf32>
    %386 = tpu.matmul %384, %385, %cst_173 {dimension_numbers = #tpu.dot_dimension_numbers<[1], [0], [0], [1], [0, 0, 1, 1], [], []>} : vector<48x64xf32>, vector<64x64xf32>, vector<48x64xf32> -> vector<48x64xf32>
    %387 = arith.addf %383, %386 : vector<48x64xf32>
    %c1_174 = arith.constant 1 : index
    %c0_175 = arith.constant 0 : index
    %388 = vector.load %arg9[%c1_174, %c0_175] : memref<56x64xf32, #tpu.memory_space<vmem>>, vector<48x64xf32>
    %c800 = arith.constant 800 : index
    %c0_176 = arith.constant 0 : index
    %389 = vector.load %arg2[%c800, %c0_176] : memref<992x64xf32, #tpu.memory_space<vmem>>, vector<64x64xf32>
    %cst_177 = arith.constant dense<0.000000e+00> : vector<48x64xf32>
    %390 = tpu.matmul %388, %389, %cst_177 {dimension_numbers = #tpu.dot_dimension_numbers<[1], [0], [0], [1], [0, 0, 1, 1], [], []>} : vector<48x64xf32>, vector<64x64xf32>, vector<48x64xf32> -> vector<48x64xf32>
    %391 = arith.addf %387, %390 : vector<48x64xf32>
    %c2_178 = arith.constant 2 : index
    %c0_179 = arith.constant 0 : index
    %392 = vector.load %arg9[%c2_178, %c0_179] : memref<56x64xf32, #tpu.memory_space<vmem>>, vector<48x64xf32>
    %c864 = arith.constant 864 : index
    %c0_180 = arith.constant 0 : index
    %393 = vector.load %arg2[%c864, %c0_180] : memref<992x64xf32, #tpu.memory_space<vmem>>, vector<64x64xf32>
    %cst_181 = arith.constant dense<0.000000e+00> : vector<48x64xf32>
    %394 = tpu.matmul %392, %393, %cst_181 {dimension_numbers = #tpu.dot_dimension_numbers<[1], [0], [0], [1], [0, 0, 1, 1], [], []>} : vector<48x64xf32>, vector<64x64xf32>, vector<48x64xf32> -> vector<48x64xf32>
    %395 = arith.addf %391, %394 : vector<48x64xf32>
    %c15 = arith.constant 15 : index
    %c0_182 = arith.constant 0 : index
    %396 = vector.load %arg3[%c15, %c0_182] : memref<17x64xf32, #tpu.memory_space<vmem>>, vector<1x64xf32>
    %397 = vector.broadcast %396 : vector<1x64xf32> to vector<48x64xf32>
    %398 = arith.addf %395, %397 : vector<48x64xf32>
    %399 = vector.extract_strided_slice %398 {offsets = [0, 0], sizes = [11, 64], strides = [1, 1]} : vector<48x64xf32> to vector<11x64xf32>
    %cst_183 = arith.constant dense<0.000000e+00> : vector<64xf32>
    %400 = vector.multi_reduction <add>, %399, %cst_183 [0] : vector<11x64xf32> to vector<64xf32>
    %401 = vector.shape_cast %400 : vector<64xf32> to vector<1x64xf32>
    %cst_184 = arith.constant 0.0909090936 : f32
    %402 = vector.broadcast %cst_184 : f32 to vector<1x64xf32>
    %403 = arith.mulf %401, %402 : vector<1x64xf32>
    %404 = vector.extract_strided_slice %398 {offsets = [24, 0], sizes = [11, 64], strides = [1, 1]} : vector<48x64xf32> to vector<11x64xf32>
    %cst_185 = arith.constant dense<0.000000e+00> : vector<64xf32>
    %405 = vector.multi_reduction <add>, %404, %cst_185 [0] : vector<11x64xf32> to vector<64xf32>
    %406 = vector.shape_cast %405 : vector<64xf32> to vector<1x64xf32>
    %cst_186 = arith.constant 0.0909090936 : f32
    %407 = vector.broadcast %cst_186 : f32 to vector<1x64xf32>
    %408 = arith.mulf %406, %407 : vector<1x64xf32>
    %409 = tpu.concatenate %403, %408 in 0 : vector<1x64xf32>, vector<1x64xf32> -> vector<2x64xf32>
    %c928 = arith.constant 928 : index
    %c0_187 = arith.constant 0 : index
    %410 = vector.load %arg2[%c928, %c0_187] : memref<992x64xf32, #tpu.memory_space<vmem>>, vector<64x8xf32>
    %cst_188 = arith.constant dense<0.000000e+00> : vector<2x8xf32>
    %411 = tpu.matmul %409, %410, %cst_188 {dimension_numbers = #tpu.dot_dimension_numbers<[1], [0], [0], [1], [0, 0, 1, 1], [], []>} : vector<2x64xf32>, vector<64x8xf32>, vector<2x8xf32> -> vector<2x8xf32>
    %c16 = arith.constant 16 : index
    %c0_189 = arith.constant 0 : index
    %412 = vector.load %arg3[%c16, %c0_189] : memref<17x64xf32, #tpu.memory_space<vmem>>, vector<1x8xf32>
    %413 = vector.broadcast %412 : vector<1x8xf32> to vector<2x8xf32>
    %414 = arith.addf %411, %413 : vector<2x8xf32>
    %c0_190 = arith.constant 0 : index
    %c0_191 = arith.constant 0 : index
    %415 = vector.load %arg4[%c0_190, %c0_191] : memref<2x8xf32, #tpu.memory_space<vmem>>, vector<2x8xf32>
    tpu.vector_store %arg4[%c0_190, %c0_191], %414 {strides = array<i32>} : memref<2x8xf32, #tpu.memory_space<vmem>>, vector<2x8xf32>,
    return
  }
}

</mosaic_0001>

<bundles_post_ra>
// kernel: model_forward.1
= control target key start
LH: loop header
LB: loop body
LE: loop exit
PB: predicated region body
PF: predicated region fallthrough
CT: control target
= control target key end

     0   :  { %vm142_vm0 = vcmask 1043456   ;;  %vm105_vm1 = vcmask 97280   ;;  %s4972_s0 = inlined_call_operand.vmem [shape: f32[96,140], index: 0, kind: input, shape index: {}]   ;;  %s4973_s1 = inlined_call_operand.vmem [shape: f32[140,32], index: 1, kind: input, shape index: {}]   ;;  %s4974_s2 = inlined_call_operand.vmem [shape: f32[992,64], index: 2, kind: input, shape index: {}]   ;;  %s4975_s3 = inlined_call_operand.vmem [shape: f32[17,64], index: 3, kind: input, shape index: {}]   ;;  %s4976_s4 = inlined_call_operand.hbm [shape: f32[2,8], index: 4, kind: output, shape index: {}]  }
   0x1   :  { %v100_v0 = vld [vmem:[%s4973_s1 + $0x78] sm:$0xff]  ;;  %v99_v1 = vld [vmem:[%s4973_s1 + $0x70] sm:$0xff]  ;;  %v98_v2 = vld [vmem:[%s4973_s1 + $0x68] sm:$0xff] }
   0x2   :  { %146 = vmatpush.msra.mxu0 %v100_v0  ;;  %v97_v3 = vld [vmem:[%s4973_s1 + $0x60] sm:$0xff]  ;;  %v102_v4 = vld [vmem:[%s4973_s1 + $0x88] sm:$0xf]  ;;  %v96_v5 = vld [vmem:[%s4973_s1 + $0x58] sm:$0xff] }
   0x3   :  { %2601 = vmatpush.msk.msra.mxu1 %vm142_vm0, %v102_v4  ;;  %v101_v6 = vld [vmem:[%s4973_s1 + $0x80] sm:$0xff]  ;;  %v62_v7 = vld [vmem:[%s4972_s0 + $0x8] sm:$0xff]  ;;  %2759 = vmatpush.msk.msra.mxu3 %vm142_vm0, %v102_v4  ;;  %v95_v8 = vld [vmem:[%s4973_s1 + $0x50] sm:$0xff] }
   0x4   :  { %147 = vmatpush.msra.mxu0 %v99_v1  ;;  %v94_v9 = vld [vmem:[%s4973_s1 + $0x48] sm:$0xff]  ;;  %v93_v10 = vld [vmem:[%s4973_s1 + $0x40] sm:$0xff] }
   0x5   :  { %214 = vmatpush.msra.mxu1 %v101_v6  ;;  %2760 = vmatpush.msra.mxu3 %v101_v6 }
   0x6   :  { %148 = vmatpush.msra.mxu0 %v98_v2  ;;  %2602 = vmatmul.msk.f32.vlgmr.msra.gmra.mxu1 %vm105_vm1, %v62_v7 }
   0x8   :  { %149 = vmatpush.msra.mxu0 %v97_v3 }
   0xa   :  { %150 = vmatpush.msra.mxu0 %v96_v5 }
   0xc   :  { %151 = vmatpush.msra.mxu0 %v95_v8 }
   0xe   :  { %152 = vmatpush.msra.mxu0 %v94_v9 }
   0xf   :  { %9 = vsyncpa [#allocation8], 0  ;;  %v92_v11 = vld [vmem:[%s4973_s1 + $0x38] sm:$0xff]  ;;  %v91_v13 = vld [vmem:[%s4973_s1 + $0x30] sm:$0xff]  ;;  %vm18_vm2 = vcmask 261120   ;;  %vm254_vm3 = vcmask 258048  }
  0x10   :  { %v64_v12 = vld [vmem:[%s4972_s0 + $0x18] sm:$0xff]  ;;  %153 = vmatpush.msra.mxu0 %v93_v10  ;;  %v90_v14 = vld [vmem:[%s4973_s1 + $0x28] sm:$0xff]  ;;  %v89_v15 = vld [vmem:[%s4973_s1 + $0x20] sm:$0xff]  ;;  %vm283_vm4 = vcmask 257024  }
  0x11   :  { %2603 = vmatmul.msk.f32.gmra.mxu1 %vm105_vm1, %v64_v12  ;;  %v88_v16 = vld [vmem:[%s4973_s1 + $0x18] sm:$0xff]  ;;  %v66_v17 = vld [vmem:[%s4972_s0 + $0x28] sm:$0xff]  ;;  %v87_v18 = vld [vmem:[%s4973_s1 + $0x10] sm:$0xff] }
  0x12   :  { %154 = vmatpush.msra.mxu0 %v92_v11  ;;  %v86_v19 = vld [vmem:[%s4973_s1 + $0x8] sm:$0xff]  ;;  %v85_v20 = vld [vmem:[%s4973_s1] sm:$0xff]  ;;  %v68_v22 = vld [vmem:[%s4972_s0 + $0x38] sm:$0xff] }
  0x13   :  { %v61_v21 = vld [vmem:[%s4972_s0] sm:$0xff]  ;;  %v63_v23 = vld [vmem:[%s4972_s0 + $0x10] sm:$0xff]  ;;  %v70_v24 = vld [vmem:[%s4972_s0 + $0x48] sm:$0xff] }
  0x14   :  { %155 = vmatpush.msra.mxu0 %v91_v13  ;;  %v65_v25 = vld [vmem:[%s4972_s0 + $0x20] sm:$0xff]  ;;  %v72_v26 = vld [vmem:[%s4972_s0 + $0x58] sm:$0xff]  ;;  %v67_v27 = vld [vmem:[%s4972_s0 + $0x30] sm:$0xff] }
  0x15   :  { %v74_v28 = vld [vmem:[%s4972_s0 + $0x68] sm:$0xff]  ;;  %v69_v29 = vld [vmem:[%s4972_s0 + $0x40] sm:$0xff]  ;;  %v76_v30 = vld [vmem:[%s4972_s0 + $0x78] sm:$0xff] }
  0x16   :  { %156 = vmatpush.msra.mxu0 %v90_v14  ;;  %v80_v31 = vld [vmem:[%s4972_s0 + $0x98] sm:$0xff]  ;;  %v71_v32 = vld [vmem:[%s4972_s0 + $0x50] sm:$0xff]  ;;  %v78_v33 = vld [vmem:[%s4972_s0 + $0x88] sm:$0xff] }
  0x17   :  { %2611 = vmatmul.msk.f32.vlgmr.msra.gmra.mxu3 %vm105_vm1, %v80_v31  ;;  %v82_v34 = vld [vmem:[%s4972_s0 + $0xa8] sm:$0xff]  ;;  %v73_v35 = vld [vmem:[%s4972_s0 + $0x60] sm:$0xff]  ;;  %v84_v36 = vld [vmem:[%s4972_s0 + $0xb8] sm:$0xff] }
  0x18   :  { %157 = vmatpush.msra.mxu0 %v89_v15  ;;  %v75_v37 = vld [vmem:[%s4972_s0 + $0x70] sm:$0xff]  ;;  %v77_v38 = vld [vmem:[%s4972_s0 + $0x80] sm:$0xff] }
  0x19   :  { %2604 = vmatmul.msk.f32.gmra.mxu1 %vm105_vm1, %v66_v17  ;;  %v79_v39 = vld [vmem:[%s4972_s0 + $0x90] sm:$0xff]  ;;  %v81_v40 = vld [vmem:[%s4972_s0 + $0xa0] sm:$0xff] }
  0x1a   :  { %158 = vmatpush.msra.mxu0 %v88_v16  ;;  %v83_v41 = vld [vmem:[%s4972_s0 + $0xb0] sm:$0xff]  ;;  %v3420_v46 = vld [vmem:[%s4975_s3] ss:$0 sm:$0xff] }
  0x1c   :  { %159 = vmatpush.msra.mxu0 %v87_v18 }
  0x1e   :  { %160 = vmatpush.msra.mxu0 %v86_v19 }
  0x1f   :  { %2612 = vmatmul.msk.f32.gmra.mxu3 %vm105_vm1, %v82_v34 }
  0x20   :  { %161 = vmatpush.msra.mxu0 %v85_v20 }
  0x21   :  { %162 = vmatmul.f32.vlgmr.msra.gmra.mxu0 %v61_v21  ;;  %2605 = vmatmul.msk.f32.gmra.mxu1 %vm105_vm1, %v68_v22 }
  0x27   :  { %2613 = vmatmul.msk.f32.gmra.mxu3 %vm105_vm1, %v84_v36 }
  0x29   :  { %165 = vmatmul.f32.gmra.mxu0 %v63_v23  ;;  %2606 = vmatmul.msk.f32.gmra.mxu1 %vm105_vm1, %v70_v24 }
  0x31   :  { %168 = vmatmul.f32.gmra.mxu0 %v65_v25  ;;  %2607 = vmatmul.msk.f32.gmra.mxu1 %vm105_vm1, %v72_v26 }
  0x39   :  { %171 = vmatmul.f32.gmra.mxu0 %v67_v27  ;;  %2608 = vmatmul.msk.f32.gmra.mxu1 %vm105_vm1, %v74_v28 }
  0x41   :  { %174 = vmatmul.f32.gmra.mxu0 %v69_v29  ;;  %2609 = vmatmul.msk.f32.gmra.mxu1 %vm105_vm1, %v76_v30 }
  0x49   :  { %177 = vmatmul.f32.gmra.mxu0 %v71_v32  ;;  %2610 = vmatmul.msk.f32.gmra.mxu1 %vm105_vm1, %v78_v33 }
  0x51   :  { %180 = vmatmul.f32.gmra.mxu0 %v73_v35 }
  0x59   :  { %183 = vmatmul.f32.gmra.mxu0 %v75_v37 }
  0x61   :  { %186 = vmatmul.f32.gmra.mxu0 %v77_v38 }
  0x69   :  { %189 = vmatmul.f32.gmra.mxu0 %v79_v39 }
  0x71   :  { %192 = vmatmul.f32.gmra.mxu0 %v81_v40 }
  0x79   :  { %195 = vmatmul.f32.gmra.mxu0 %v83_v41 }
  0x83   :  { %v216_v42 = vpop.f32.mrf.mxu1 }
  0x8e   :  { %v219_v43 = vpop.f32.mrf.mxu1 }
  0x96   :  { %v222_v45 = vpop.f32.mrf.mxu1 }
  0x9a   :  { %v243_v41 = vpop.f32.mrf.mxu3 }
  0x9e   :  { %v163_v44 = vpop.f32.mrf.mxu0  ;;  %v225_v51 = vpop.f32.mrf.mxu1 }
  0x9f   :  { %v164_v49 = vadd.f32 %v3420_v46, %v163_v44 }
  0xa1   :  { %v3426_v52 = vadd.f32 %v216_v42, %v164_v49 }
  0xa3   :  { %v310_v58 = vsel %vm18_vm2, %v3426_v52, -inf  ;;  %v252_v59 = vsel %vm18_vm2, %v3426_v52, inf }
  0xa6   :  { %v166_v47 = vpop.f32.mrf.mxu0  ;;  %v228_v3 = vpop.f32.mrf.mxu1 }
  0xa7   :  { %v167_v48 = vadd.f32 %v3420_v46, %v166_v47 }
  0xa9   :  { %v3424_v50 = vadd.f32 %v219_v43, %v167_v48  ;;  %v246_v48 = vpop.f32.mrf.mxu3 }
  0xab   :  { %v311_v55 = vsel %vm18_vm2, %v3424_v50, -inf  ;;  %v253_v56 = vsel %vm18_vm2, %v3424_v50, inf }
  0xac   :  { %v313_v60 = vmax.f32 %v310_v58, %v311_v55  ;;  %v256_v61 = vmin.f32 %v252_v59, %v253_v56 }
  0xae   :  { %v169_v53 = vpop.f32.mrf.mxu0  ;;  %v231_v6 = vpop.f32.mrf.mxu1 }
  0xaf   :  { %v170_v54 = vadd.f32 %v3420_v46, %v169_v53 }
  0xb1   :  { %v3433_v57 = vadd.f32 %v222_v45, %v170_v54  ;;  %v249_v58 = vpop.f32.mrf.mxu3 }
  0xb3   :  { %v312_v62 = vsel %vm254_vm3, %v3433_v57, -inf  ;;  %v255_v63 = vsel %vm254_vm3, %v3433_v57, inf }
  0xb4   :  { %v314_v0 = vmax.f32 %v313_v60, %v312_v62  ;;  %v257_v1 = vmin.f32 %v256_v61, %v255_v63 }
  0xb6   :  { %v172_v2 = vpop.f32.mrf.mxu0  ;;  %315 = vmax.xlane.f32.xlu2 %v314_v0  ;;  %258 = vmin.xlane.f32.xlu0 %v257_v1  ;;  %v234_v19 = vpop.f32.mrf.mxu1 }
  0xb7   :  { %v173_v7 = vadd.f32 %v3420_v46, %v172_v2 }
  0xb9   :  { %v3447_v9 = vadd.f32 %v225_v51, %v173_v7 }
  0xbb   :  { %v324_v15 = vsel %vm18_vm2, %v3447_v9, -inf  ;;  %v267_v16 = vsel %vm18_vm2, %v3447_v9, inf }
  0xbe   :  { %v175_v4 = vpop.f32.mrf.mxu0  ;;  %v237_v25 = vpop.f32.mrf.mxu1 }
  0xbf   :  { %v176_v5 = vadd.f32 %v3420_v46, %v175_v4 }
  0xc1   :  { %v3445_v8 = vadd.f32 %v228_v3, %v176_v5 }
  0xc3   :  { %v325_v12 = vsel %vm18_vm2, %v3445_v8, -inf  ;;  %v268_v13 = vsel %vm18_vm2, %v3445_v8, inf }
  0xc4   :  { %v327_v17 = vmax.f32 %v324_v15, %v325_v12  ;;  %v270_v18 = vmin.f32 %v267_v16, %v268_v13 }
  0xc6   :  { %v178_v10 = vpop.f32.mrf.mxu0  ;;  %v240_v32 = vpop.f32.mrf.mxu1 }
  0xc7   :  { %v179_v11 = vadd.f32 %v3420_v46, %v178_v10 }
  0xc9   :  { %v3454_v14 = vadd.f32 %v231_v6, %v179_v11 }
  0xcb   :  { %v326_v20 = vsel %vm254_vm3, %v3454_v14, -inf  ;;  %v269_v21 = vsel %vm254_vm3, %v3454_v14, inf }
  0xcc   :  { %v328_v22 = vmax.f32 %v327_v17, %v326_v20  ;;  %v271_v23 = vmin.f32 %v270_v18, %v269_v21 }
  0xce   :  { %v181_v24 = vpop.f32.mrf.mxu0  ;;  %329 = vmax.xlane.f32.xlu2 %v328_v22  ;;  %272 = vmin.xlane.f32.xlu0 %v271_v23 }
  0xcf   :  { %v182_v28 = vadd.f32 %v3420_v46, %v181_v24 }
  0xd1   :  { %v3468_v30 = vadd.f32 %v234_v19, %v182_v28 }
  0xd3   :  { %v281_v37 = vsel %vm18_vm2, %v3468_v30, inf  ;;  %v338_v38 = vsel %vm18_vm2, %v3468_v30, -inf }
  0xd6   :  { %v184_v26 = vpop.f32.mrf.mxu0 }
  0xd7   :  { %v185_v27 = vadd.f32 %v3420_v46, %v184_v26 }
  0xd9   :  { %v3466_v29 = vadd.f32 %v237_v25, %v185_v27 }
  0xdb   :  { %v282_v34 = vsel %vm18_vm2, %v3466_v29, inf  ;;  %v339_v35 = vsel %vm18_vm2, %v3466_v29, -inf }
  0xdc   :  { %v285_v39 = vmin.f32 %v281_v37, %v282_v34  ;;  %v341_v40 = vmax.f32 %v338_v38, %v339_v35 }
  0xde   :  { %v187_v31 = vpop.f32.mrf.mxu0 }
  0xdf   :  { %v188_v33 = vadd.f32 %v3420_v46, %v187_v31 }
  0xe1   :  { %v3475_v36 = vadd.f32 %v240_v32, %v188_v33 }
  0xe3   :  { %v284_v42 = vsel %vm283_vm4, %v3475_v36, inf  ;;  %v340_v43 = vsel %vm283_vm4, %v3475_v36, -inf }
  0xe4   :  { %v286_v44 = vmin.f32 %v285_v39, %v284_v42  ;;  %v342_v45 = vmax.f32 %v341_v40, %v340_v43  ;;  %v3251_v39 = vmov 255.0  }
  0xe5   :  { %3129 = vrcp.f32 %v3251_v39 }
  0xe6   :  { %v190_v47 = vpop.f32.mrf.mxu0  ;;  %287 = vmin.xlane.f32.xlu1 %v286_v44  ;;  %343 = vmax.xlane.f32.xlu0 %v342_v45 }
  0xe7   :  { %v191_v53 = vadd.f32 %v3420_v46, %v190_v47 }
  0xe9   :  { %v3489_v55 = vadd.f32 %v243_v41, %v191_v53 }
  0xeb   :  { %v296_v62 = vsel %vm18_vm2, %v3489_v55, inf  ;;  %v3130_v43 = vpop.eup %3129 }
  0xec   :  { %v375_v53 = vmul.f32 255.0, %v3130_v43  ;;  %vm379_vm5 = vweird.f32 %v3130_v43 }
  0xee   :  { %v193_v49 = vpop.f32.mrf.mxu0 }
  0xef   :  { %v194_v51 = vadd.f32 %v3420_v46, %v193_v49 }
  0xf1   :  { %v3487_v54 = vadd.f32 %v246_v48, %v194_v51 }
  0xf3   :  { %v297_v60 = vsel %vm18_vm2, %v3487_v54, inf  ;;  %v353_v2 = vsel %vm18_vm2, %v3487_v54, -inf }
  0xf4   :  { %v299_v63 = vmin.f32 %v296_v62, %v297_v60 }
  0xf6   :  { %v196_v56 = vpop.f32.mrf.mxu0 }
  0xf7   :  { %v197_v59 = vadd.f32 %v3420_v46, %v196_v56  ;;  %v352_v46 = vsel %vm18_vm2, %v3489_v55, -inf }
  0xf8   :  { %v355_v4 = vmax.f32 %v352_v46, %v353_v2 }
  0xf9   :  { %v3494_v61 = vadd.f32 %v249_v58, %v197_v59 }
  0xfb   :  { %v298_v0 = vsel %vm283_vm4, %v3494_v61, inf  ;;  %v354_v3 = vsel %vm283_vm4, %v3494_v61, -inf }
  0xfc   :  { %v300_v1 = vmin.f32 %v299_v63, %v298_v0  ;;  %v356_v5 = vmax.f32 %v355_v4, %v354_v3  ;;  %v376_v63 = vsub.f32 1.0, %v375_v53 }
  0xfe   :  { %301 = vmin.xlane.f32.xlu1 %v300_v1 }
 0x106   :  { %357 = vmax.xlane.f32.xlu1 %v356_v5 }
 0x129   :  { %v259_v6 = vpop.xlane.xlu0 %258  ;;  %v316_v27 = vpop.xlane.xlu2 %315 }
 0x12a   :  { %v260_v7 = vrot.slane %v259_v6, 4  ;;  %v317_v35 = vrot.slane %v316_v27, 4 }
 0x12c   :  { %v261_v10 = vmin.f32 %v259_v6, %v260_v7  ;;  %v318_v40 = vmax.f32 %v316_v27, %v317_v35  ;;  %v377_v7 = vmul.f32 %v3130_v43, %v376_v63 }
 0x12e   :  { %v262_v11 = vrot.slane %v261_v10, 2  ;;  %v319_v44 = vrot.slane %v318_v40, 2 }
 0x130   :  { %v263_v12 = vmin.f32 %v261_v10, %v262_v11  ;;  %v320_v56 = vmax.f32 %v318_v40, %v319_v44 }
 0x132   :  { %v264_v13 = vrot.slane %v263_v12, 1  ;;  %v321_v1 = vrot.slane %v320_v56, 1 }
 0x134   :  { %v265_v15 = vmin.f32 %v263_v12, %v264_v13  ;;  %v322_v10 = vmax.f32 %v320_v56, %v321_v1  ;;  %v606_v1 = vld [vmem:[%s4974_s2 + $0x38] sm:$0xff] }
 0x135   :  { %637 = vmatpush.msra.mxu2 %v606_v1 }
 0x136   :  { %2761 = vpush %v265_v15 }
 0x141   :  { %v273_v16 = vpop.xlane.xlu0 %272  ;;  %v330_v33 = vpop.xlane.xlu2 %329 }
 0x142   :  { %v274_v17 = vrot.slane %v273_v16, 4  ;;  %v331_v37 = vrot.slane %v330_v33, 4 }
 0x144   :  { %v275_v18 = vmin.f32 %v273_v16, %v274_v17  ;;  %v332_v41 = vmax.f32 %v330_v33, %v331_v37  ;;  %v378_v16 = vadd.f32 %v3130_v43, %v377_v7  ;;  %v858_v7 = vld [vmem:[%s4974_s2 + $0x88] sm:$0xff] }
 0x146   :  { %v276_v19 = vrot.slane %v275_v18, 2  ;;  %v333_v47 = vrot.slane %v332_v41, 2 }
 0x148   :  { %v277_v20 = vmin.f32 %v275_v18, %v276_v19  ;;  %v334_v59 = vmax.f32 %v332_v41, %v333_v47  ;;  %v380_v19 = vsel %vm379_vm5, %v3130_v43, %v378_v16  ;;  %v604_v16 = vld [vmem:[%s4974_s2 + $0x28] sm:$0xff] }
 0x14a   :  { %v278_v21 = vrot.slane %v277_v20, 1  ;;  %v335_v3 = vrot.slane %v334_v59, 1 }
 0x14c   :  { %v279_v22 = vmin.f32 %v277_v20, %v278_v21  ;;  %v336_v12 = vmax.f32 %v334_v59, %v335_v3  ;;  %v594_v59 = vld [vmem:[%s4974_s2 + $0x8] sm:$0xff] }
 0x14e   :  { %2763 = vpush %v279_v22 }
 0x159   :  { %v288_v23 = vpop.xlane.xlu1 %287  ;;  %v344_v34 = vpop.xlane.xlu0 %343 }
 0x15a   :  { %v289_v24 = vrot.slane %v288_v23, 4  ;;  %v345_v38 = vrot.slane %v344_v34, 4 }
 0x15c   :  { %v290_v25 = vmin.f32 %v288_v23, %v289_v24  ;;  %v346_v42 = vmax.f32 %v344_v34, %v345_v38 }
 0x15e   :  { %v291_v26 = vrot.slane %v290_v25, 2  ;;  %v347_v49 = vrot.slane %v346_v42, 2 }
 0x160   :  { %v292_v28 = vmin.f32 %v290_v25, %v291_v26  ;;  %v348_v60 = vmax.f32 %v346_v42, %v347_v49  ;;  %v860_v49 = vld [vmem:[%s4974_s2 + $0x98] sm:$0xff] }
 0x161   :  { %891 = vmatpush.msrb.mxu1 %v860_v49 }
 0x162   :  { %v293_v31 = vrot.slane %v292_v28, 1  ;;  %v349_v4 = vrot.slane %v348_v60, 1 }
 0x164   :  { %v294_v32 = vmin.f32 %v292_v28, %v293_v31  ;;  %v350_v13 = vmax.f32 %v348_v60, %v349_v4 }
 0x166   :  { %2765 = vpush %v294_v32 }
 0x167   :  { %s2762_s0 = spop %2761 }
 0x171   :  { %v302_v45 = vpop.xlane.xlu1 %301 }
 0x172   :  { %v303_v48 = vrot.slane %v302_v45, 4 }
 0x174   :  { %v304_v51 = vmin.f32 %v302_v45, %v303_v48  ;;  %v596_v48 = vld [vmem:[%s4974_s2 + $0x18] sm:$0xff] }
 0x175   :  { %690 = vmatpush.msrb.mxu3 %v596_v48 }
 0x176   :  { %v305_v58 = vrot.slane %v304_v51, 2 }
 0x178   :  { %v306_v62 = vmin.f32 %v304_v51, %v305_v58 }
 0x179   :  { %v358_v0 = vpop.xlane.xlu1 %357 }
 0x17a   :  { %v359_v2 = vrot.slane %v358_v0, 4  ;;  %v307_v46 = vrot.slane %v306_v62, 1 }
 0x17c   :  { %v360_v5 = vmax.f32 %v358_v0, %v359_v2  ;;  %v308_v6 = vmin.f32 %v306_v62, %v307_v46  ;;  %v605_v2 = vld [vmem:[%s4974_s2 + $0x30] sm:$0xff] }
 0x17d   :  { %v859_v46 = vld [vmem:[%s4974_s2 + $0x90] sm:$0xff]  ;;  %638 = vmatpush.msra.mxu2 %v605_v2 }
 0x17e   :  { %v361_v11 = vrot.slane %v360_v5, 2  ;;  %2767 = vpush %v308_v6  ;;  %892 = vmatpush.msrb.mxu1 %v859_v46 }
 0x17f   :  { %2769 = vpush %v322_v10  ;;  %s2764_s21 = spop %2763  ;;  %639 = vmatpush.msra.mxu2 %v604_v16 }
 0x180   :  { %2771 = vpush %v336_v12  ;;  %v362_v15 = vmax.f32 %v360_v5, %v361_v11  ;;  %s366_s26 = smin.f32 %s2764_s21, %s2762_s0  ;;  %893 = vmatpush.msrb.mxu1 %v858_v7 }
 0x181   :  { %2773 = vpush %v350_v13 }
 0x182   :  { %v363_v17 = vrot.slane %v362_v15, 1 }
 0x184   :  { %v364_v18 = vmax.f32 %v362_v15, %v363_v17  ;;  %v593_v15 = vld [vmem:[%s4974_s2] sm:$0xff] }
 0x186   :  { %2775 = vpush %v364_v18 }
 0x187   :  { %2777 = vpush %v380_v19 }
 0x197   :  { %s2766_s22 = spop %2765 }
 0x198   :  { %s367_s29 = smin.f32 %s2766_s22, %s366_s26 }
 0x1af   :  { %s2768_s23 = spop %2767 }
 0x1b0   :  { %s2770_s24 = spop %2769  ;;  %s368_s30 = smin.f32 %s2768_s23, %s367_s29 }
 0x1b1   :  { %s2772_s25 = spop %2771  ;;  %v3516_v33 = vstv %s368_s30  ;;  %s2592_s29 = sshll.u32 %s4976_s4, 4  ;;  %s2593_s29 = int_to_ptr.hbm [resolvable:$true] %s2592_s29 }
 0x1b2   :  { %s369_s27 = smax.f32 %s2772_s25, %s2770_s24  ;;  %s2774_s28 = spop %2773  ;;  %v401_v34 = vsub.f32 %v3426_v52, %v3516_v33  ;;  %v402_v35 = vsub.f32 %v3424_v50, %v3516_v33  ;;  %v403_v37 = vsub.f32 %v3433_v57, %v3516_v33  ;;  %v404_v38 = vsub.f32 %v3447_v9, %v3516_v33 }
 0x1b3   :  { %s370_s5 = smax.f32 %s2774_s28, %s369_s27  ;;  %v405_v39 = vsub.f32 %v3445_v8, %v3516_v33  ;;  %v406_v40 = vsub.f32 %v3454_v14, %v3516_v33  ;;  %v407_v41 = vsub.f32 %v3468_v30, %v3516_v33  ;;  %v408_v52 = vsub.f32 %v3466_v29, %v3516_v33 }
 0x1b4   :  { %v409_v50 = vsub.f32 %v3475_v36, %v3516_v33  ;;  %v410_v57 = vsub.f32 %v3489_v55, %v3516_v33  ;;  %v411_v9 = vsub.f32 %v3487_v54, %v3516_v33  ;;  %v412_v30 = vsub.f32 %v3494_v61, %v3516_v33  ;;  %v595_v61 = vld [vmem:[%s4974_s2 + $0x10] sm:$0xff] }
 0x1b5   :  { %691 = vmatpush.msrb.mxu3 %v595_v61 }
 0x1b7   :  { %s2776_s6 = spop %2775  ;;  %692 = vmatpush.msrb.mxu3 %v594_v59 }
 0x1b8   :  { %s371_s7 = smax.f32 %s2776_s6, %s370_s5  ;;  %s3506_s8 = spop %2777 }
 0x1b9   :  { %s372_s9 = ssub.f32 %s371_s7, %s368_s30  ;;  %693 = vmatpush.msrb.mxu3 %v593_v15 }
 0x1bb   :  { %p373_p0 = scmp.ne.f32.partialorder %s372_s9, 0.0  ;;  %s382_s10 = smul.f32 %s3506_s8, %s372_s9 }
 0x1bd   :  { %s5042_s10 = smov (!%p373_p0, %s382_s10), 1.0 }
 0x1be   :  { %v3509_v20 = vstv %s5042_s10 }
 0x1bf   :  { %3131 = vrcp.f32 %v3509_v20  ;;  %v396_v24 = vand.u32 2147483648, %v3509_v20  ;;  %v394_v26 = vand.u32 2147483647, %v3509_v20  ;;  %vm390_vm7 = vweird.f32 %v3509_v20 }
 0x1c1   :  { %v397_v28 = vor.u32 1.1754944e-38, %v396_v24  ;;  %vm395_vm9 = vcmp.eq.f32.partialorder %v394_v26, 8.507059e+37 }
 0x1c5   :  { %v3132_v21 = vpop.eup %3131 }
 0x1c6   :  { %v386_v22 = vmul.f32 %v3132_v21, %v3509_v20  ;;  %vm391_vm6 = vweird.f32 %v3132_v21 }
 0x1c7   :  { %vm392_vm8 = vmor %vm390_vm7, %vm391_vm6 }
 0x1c8   :  { %v387_v23 = vsub.f32 1.0, %v386_v22  ;;  %v857_v22 = vld [vmem:[%s4974_s2 + $0x80] sm:$0xff] }
 0x1c9   :  { %894 = vmatpush.msrb.mxu1 %v857_v22 }
 0x1ca   :  { %v388_v25 = vmul.f32 %v3132_v21, %v387_v23 }
 0x1cc   :  { %v389_v27 = vadd.f32 %v3132_v21, %v388_v25 }
 0x1ce   :  { %v393_v31 = vsel %vm392_vm8, %v3132_v21, %v389_v27  ;;  %v603_v27 = vld [vmem:[%s4974_s2 + $0x20] sm:$0xff] }
 0x1cf   :  { %v398_v32 = vsel %vm395_vm9, %v397_v28, %v393_v31  ;;  %640 = vmatpush.msra.mxu2 %v603_v27 }
 0x1d0   :  { %2779 = vpush %v398_v32 }
 0x201   :  { %s2780_s11 = spop %2779 }
 0x202   :  { %v413_v42 = vstv %s2780_s11 }
 0x203   :  { %v3540_v8 = vmul.f32 %v413_v42, %v401_v34  ;;  %v3542_v43 = vmul.f32 %v413_v42, %v402_v35  ;;  %v3544_v14 = vmul.f32 %v413_v42, %v403_v37  ;;  %v3548_v29 = vmul.f32 %v413_v42, %v404_v38 }
 0x204   :  { %v3550_v44 = vmul.f32 %v413_v42, %v405_v39  ;;  %v3552_v36 = vmul.f32 %v413_v42, %v406_v40  ;;  %v3554_v55 = vmul.f32 %v413_v42, %v407_v41  ;;  %v3556_v45 = vmul.f32 %v413_v42, %v408_v52 }
 0x205   :  { %v3558_v54 = vmul.f32 %v413_v42, %v409_v50  ;;  %v3560_v47 = vmul.f32 %v413_v42, %v410_v57  ;;  %v3571_v51 = vmul.f32 %v413_v42, %v411_v9  ;;  %v2781_v53 = vand.u32 2147483647, %v3540_v8 }
 0x206   :  { %v2783_v56 = vcvt.f32.s32 %v3540_v8  ;;  %v2789_v58 = vand.u32 2147483647, %v3542_v43  ;;  %v3579_v60 = vmul.f32 %v413_v42, %v412_v30  ;;  %v2791_v62 = vcvt.f32.s32 %v3542_v43 }
 0x207   :  { %v2797_v63 = vand.u32 2147483647, %v3544_v14  ;;  %v2799_v0 = vcvt.f32.s32 %v3544_v14  ;;  %vm3593_vm10 = vcmp.lt.f32.partialorder %v2781_v53, 8388608.0  ;;  %v2786_v5 = vand.u32 2147483648, %v3540_v8 }
 0x208   :  { %v2784_v4 = vcvt.s32.f32 %v2783_v56  ;;  %v2794_v6 = vand.u32 2147483648, %v3542_v43  ;;  %vm3602_vm11 = vcmp.lt.f32.partialorder %v2789_v58, 8388608.0  ;;  %v2792_v11 = vcvt.s32.f32 %v2791_v62 }
 0x209   :  { %v2800_v12 = vcvt.s32.f32 %v2799_v0  ;;  %v2805_v13 = vand.u32 2147483647, %v3548_v29  ;;  %v2802_v18 = vand.u32 2147483648, %v3544_v14  ;;  %v2807_v19 = vcvt.f32.s32 %v3548_v29 }
 0x20a   :  { %v2785_v17 = vand.u32 2147483647, %v2784_v4  ;;  %v2813_v21 = vand.u32 2147483647, %v3550_v44  ;;  %v2793_v23 = vand.u32 2147483647, %v2792_v11  ;;  %v2815_v26 = vcvt.f32.s32 %v3550_v44 }
 0x20b   :  { %vm3619_vm12 = vcmp.lt.f32.partialorder %v2797_v63, 8388608.0  ;;  %v2801_v25 = vand.u32 2147483647, %v2800_v12  ;;  %vm3629_vm13 = vcmp.lt.f32.partialorder %v2805_v13, 8388608.0  ;;  %v2808_v32 = vcvt.s32.f32 %v2807_v19 }
 0x20c   :  { %v3627_v28 = vor.u32 %v2786_v5, %v2785_v17  ;;  %v2810_v34 = vand.u32 2147483648, %v3548_v29  ;;  %v3634_v35 = vor.u32 %v2794_v6, %v2793_v23  ;;  %v2816_v38 = vcvt.s32.f32 %v2815_v26 }
 0x20d   :  { %v3636_v37 = vor.u32 %v2802_v18, %v2801_v25  ;;  %v2821_v39 = vand.u32 2147483647, %v3552_v36  ;;  %v2809_v40 = vand.u32 2147483647, %v2808_v32  ;;  %vm3639_vm14 = vcmp.lt.f32.partialorder %v2813_v21, 8388608.0 }
 0x20e   :  { %v2818_v52 = vand.u32 2147483648, %v3550_v44  ;;  %v2823_v50 = vcvt.f32.s32 %v3552_v36  ;;  %v2788_v57 = vsel %vm3593_vm10, %v3627_v28, %v3540_v8  ;;  %v2796_v42 = vsel %vm3602_vm11, %v3634_v35, %v3542_v43 }
 0x20f   :  { %v2817_v9 = vand.u32 2147483647, %v2816_v38  ;;  %v2826_v30 = vand.u32 2147483648, %v3552_v36  ;;  %v2811_v48 = vor.u32 %v2810_v34, %v2809_v40  ;;  %v2829_v49 = vand.u32 2147483647, %v3554_v55 }
 0x210   :  { %v2824_v61 = vcvt.s32.f32 %v2823_v50  ;;  %v2831_v53 = vcvt.f32.s32 %v3554_v55  ;;  %v2804_v56 = vsel %vm3619_vm12, %v3636_v37, %v3544_v14  ;;  %vm3660_vm15 = vcmp.lt.f32.partialorder %v2821_v39, 8388608.0 }
 0x211   :  { %v2819_v8 = vor.u32 %v2818_v52, %v2817_v9  ;;  %v2839_v43 = vcvt.f32.s32 %v3556_v45  ;;  %v2834_v63 = vand.u32 2147483648, %v3554_v55  ;;  %v2837_v0 = vand.u32 2147483647, %v3556_v45 }
 0x212   :  { %v2825_v59 = vand.u32 2147483647, %v2824_v61  ;;  %v2832_v62 = vcvt.s32.f32 %v2831_v53  ;;  %v2812_v1 = vsel %vm3629_vm13, %v2811_v48, %v3548_v29  ;;  %vm3673_vm0 = vcmp.lt.f32.partialorder %v2829_v49, 8388608.0 }
 0x213   :  { %v2820_v14 = vsel %vm3639_vm14, %v2819_v8, %v3550_v44  ;;  %v2840_v46 = vcvt.s32.f32 %v2839_v43  ;;  %v2845_v5 = vand.u32 2147483647, %v3558_v54  ;;  %v2847_v6 = vcvt.f32.s32 %v3558_v54  ;;  %v3758_v44 = vld [vmem:[%s4975_s3 + $0x2] ss:$0 sm:$0xff] }
 0x214   :  { %v2827_v3 = vor.u32 %v2826_v30, %v2825_v59  ;;  %v2833_v4 = vand.u32 2147483647, %v2832_v62  ;;  %v2842_v10 = vand.u32 2147483648, %v3556_v45  ;;  %v2853_v29 = vand.u32 2147483647, %v3560_v47 }
 0x215   :  { %v2841_v7 = vand.u32 2147483647, %v2840_v46  ;;  %v2855_v11 = vcvt.f32.s32 %v3560_v47  ;;  %vm3682_vm1 = vcmp.lt.f32.partialorder %v2837_v0, 8388608.0  ;;  %v2848_v13 = vcvt.s32.f32 %v2847_v6  ;;  %v791_v0 = vld [vmem:[%s4974_s2 + $0x78] sm:$0xff]  ;;  %v3745_v6 = vld [vmem:[%s4975_s3 + $0x1] ss:$0 sm:$0xff] }
 0x216   :  { %v2835_v12 = vor.u32 %v2834_v63, %v2833_v4  ;;  %v2850_v15 = vand.u32 2147483648, %v3558_v54  ;;  %v2828_v16 = vsel %vm3660_vm15, %v2827_v3, %v3552_v36  ;;  %vm3690_vm3 = vcmp.lt.f32.partialorder %v2845_v5, 8388608.0  ;;  %822 = vmatpush.msra.mxu3 %v791_v0 }
 0x217   :  { %v2843_v17 = vor.u32 %v2842_v10, %v2841_v7  ;;  %v2856_v19 = vcvt.s32.f32 %v2855_v11  ;;  %v2849_v21 = vand.u32 2147483647, %v2848_v13  ;;  %vm3694_vm4 = vcmp.lt.f32.partialorder %v2853_v29, 8388608.0 }
 0x218   :  { %v2861_v23 = vand.u32 2147483647, %v3571_v51  ;;  %v2863_v24 = vcvt.f32.s32 %v3571_v51  ;;  %v2836_v25 = vsel %vm3673_vm0, %v2835_v12, %v3554_v55  ;;  %v2858_v27 = vand.u32 2147483648, %v3560_v47 }
 0x219   :  { %v2844_v36 = vsel %vm3682_vm1, %v2843_v17, %v3556_v45  ;;  %v2857_v26 = vand.u32 2147483647, %v2856_v19  ;;  %v2851_v28 = vor.u32 %v2850_v15, %v2849_v21  ;;  %v2866_v32 = vand.u32 2147483648, %v3571_v51 }
 0x21a   :  { %v2864_v31 = vcvt.s32.f32 %v2863_v24  ;;  %v2871_v34 = vcvt.f32.s32 %v3579_v60  ;;  %vm3709_vm5 = vcmp.lt.f32.partialorder %v2861_v23, 8388608.0  ;;  %v2869_v55 = vand.u32 2147483647, %v3579_v60 }
 0x21b   :  { %v2859_v35 = vor.u32 %v2858_v27, %v2857_v26  ;;  %v438_v38 = vmax.f32 %v2788_v57, 0.0  ;;  %v2852_v45 = vsel %vm3690_vm3, %v2851_v28, %v3558_v54  ;;  %v439_v41 = vmax.f32 %v2796_v42, 0.0 }
 0x21c   :  { %v2865_v39 = vand.u32 2147483647, %v2864_v31  ;;  %v2872_v40 = vcvt.s32.f32 %v2871_v34  ;;  %v2874_v50 = vand.u32 2147483648, %v3579_v60  ;;  %v440_v9 = vmax.f32 %v2804_v56, 0.0  ;;  %v790_v34 = vld [vmem:[%s4974_s2 + $0x70] sm:$0xff] }
 0x21d   :  { %v2860_v52 = vsel %vm3694_vm4, %v2859_v35, %v3560_v47  ;;  %v441_v30 = vmax.f32 %v2812_v1, 0.0  ;;  %v3721_v49 = vmax.f32 %v2820_v14, 0.0  ;;  %v444_v57 = vmax.f32 %v2836_v25, 0.0  ;;  %v722_v47 = vld [vmem:[%s4974_s2 + $0x58] sm:$0xff]  ;;  %823 = vmatpush.msra.mxu3 %v790_v34 }
 0x21e   :  { %v2867_v48 = vor.u32 %v2866_v32, %v2865_v39  ;;  %v2873_v61 = vand.u32 2147483647, %v2872_v40  ;;  %v445_v53 = vmax.f32 %v2844_v36, 0.0  ;;  %v446_v8 = vmax.f32 %v2852_v45, 0.0  ;;  %753 = vmatpush.msrb.mxu2 %v722_v47  ;;  %v721_v32 = vld [vmem:[%s4974_s2 + $0x50] sm:$0xff] }
 0x21f   :  { %v447_v58 = vmax.f32 %v2860_v52, 0.0  ;;  %v450_v54 = vmin.f32 %v438_v38, 255.0  ;;  %v451_v43 = vmin.f32 %v439_v41, 255.0  ;;  %vm3729_vm6 = vcmp.lt.f32.partialorder %v2869_v55, 8388608.0 }
 0x220   :  { %v2868_v42 = vsel %vm3709_vm5, %v2867_v48, %v3571_v51  ;;  %v2875_v59 = vor.u32 %v2874_v50, %v2873_v61  ;;  %v3733_v62 = vmax.f32 %v2828_v16, 0.0  ;;  %v452_v63 = vmin.f32 %v440_v9, 255.0  ;;  %754 = vmatpush.msrb.mxu2 %v721_v32 }
 0x221   :  { %v453_v1 = vmin.f32 %v441_v30, 255.0  ;;  %v456_v51 = vmin.f32 %v444_v57, 255.0  ;;  %v457_v14 = vmin.f32 %v445_v53, 255.0  ;;  %v458_v2 = vmin.f32 %v446_v8, 255.0 }
 0x222   :  { %v3738_v46 = vmax.f32 %v2868_v42, 0.0  ;;  %v454_v3 = vmin.f32 %v3721_v49, 255.0  ;;  %v459_v4 = vmin.f32 %v447_v58, 255.0  ;;  %v463_v5 = vmul.f32 %v450_v54, %v3509_v20 }
 0x223   :  { %v464_v7 = vmul.f32 %v451_v43, %v3509_v20  ;;  %v469_v10 = vmul.f32 %v456_v51, %v3509_v20  ;;  %v470_v29 = vmul.f32 %v457_v14, %v3509_v20  ;;  %v2876_v11 = vsel %vm3729_vm6, %v2875_v59, %v3579_v60 }
 0x224   :  { %v3252_v12 = vmov 0.0   ;;  %v475_v13 = vadd.f32 %v463_v5, %v3516_v33  ;;  %v465_v15 = vmul.f32 %v452_v63, %v3509_v20  ;;  %v471_v16 = vmul.f32 %v458_v2, %v3509_v20 }
 0x225   :  { %25 = vst.msk [vmem:[#allocation2 + $0x30] sm:$0xff] %vm18_vm2, %v3252_v12  ;;  %v481_v17 = vadd.f32 %v469_v10, %v3516_v33  ;;  %v476_v60 = vadd.f32 %v464_v7, %v3516_v33  ;;  %v482_v18 = vadd.f32 %v470_v29, %v3516_v33  ;;  %v466_v19 = vmul.f32 %v453_v1, %v3509_v20 }
 0x226   :  { %19 = vst.msk [vmem:[#allocation2] sm:$0xff] %vm18_vm2, %v3252_v12  ;;  %v489_v21 = vmul.f32 %v3745_v6, %v475_v13  ;;  %v477_v22 = vadd.f32 %v465_v15, %v3516_v33  ;;  %v483_v23 = vadd.f32 %v471_v16, %v3516_v33  ;;  %v472_v24 = vmul.f32 %v459_v4, %v3509_v20 }
 0x227   :  { %20 = vst.msk [vmem:[#allocation2 + $0x8] sm:$0xff] %vm18_vm2, %v3252_v12  ;;  %v449_v25 = vmax.f32 %v2876_v11, 0.0  ;;  %v495_v36 = vmul.f32 %v3745_v6, %v481_v17  ;;  %v490_v26 = vmul.f32 %v3745_v6, %v476_v60  ;;  %v496_v27 = vmul.f32 %v3745_v6, %v482_v18 }
 0x228   :  { %21 = vst.msk [vmem:[#allocation2 + $0x10] sm:$0xff] %vm18_vm2, %v3252_v12  ;;  %v3783_v28 = vadd.f32 %v3758_v44, %v489_v21  ;;  %v491_v31 = vmul.f32 %v3745_v6, %v477_v22  ;;  %v497_v35 = vmul.f32 %v3745_v6, %v483_v23  ;;  %v478_v37 = vadd.f32 %v466_v19, %v3516_v33  ;;  %v720_v23 = vld [vmem:[%s4974_s2 + $0x48] sm:$0xff] }
 0x229   :  { %22 = vst.msk [vmem:[#allocation2 + $0x18] sm:$0xff] %vm18_vm2, %v3252_v12  ;;  %v3795_v55 = vadd.f32 %v3758_v44, %v495_v36  ;;  %v3800_v38 = vadd.f32 %v3758_v44, %v490_v26  ;;  %v3803_v45 = vadd.f32 %v3758_v44, %v496_v27  ;;  %v484_v52 = vadd.f32 %v472_v24, %v3516_v33  ;;  %v789_v26 = vld [vmem:[%s4974_s2 + $0x68] sm:$0xff] }
 0x22a   :  { %23 = vst.msk [vmem:[#allocation2 + $0x20] sm:$0xff] %vm18_vm2, %v3252_v12  ;;  %v527_v39 = vmul.f32 1.442695, %v3783_v28  ;;  %v3809_v40 = vadd.f32 %v3758_v44, %v491_v31  ;;  %v3812_v41 = vadd.f32 %v3758_v44, %v497_v35  ;;  %v455_v50 = vmin.f32 %v3733_v62, 255.0  ;;  %755 = vmatpush.msrb.mxu2 %v720_v23  ;;  %824 = vmatpush.msra.mxu3 %v789_v26 }
 0x22b   :  { %24 = vst.msk [vmem:[#allocation2 + $0x28] sm:$0xff] %vm18_vm2, %v3252_v12  ;;  %v460_v9 = vmin.f32 %v3738_v46, 255.0  ;;  %v461_v30 = vmin.f32 %v449_v25, 255.0  ;;  %v539_v48 = vmul.f32 1.442695, %v3795_v55  ;;  %v492_v58 = vmul.f32 %v3745_v6, %v478_v37 }
 0x22c   :  { %26 = vst.msk [vmem:[#allocation2 + $0x38] sm:$0xff] %vm18_vm2, %v3252_v12  ;;  %3133 = vpow2.f32 %v527_v39  ;;  %v529_v61 = vmul.f32 1.442695, %v3800_v38  ;;  %v541_v57 = vmul.f32 1.442695, %v3803_v45  ;;  %v498_v54 = vmul.f32 %v3745_v6, %v484_v52 }
 0x22d   :  { %27 = vst.msk [vmem:[#allocation2 + $0x40] sm:$0xff] %vm18_vm2, %v3252_v12  ;;  %3135 = vpow2.f32 %v539_v48  ;;  %v531_v53 = vmul.f32 1.442695, %v3809_v40  ;;  %v543_v8 = vmul.f32 1.442695, %v3812_v41  ;;  %v467_v42 = vmul.f32 %v454_v3, %v3509_v20  ;;  %v719_v48 = vld [vmem:[%s4974_s2 + $0x40] sm:$0xff] }
 0x22e   :  { %28 = vst.msk [vmem:[#allocation2 + $0x48] sm:$0xff] %vm18_vm2, %v3252_v12  ;;  %3137 = vpow2.f32 %v529_v61  ;;  %v473_v43 = vmul.f32 %v460_v9, %v3509_v20  ;;  %v468_v47 = vmul.f32 %v455_v50, %v3509_v20  ;;  %v474_v56 = vmul.f32 %v461_v30, %v3509_v20  ;;  %v788_v61 = vld [vmem:[%s4974_s2 + $0x60] sm:$0xff]  ;;  %756 = vmatpush.msrb.mxu2 %v719_v48 }
 0x22f   :  { %29 = vst.msk [vmem:[#allocation2 + $0x50] sm:$0xff] %vm18_vm2, %v3252_v12  ;;  %3139 = vpow2.f32 %v541_v57  ;;  %v3843_v59 = vadd.f32 %v3758_v44, %v492_v58  ;;  %v3846_v49 = vadd.f32 %v3758_v44, %v498_v54  ;;  %v479_v62 = vadd.f32 %v467_v42, %v3516_v33  ;;  %825 = vmatpush.msra.mxu3 %v788_v61 }
 0x230   :  { %30 = vst.msk [vmem:[#allocation2 + $0x58] sm:$0xff] %vm18_vm2, %v3252_v12  ;;  %3141 = vpow2.f32 %v531_v53  ;;  %v485_v63 = vadd.f32 %v473_v43, %v3516_v33  ;;  %v480_v0 = vadd.f32 %v468_v47, %v3516_v33  ;;  %v486_v1 = vadd.f32 %v474_v56, %v3516_v33 }
 0x231   :  { %31 = vst.msk [vmem:[#allocation2 + $0x60] sm:$0xff] %vm18_vm2, %v3252_v12  ;;  %3143 = vpow2.f32 %v543_v8  ;;  %vm521_vm7 = vcmp.gt.f32.partialorder %v3795_v55, 0.0  ;;  %vm515_vm8 = vcmp.gt.f32.partialorder %v3783_v28, 0.0  ;;  %v533_v51 = vmul.f32 1.442695, %v3843_v59 }
 0x232   :  { %v3134_v20 = vpop.eup %3133  ;;  %v545_v14 = vmul.f32 1.442695, %v3846_v49  ;;  %v493_v3 = vmul.f32 %v3745_v6, %v479_v62  ;;  %v499_v4 = vmul.f32 %v3745_v6, %v485_v63  ;;  %v494_v5 = vmul.f32 %v3745_v6, %v480_v0 }
 0x233   :  { %v3136_v2 = vpop.eup %3135  ;;  %v2614_v46 = vadd.f32 -1.0, %v3134_v20  ;;  %vm516_vm9 = vcmp.gt.f32.partialorder %v3800_v38, 0.0  ;;  %3145 = vpow2.f32 %v533_v51  ;;  %v500_v33 = vmul.f32 %v3745_v6, %v486_v1 }
 0x234   :  { %v3138_v7 = vpop.eup %3137  ;;  %v2620_v10 = vadd.f32 -1.0, %v3136_v2  ;;  %3147 = vpow2.f32 %v545_v14  ;;  %v507_v15 = vadd.f32 %v3758_v44, %v493_v3  ;;  %v513_v18 = vadd.f32 %v3758_v44, %v499_v4 }
 0x235   :  { %v3140_v29 = vpop.eup %3139  ;;  %v563_v11 = vsel %vm515_vm8, %v3783_v28, %v2614_v46  ;;  %v2615_v13 = vadd.f32 -1.0, %v3138_v7  ;;  %v3869_v19 = vadd.f32 %v3758_v44, %v494_v5  ;;  %vm522_vm10 = vcmp.gt.f32.partialorder %v3803_v45, 0.0 }
 0x236   :  { %v3142_v16 = vpop.eup %3141  ;;  %v569_v17 = vsel %vm521_vm7, %v3795_v55, %v2620_v10  ;;  %575 = vst.msk [vmem:[#allocation2] sm:$0xff] %vm18_vm2, %v563_v11  ;;  %v2621_v60 = vadd.f32 -1.0, %v3140_v29  ;;  %v535_v24 = vmul.f32 1.442695, %v507_v15  ;;  %vm517_vm11 = vcmp.gt.f32.partialorder %v3809_v40, 0.0 }
 0x237   :  { %v3144_v6 = vpop.eup %3143  ;;  %581 = vst.msk [vmem:[#allocation2 + $0x30] sm:$0xff] %vm18_vm2, %v569_v17  ;;  %v564_v21 = vsel %vm516_vm9, %v3800_v38, %v2615_v13  ;;  %v2616_v22 = vadd.f32 -1.0, %v3142_v16  ;;  %v547_v27 = vmul.f32 1.442695, %v513_v18  ;;  %vm523_vm12 = vcmp.gt.f32.partialorder %v3812_v41, 0.0 }
 0x238   :  { %576 = vst.msk [vmem:[#allocation2 + $0x8] sm:$0xff] %vm18_vm2, %v564_v21  ;;  %v570_v25 = vsel %vm522_vm10, %v3803_v45, %v2621_v60  ;;  %v2622_v36 = vadd.f32 -1.0, %v3144_v6  ;;  %3149 = vpow2.f32 %v535_v24  ;;  %v537_v31 = vmul.f32 1.442695, %v3869_v19 }
 0x239   :  { %582 = vst.msk [vmem:[#allocation2 + $0x38] sm:$0xff] %vm18_vm2, %v570_v25  ;;  %v565_v28 = vsel %vm517_vm11, %v3809_v40, %v2616_v22  ;;  %v3146_v32 = vpop.eup %3145  ;;  %3151 = vpow2.f32 %v547_v27  ;;  %v514_v35 = vadd.f32 %v3758_v44, %v500_v33  ;;  %vm518_vm13 = vcmp.gt.f32.partialorder %v3843_v59, 0.0 }
 0x23a   :  { %577 = vst.msk [vmem:[#allocation2 + $0x10] sm:$0xff] %vm18_vm2, %v565_v28  ;;  %v571_v34 = vsel %vm523_vm12, %v3812_v41, %v2622_v36  ;;  %v3148_v37 = vpop.eup %3147  ;;  %v2617_v55 = vadd.f32 -1.0, %v3146_v32  ;;  %3153 = vpow2.f32 %v537_v31  ;;  %vm524_vm14 = vcmp.gt.f32.partialorder %v3846_v49, 0.0 }
 0x23b   :  { %583 = vst.msk [vmem:[#allocation2 + $0x40] sm:$0xff] %vm18_vm2, %v571_v34  ;;  %v2623_v38 = vadd.f32 -1.0, %v3148_v37  ;;  %v549_v45 = vmul.f32 1.442695, %v514_v35  ;;  %vm519_vm15 = vcmp.gt.f32.partialorder %v507_v15, 0.0  ;;  %vm525_vm0 = vcmp.gt.f32.partialorder %v513_v18, 0.0 }
 0x23c   :  { %v566_v40 = vsel %vm518_vm13, %v3843_v59, %v2617_v55  ;;  %vm520_vm1 = vcmp.gt.f32.partialorder %v3869_v19, 0.0  ;;  %vm526_vm3 = vcmp.gt.f32.partialorder %v514_v35, 0.0  ;;  %vm32_vm4 = vcmask 523264  }
 0x23d   :  { %v587_v39 = vld [vmem:[#allocation2] sm:$0xff]  ;;  %578 = vst.msk [vmem:[#allocation2 + $0x18] sm:$0xff] %vm18_vm2, %v566_v40  ;;  %v572_v44 = vsel %vm524_vm14, %v3846_v49, %v2623_v38  ;;  %3155 = vpow2.f32 %v549_v45 }
 0x23e   :  { %v597_v52 = vld [vmem:[#allocation2 + $0x30] sm:$0xff]  ;;  %2632 = vmatmul.msk.f32.vlgmr.msrb.gmra.mxu3 %vm18_vm2, %v587_v39  ;;  %v3150_v41 = vpop.eup %3149  ;;  %584 = vst.msk [vmem:[#allocation2 + $0x48] sm:$0xff] %vm18_vm2, %v572_v44 }
 0x23f   :  { %2626 = vmatmul.msk.f32.vlgmr.msra.gmra.mxu2 %vm18_vm2, %v597_v52  ;;  %v851_v50 = vld [vmem:[#allocation2 + $0x2] sm:$0xff]  ;;  %v3152_v9 = vpop.eup %3151  ;;  %v2618_v30 = vadd.f32 -1.0, %v3150_v41  ;;  %33 = vst.msk [vmem:[#allocation3] sm:$0xff] %vm32_vm4, %v3252_v12 }
 0x240   :  { %2650 = vmatmul.msk.f32.vlgmr.msrb.gmra.mxu1 %vm18_vm2, %v851_v50  ;;  %v3154_v57 = vpop.eup %3153  ;;  %v2624_v53 = vadd.f32 -1.0, %v3152_v9  ;;  %v588_v47 = vld [vmem:[#allocation2 + $0x8] sm:$0xff]  ;;  %v598_v59 = vld [vmem:[#allocation2 + $0x38] sm:$0xff]  ;;  %34 = vst.msk [vmem:[#allocation3 + $0x8] sm:$0xff] %vm32_vm4, %v3252_v12 }
 0x241   :  { %v567_v8 = vsel %vm519_vm15, %v507_v15, %v2618_v30  ;;  %v2619_v58 = vadd.f32 -1.0, %v3154_v57  ;;  %v852_v49 = vld [vmem:[#allocation2 + $0xa] sm:$0xff]  ;;  %v713_v33 = vld [vmem:[#allocation2 + $0x1] sm:$0xff]  ;;  %35 = vst.msk [vmem:[#allocation3 + $0x10] sm:$0xff] %vm32_vm4, %v3252_v12 }
 0x242   :  { %579 = vst.msk [vmem:[#allocation2 + $0x20] sm:$0xff] %vm18_vm2, %v567_v8  ;;  %v573_v54 = vsel %vm525_vm0, %v513_v18, %v2624_v53  ;;  %v589_v63 = vld [vmem:[#allocation2 + $0x10] sm:$0xff]  ;;  %v599_v0 = vld [vmem:[#allocation2 + $0x40] sm:$0xff] }
 0x243   :  { %v3156_v42 = vpop.eup %3155  ;;  %585 = vst.msk [vmem:[#allocation2 + $0x50] sm:$0xff] %vm18_vm2, %v573_v54  ;;  %v568_v43 = vsel %vm520_vm1, %v3869_v19, %v2619_v58  ;;  %v782_v10 = vld [vmem:[#allocation2 + $0x31] sm:$0xff]  ;;  %v783_v29 = vld [vmem:[#allocation2 + $0x39] sm:$0xff]  ;;  %v714_v11 = vld [vmem:[#allocation2 + $0x9] sm:$0xff] }
 0x244   :  { %580 = vst.msk [vmem:[#allocation2 + $0x28] sm:$0xff] %vm18_vm2, %v568_v43  ;;  %v2625_v56 = vadd.f32 -1.0, %v3156_v42  ;;  %v853_v1 = vld [vmem:[#allocation2 + $0x12] sm:$0xff]  ;;  %v3115_v53 = vld [vmem:[%s4975_s3 + $0x3] ss:$0 sm:$0xff] }
 0x245   :  { %v590_v20 = vld [vmem:[#allocation2 + $0x18] sm:$0xff]  ;;  %v600_v51 = vld [vmem:[#allocation2 + $0x48] sm:$0xff]  ;;  %36 = vst.msk [vmem:[#allocation3 + $0x18] sm:$0xff] %vm32_vm4, %v3252_v12 }
 0x246   :  { %2633 = vmatmul.msk.f32.gmra.mxu3 %vm18_vm2, %v588_v47  ;;  %v574_v62 = vsel %vm526_vm3, %v514_v35, %v2625_v56  ;;  %v784_v13 = vld [vmem:[#allocation2 + $0x41] sm:$0xff]  ;;  %v715_v15 = vld [vmem:[#allocation2 + $0x11] sm:$0xff]  ;;  %37 = vst.msk [vmem:[#allocation3 + $0x20] sm:$0xff] %vm32_vm4, %v3252_v12 }
 0x247   :  { %2627 = vmatmul.msk.f32.gmra.mxu2 %vm18_vm2, %v598_v59  ;;  %586 = vst.msk [vmem:[#allocation2 + $0x58] sm:$0xff] %vm18_vm2, %v574_v62 }
 0x248   :  { %2651 = vmatmul.msk.f32.gmra.mxu1 %vm18_vm2, %v852_v49  ;;  %38 = vst.msk [vmem:[#allocation3 + $0x28] sm:$0xff] %vm32_vm4, %v3252_v12 }
 0x249   :  { %v854_v14 = vld [vmem:[#allocation2 + $0x1a] sm:$0xff]  ;;  %39 = vst.msk [vmem:[#allocation3 + $0x30] sm:$0xff] %vm32_vm4, %v3252_v12 }
 0x24a   :  { %v591_v2 = vld [vmem:[#allocation2 + $0x20] sm:$0xff]  ;;  %v601_v46 = vld [vmem:[#allocation2 + $0x50] sm:$0xff]  ;;  %40 = vst.msk [vmem:[#allocation4] sm:$0xff] %vm32_vm4, %v3252_v12 }
 0x24b   :  { %v855_v3 = vld [vmem:[#allocation2 + $0x22] sm:$0xff]  ;;  %v856_v7 = vld [vmem:[#allocation2 + $0x2a] sm:$0xff]  ;;  %v716_v17 = vld [vmem:[#allocation2 + $0x19] sm:$0xff]  ;;  %41 = vst.msk [vmem:[#allocation4 + $0x8] sm:$0xff] %vm32_vm4, %v3252_v12 }
 0x24c   :  { %v592_v4 = vld [vmem:[#allocation2 + $0x28] sm:$0xff]  ;;  %42 = vst.msk [vmem:[#allocation4 + $0x10] sm:$0xff] %vm32_vm4, %v3252_v12 }
 0x24d   :  { %v785_v16 = vld [vmem:[#allocation2 + $0x49] sm:$0xff]  ;;  %v717_v18 = vld [vmem:[#allocation2 + $0x21] sm:$0xff]  ;;  %43 = vst.msk [vmem:[#allocation4 + $0x18] sm:$0xff] %vm32_vm4, %v3252_v12 }
 0x24e   :  { %2634 = vmatmul.msk.f32.gmra.mxu3 %vm18_vm2, %v589_v63  ;;  %v602_v5 = vld [vmem:[#allocation2 + $0x58] sm:$0xff]  ;;  %v718_v6 = vld [vmem:[#allocation2 + $0x29] sm:$0xff]  ;;  %44 = vst.msk [vmem:[#allocation4 + $0x20] sm:$0xff] %vm32_vm4, %v3252_v12 }
 0x24f   :  { %2628 = vmatmul.msk.f32.gmra.mxu2 %vm18_vm2, %v599_v0  ;;  %v786_v60 = vld [vmem:[#allocation2 + $0x51] sm:$0xff]  ;;  %v787_v19 = vld [vmem:[#allocation2 + $0x59] sm:$0xff]  ;;  %45 = vst.msk [vmem:[#allocation4 + $0x28] sm:$0xff] %vm32_vm4, %v3252_v12 }
 0x250   :  { %2652 = vmatmul.msk.f32.gmra.mxu1 %vm18_vm2, %v853_v1  ;;  %46 = vst.msk [vmem:[#allocation4 + $0x30] sm:$0xff] %vm32_vm4, %v3252_v12 }
 0x251   :  { %47 = vst.msk [vmem:[#allocation5] sm:$0xff] %vm32_vm4, %v3252_v12 }
 0x252   :  { %48 = vst.msk [vmem:[#allocation5 + $0x8] sm:$0xff] %vm32_vm4, %v3252_v12 }
 0x253   :  { %49 = vst.msk [vmem:[#allocation5 + $0x10] sm:$0xff] %vm32_vm4, %v3252_v12 }
 0x254   :  { %50 = vst.msk [vmem:[#allocation5 + $0x18] sm:$0xff] %vm32_vm4, %v3252_v12 }
 0x255   :  { %51 = vst.msk [vmem:[#allocation5 + $0x20] sm:$0xff] %vm32_vm4, %v3252_v12 }
 0x256   :  { %2635 = vmatmul.msk.f32.gmra.mxu3 %vm18_vm2, %v590_v20  ;;  %52 = vst.msk [vmem:[#allocation5 + $0x28] sm:$0xff] %vm32_vm4, %v3252_v12 }
 0x257   :  { %2629 = vmatmul.msk.f32.gmra.mxu2 %vm18_vm2, %v600_v51  ;;  %53 = vst.msk [vmem:[#allocation5 + $0x30] sm:$0xff] %vm32_vm4, %v3252_v12 }
 0x258   :  { %2653 = vmatmul.msk.f32.gmra.mxu1 %vm18_vm2, %v854_v14  ;;  %54 = vst.msk [vmem:[#allocation6] sm:$0xff] %vm32_vm4, %v3252_v12 }
 0x259   :  { %55 = vst.msk [vmem:[#allocation6 + $0x8] sm:$0xff] %vm32_vm4, %v3252_v12 }
 0x25a   :  { %56 = vst.msk [vmem:[#allocation6 + $0x10] sm:$0xff] %vm32_vm4, %v3252_v12 }
 0x25b   :  { %57 = vst.msk [vmem:[#allocation6 + $0x18] sm:$0xff] %vm32_vm4, %v3252_v12 }
 0x25c   :  { %58 = vst.msk [vmem:[#allocation6 + $0x20] sm:$0xff] %vm32_vm4, %v3252_v12 }
 0x25d   :  { %59 = vst.msk [vmem:[#allocation6 + $0x28] sm:$0xff] %vm32_vm4, %v3252_v12 }
 0x25e   :  { %2636 = vmatmul.msk.f32.gmra.mxu3 %vm18_vm2, %v591_v2  ;;  %60 = vst.msk [vmem:[#allocation6 + $0x30] sm:$0xff] %vm32_vm4, %v3252_v12 }
 0x25f   :  { %2630 = vmatmul.msk.f32.gmra.mxu2 %vm18_vm2, %v601_v46 }
 0x260   :  { %2654 = vmatmul.msk.f32.gmra.mxu1 %vm18_vm2, %v855_v3 }
 0x266   :  { %2637 = vmatmul.msk.f32.gmra.mxu3 %vm18_vm2, %v592_v4 }
 0x267   :  { %2631 = vmatmul.msk.f32.gmra.mxu2 %vm18_vm2, %v602_v5 }
 0x268   :  { %2655 = vmatmul.msk.f32.gmra.mxu1 %vm18_vm2, %v856_v7 }
 0x26e   :  { %2644 = vmatmul.msk.f32.vlgmr.msra.gmra.mxu3 %vm18_vm2, %v782_v10 }
 0x26f   :  { %2638 = vmatmul.msk.f32.vlgmr.msrb.gmra.mxu2 %vm18_vm2, %v713_v33 }
 0x276   :  { %2645 = vmatmul.msk.f32.gmra.mxu3 %vm18_vm2, %v783_v29 }
 0x277   :  { %2639 = vmatmul.msk.f32.gmra.mxu2 %vm18_vm2, %v714_v11 }
 0x27e   :  { %2646 = vmatmul.msk.f32.gmra.mxu3 %vm18_vm2, %v784_v13 }
 0x27f   :  { %2640 = vmatmul.msk.f32.gmra.mxu2 %vm18_vm2, %v715_v15 }
 0x286   :  { %2647 = vmatmul.msk.f32.gmra.mxu3 %vm18_vm2, %v785_v16 }
 0x287   :  { %2641 = vmatmul.msk.f32.gmra.mxu2 %vm18_vm2, %v716_v17 }
 0x28e   :  { %2648 = vmatmul.msk.f32.gmra.mxu3 %vm18_vm2, %v786_v60 }
 0x28f   :  { %2642 = vmatmul.msk.f32.gmra.mxu2 %vm18_vm2, %v717_v18 }
 0x296   :  { %2649 = vmatmul.msk.f32.gmra.mxu3 %vm18_vm2, %v787_v19 }
 0x297   :  { %2643 = vmatmul.msk.f32.gmra.mxu2 %vm18_vm2, %v718_v6  ;;  %vm930_vm2 = vcmask 518144  }
 0x2bd   :  { %v896_v35 = vpop.f32.mrf.mxu1 }
 0x2c1   :  { %v695_v21 = vpop.f32.mrf.mxu3 }
 0x2c2   :  { %v642_v22 = vpop.f32.mrf.mxu2 }
 0x2c3   :  { %v696_v45 = vadd.f32 %v695_v21, %v642_v22 }
 0x2c5   :  { %v899_v38 = vpop.f32.mrf.mxu1 }
 0x2c9   :  { %v698_v23 = vpop.f32.mrf.mxu3 }
 0x2ca   :  { %v645_v24 = vpop.f32.mrf.mxu2 }
 0x2cb   :  { %v699_v39 = vadd.f32 %v698_v23, %v645_v24 }
 0x2cd   :  { %v902_v48 = vpop.f32.mrf.mxu1 }
 0x2d1   :  { %v701_v25 = vpop.f32.mrf.mxu3 }
 0x2d2   :  { %v648_v36 = vpop.f32.mrf.mxu2 }
 0x2d3   :  { %v702_v61 = vadd.f32 %v701_v25, %v648_v36 }
 0x2d5   :  { %v905_v20 = vpop.f32.mrf.mxu1 }
 0x2d9   :  { %v3941_v26 = vpop.f32.mrf.mxu3 }
 0x2da   :  { %v3943_v27 = vpop.f32.mrf.mxu2 }
 0x2db   :  { %v705_v5 = vadd.f32 %v3941_v26, %v3943_v27 }
 0x2dd   :  { %v908_v13 = vpop.f32.mrf.mxu1 }
 0x2e1   :  { %v3945_v28 = vpop.f32.mrf.mxu3 }
 0x2e2   :  { %v3947_v31 = vpop.f32.mrf.mxu2 }
 0x2e3   :  { %v708_v7 = vadd.f32 %v3945_v28, %v3947_v31 }
 0x2e5   :  { %v911_v25 = vpop.f32.mrf.mxu1 }
 0x2e9   :  { %v3949_v32 = vpop.f32.mrf.mxu3 }
 0x2ea   :  { %v3951_v34 = vpop.f32.mrf.mxu2 }
 0x2eb   :  { %v711_v60 = vadd.f32 %v3949_v32, %v3951_v34 }
 0x2f1   :  { %v827_v37 = vpop.f32.mrf.mxu3 }
 0x2f2   :  { %v758_v55 = vpop.f32.mrf.mxu2 }
 0x2f3   :  { %v776_v40 = vadd.f32 %v758_v55, %v696_v45 }
 0x2f5   :  { %v845_v50 = vadd.f32 %v827_v37, %v776_v40 }
 0x2f7   :  { %v914_v57 = vadd.f32 %v896_v35, %v845_v50 }
 0x2f9   :  { %v830_v52 = vpop.f32.mrf.mxu3  ;;  %v4008_v43 = vadd.f32 %v3115_v53, %v914_v57 }
 0x2fa   :  { %v761_v44 = vpop.f32.mrf.mxu2 }
 0x2fb   :  { %v777_v41 = vadd.f32 %v761_v44, %v699_v39  ;;  %v957_v0 = vsel %vm32_vm4, %v4008_v43, -inf  ;;  %v928_v1 = vsel %vm32_vm4, %v4008_v43, inf }
 0x2fd   :  { %v846_v9 = vadd.f32 %v830_v52, %v777_v41 }
 0x2ff   :  { %v915_v30 = vadd.f32 %v899_v38, %v846_v9 }
 0x301   :  { %v833_v8 = vpop.f32.mrf.mxu3  ;;  %v4002_v54 = vadd.f32 %v3115_v53, %v915_v30 }
 0x302   :  { %v764_v58 = vpop.f32.mrf.mxu2 }
 0x303   :  { %v778_v42 = vadd.f32 %v764_v58, %v702_v61  ;;  %v958_v59 = vsel %vm32_vm4, %v4002_v54, -inf  ;;  %v929_v49 = vsel %vm32_vm4, %v4002_v54, inf }
 0x304   :  { %v960_v14 = vmax.f32 %v957_v0, %v958_v59  ;;  %v932_v2 = vmin.f32 %v928_v1, %v929_v49 }
 0x305   :  { %v847_v47 = vadd.f32 %v833_v8, %v778_v42 }
 0x307   :  { %v916_v56 = vadd.f32 %v902_v48, %v847_v47 }
 0x309   :  { %v4020_v62 = vadd.f32 %v3115_v53, %v916_v56  ;;  %v836_v63 = vpop.f32.mrf.mxu3 }
 0x30a   :  { %v767_v51 = vpop.f32.mrf.mxu2 }
 0x30b   :  { %v959_v12 = vsel %vm930_vm2, %v4020_v62, -inf  ;;  %v931_v46 = vsel %vm930_vm2, %v4020_v62, inf  ;;  %v779_v10 = vadd.f32 %v767_v51, %v705_v5  ;;  %v1139_v5 = vld [vmem:[%s4974_s2 + $0x118] sm:$0xff] }
 0x30c   :  { %v961_v3 = vmax.f32 %v960_v14, %v959_v12  ;;  %v933_v4 = vmin.f32 %v932_v2, %v931_v46  ;;  %1166 = vmatpush.msra.mxu2 %v1139_v5 }
 0x30d   :  { %v848_v15 = vadd.f32 %v836_v63, %v779_v10  ;;  %v1257_v10 = vld [vmem:[%s4974_s2 + $0x148] sm:$0xff] }
 0x30e   :  { %962 = vmax.xlane.f32.xlu1 %v961_v3  ;;  %934 = vmin.xlane.f32.xlu2 %v933_v4  ;;  %v1259_v3 = vld [vmem:[%s4974_s2 + $0x158] sm:$0xff]  ;;  %v1258_v4 = vld [vmem:[%s4974_s2 + $0x150] sm:$0xff] }
 0x30f   :  { %v917_v18 = vadd.f32 %v905_v20, %v848_v15  ;;  %1286 = vmatpush.msrb.mxu0 %v1259_v3 }
 0x311   :  { %v839_v29 = vpop.f32.mrf.mxu3  ;;  %v4038_v23 = vadd.f32 %v3115_v53, %v917_v18  ;;  %1287 = vmatpush.msrb.mxu0 %v1258_v4 }
 0x312   :  { %v770_v33 = vpop.f32.mrf.mxu2 }
 0x313   :  { %v780_v11 = vadd.f32 %v770_v33, %v708_v7  ;;  %v943_v31 = vsel %vm32_vm4, %v4038_v23, inf  ;;  %v971_v32 = vsel %vm32_vm4, %v4038_v23, -inf  ;;  %v1125_v7 = vld [vmem:[%s4974_s2 + $0xd8] sm:$0xff]  ;;  %v1256_v33 = vld [vmem:[%s4974_s2 + $0x140] sm:$0xff]  ;;  %1288 = vmatpush.msrb.mxu0 %v1257_v10  ;;  %v1138_v10 = vld [vmem:[%s4974_s2 + $0x110] sm:$0xff] }
 0x314   :  { %1219 = vmatpush.msrb.mxu3 %v1125_v7  ;;  %1167 = vmatpush.msra.mxu2 %v1138_v10 }
 0x315   :  { %v849_v16 = vadd.f32 %v839_v29, %v780_v11  ;;  %1289 = vmatpush.msrb.mxu0 %v1256_v33  ;;  %v1124_v33 = vld [vmem:[%s4974_s2 + $0xd0] sm:$0xff] }
 0x316   :  { %1220 = vmatpush.msrb.mxu3 %v1124_v33 }
 0x317   :  { %v918_v17 = vadd.f32 %v908_v13, %v849_v16 }
 0x319   :  { %v4036_v6 = vadd.f32 %v3115_v53, %v918_v17  ;;  %v842_v22 = vpop.f32.mrf.mxu3 }
 0x31a   :  { %v773_v19 = vpop.f32.mrf.mxu2 }
 0x31b   :  { %v781_v21 = vadd.f32 %v773_v19, %v711_v60  ;;  %v944_v26 = vsel %vm32_vm4, %v4036_v6, inf  ;;  %v972_v27 = vsel %vm32_vm4, %v4036_v6, -inf }
 0x31c   :  { %v946_v34 = vmin.f32 %v943_v31, %v944_v26  ;;  %v974_v35 = vmax.f32 %v971_v32, %v972_v27 }
 0x31d   :  { %v850_v24 = vadd.f32 %v842_v22, %v781_v21 }
 0x31f   :  { %v919_v36 = vadd.f32 %v911_v25, %v850_v24 }
 0x321   :  { %v4044_v28 = vadd.f32 %v3115_v53, %v919_v36 }
 0x323   :  { %v945_v37 = vsel %vm930_vm2, %v4044_v28, inf  ;;  %v973_v55 = vsel %vm930_vm2, %v4044_v28, -inf }
 0x324   :  { %v947_v38 = vmin.f32 %v946_v34, %v945_v37  ;;  %v975_v45 = vmax.f32 %v974_v35, %v973_v55 }
 0x326   :  { %948 = vmin.xlane.f32.xlu0 %v947_v38  ;;  %976 = vmax.xlane.f32.xlu2 %v975_v45 }
 0x381   :  { %v935_v39 = vpop.xlane.xlu2 %934  ;;  %v963_v30 = vpop.xlane.xlu1 %962 }
 0x382   :  { %v936_v40 = vrot.slane %v935_v39, 4  ;;  %v964_v48 = vrot.slane %v963_v30, 4 }
 0x384   :  { %v937_v52 = vmin.f32 %v935_v39, %v936_v40  ;;  %v965_v61 = vmax.f32 %v963_v30, %v964_v48 }
 0x386   :  { %v938_v44 = vrot.slane %v937_v52, 2  ;;  %v966_v57 = vrot.slane %v965_v61, 2 }
 0x388   :  { %v939_v41 = vmin.f32 %v937_v52, %v938_v44  ;;  %v967_v59 = vmax.f32 %v965_v61, %v966_v57 }
 0x38a   :  { %v940_v50 = vrot.slane %v939_v41, 1  ;;  %v968_v20 = vrot.slane %v967_v59, 1 }
 0x38c   :  { %v941_v9 = vmin.f32 %v939_v41, %v940_v50  ;;  %v969_v46 = vmax.f32 %v967_v59, %v968_v20  ;;  %v1132_v20 = vld [vmem:[%s4974_s2 + $0xe0] sm:$0xff] }
 0x38e   :  { %2877 = vpush %v941_v9 }
 0x399   :  { %v949_v53 = vpop.xlane.xlu0 %948  ;;  %v977_v8 = vpop.xlane.xlu2 %976 }
 0x39a   :  { %v950_v58 = vrot.slane %v949_v53, 4  ;;  %v978_v42 = vrot.slane %v977_v8, 4 }
 0x39c   :  { %v951_v47 = vmin.f32 %v949_v53, %v950_v58  ;;  %v979_v56 = vmax.f32 %v977_v8, %v978_v42 }
 0x39e   :  { %v952_v49 = vrot.slane %v951_v47, 2  ;;  %v980_v63 = vrot.slane %v979_v56, 2 }
 0x3a0   :  { %v953_v0 = vmin.f32 %v951_v47, %v952_v49  ;;  %v981_v1 = vmax.f32 %v979_v56, %v980_v63 }
 0x3a2   :  { %v954_v51 = vrot.slane %v953_v0, 1  ;;  %v982_v14 = vrot.slane %v981_v1, 1 }
 0x3a4   :  { %v955_v2 = vmin.f32 %v953_v0, %v954_v51  ;;  %v983_v12 = vmax.f32 %v981_v1, %v982_v14 }
 0x3a6   :  { %2879 = vpush %v955_v2 }
 0x3a7   :  { %2881 = vpush %v969_v46 }
 0x3a8   :  { %2883 = vpush %v983_v12 }
 0x3bf   :  { %s2878_s13 = spop %2877 }
 0x3d7   :  { %s2880_s14 = spop %2879 }
 0x3d8   :  { %s985_s17 = smin.f32 %s2880_s14, %s2878_s13  ;;  %s2882_s18 = spop %2881 }
 0x3d9   :  { %s2884_s19 = spop %2883  ;;  %v4080_v24 = vstv %s985_s17 }
 0x3da   :  { %s986_s20 = smax.f32 %s2884_s19, %s2882_s18  ;;  %v1016_v25 = vsub.f32 %v4008_v43, %v4080_v24  ;;  %v1017_v36 = vsub.f32 %v4002_v54, %v4080_v24  ;;  %v1018_v26 = vsub.f32 %v4020_v62, %v4080_v24  ;;  %v1019_v27 = vsub.f32 %v4038_v23, %v4080_v24 }
 0x3db   :  { %s987_s0 = ssub.f32 %s986_s20, %s985_s17  ;;  %v1020_v37 = vsub.f32 %v4036_v6, %v4080_v24  ;;  %v1021_v43 = vsub.f32 %v4044_v28, %v4080_v24  ;;  %v1134_v6 = vld [vmem:[%s4974_s2 + $0xf0] sm:$0xff] }
 0x3dd   :  { %p988_p1 = scmp.ne.f32.partialorder %s987_s0, 0.0  ;;  %s997_s21 = smul.f32 %s3506_s8, %s987_s0 }
 0x3df   :  { %s5044_s21 = smov (!%p988_p1, %s997_s21), 1.0 }
 0x3e0   :  { %v4073_v29 = vstv %s5044_s21 }
 0x3e1   :  { %3157 = vrcp.f32 %v4073_v29  ;;  %v1011_v16 = vand.u32 2147483648, %v4073_v29  ;;  %v1009_v60 = vand.u32 2147483647, %v4073_v29  ;;  %vm1005_vm6 = vweird.f32 %v4073_v29 }
 0x3e3   :  { %v1012_v19 = vor.u32 1.1754944e-38, %v1011_v16  ;;  %vm1010_vm8 = vcmp.eq.f32.partialorder %v1009_v60, 8.507059e+37  ;;  %v1137_v60 = vld [vmem:[%s4974_s2 + $0x108] sm:$0xff] }
 0x3e4   :  { %1168 = vmatpush.msra.mxu2 %v1137_v60 }
 0x3e7   :  { %v3158_v11 = vpop.eup %3157 }
 0x3e8   :  { %v1001_v13 = vmul.f32 %v3158_v11, %v4073_v29  ;;  %vm1006_vm5 = vweird.f32 %v3158_v11 }
 0x3e9   :  { %vm1007_vm7 = vmor %vm1005_vm6, %vm1006_vm5 }
 0x3ea   :  { %v1002_v15 = vsub.f32 1.0, %v1001_v13 }
 0x3ec   :  { %v1003_v17 = vmul.f32 %v3158_v11, %v1002_v15 }
 0x3ee   :  { %v1004_v18 = vadd.f32 %v3158_v11, %v1003_v17 }
 0x3f0   :  { %v1008_v21 = vsel %vm1007_vm7, %v3158_v11, %v1004_v18  ;;  %v1255_v11 = vld [vmem:[%s4974_s2 + $0x138] sm:$0xff]  ;;  %v1123_v18 = vld [vmem:[%s4974_s2 + $0xc8] sm:$0xff]  ;;  %vm1329_vm7 = vcmask 516096  }
 0x3f1   :  { %v1013_v22 = vsel %vm1010_vm8, %v1012_v19, %v1008_v21  ;;  %1290 = vmatpush.msrb.mxu0 %v1255_v11  ;;  %1221 = vmatpush.msrb.mxu3 %v1123_v18 }
 0x3f2   :  { %2885 = vpush %v1013_v22 }
 0x423   :  { %s2886_s22 = spop %2885 }
 0x424   :  { %v1022_v31 = vstv %s2886_s22 }
 0x425   :  { %v1023_v32 = vmul.f32 %v1022_v31, %v1016_v25  ;;  %v1024_v34 = vmul.f32 %v1022_v31, %v1017_v36  ;;  %v1025_v35 = vmul.f32 %v1022_v31, %v1018_v26  ;;  %v4092_v55 = vmul.f32 %v1022_v31, %v1019_v27  ;;  %v1136_v36 = vld [vmem:[%s4974_s2 + $0x100] sm:$0xff]  ;;  %v1254_v27 = vld [vmem:[%s4974_s2 + $0x130] sm:$0xff] }
 0x426   :  { %v4096_v39 = vmul.f32 %v1022_v31, %v1020_v37  ;;  %v4098_v52 = vmul.f32 %v1022_v31, %v1021_v43  ;;  %v1122_v26 = vld [vmem:[%s4974_s2 + $0xc0] sm:$0xff]  ;;  %1291 = vmatpush.msrb.mxu0 %v1254_v27  ;;  %1169 = vmatpush.msra.mxu2 %v1136_v36 }
 0x427   :  { %v2887_v38 = vand.u32 2147483647, %v1023_v32  ;;  %v2889_v54 = vcvt.f32.s32 %v1023_v32  ;;  %v2895_v45 = vand.u32 2147483647, %v1024_v34  ;;  %v2897_v62 = vcvt.f32.s32 %v1024_v34  ;;  %1222 = vmatpush.msrb.mxu3 %v1122_v26 }
 0x428   :  { %v2903_v40 = vand.u32 2147483647, %v1025_v35  ;;  %v2905_v23 = vcvt.f32.s32 %v1025_v35  ;;  %v2892_v41 = vand.u32 2147483648, %v1023_v32  ;;  %v2900_v50 = vand.u32 2147483648, %v1024_v34 }
 0x429   :  { %v2890_v44 = vcvt.s32.f32 %v2889_v54  ;;  %vm4100_vm9 = vcmp.lt.f32.partialorder %v2887_v38, 8388608.0  ;;  %v2898_v9 = vcvt.s32.f32 %v2897_v62  ;;  %v2911_v28 = vand.u32 2147483647, %v4092_v55  ;;  %v1135_v54 = vld [vmem:[%s4974_s2 + $0xf8] sm:$0xff] }
 0x42a   :  { %v2906_v30 = vcvt.s32.f32 %v2905_v23  ;;  %vm4105_vm10 = vcmp.lt.f32.partialorder %v2895_v45, 8388608.0  ;;  %v2908_v57 = vand.u32 2147483648, %v1025_v35  ;;  %v2913_v53 = vcvt.f32.s32 %v4092_v55  ;;  %v1253_v45 = vld [vmem:[%s4974_s2 + $0x128] sm:$0xff]  ;;  %1170 = vmatpush.msra.mxu2 %v1135_v54 }
 0x42b   :  { %v2891_v48 = vand.u32 2147483647, %v2890_v44  ;;  %v2899_v8 = vand.u32 2147483647, %v2898_v9  ;;  %vm4110_vm11 = vcmp.lt.f32.partialorder %v2903_v40, 8388608.0  ;;  %v2921_v47 = vcvt.f32.s32 %v4096_v39  ;;  %v1120_v9 = vld [vmem:[%s4974_s2 + $0xb0] sm:$0xff]  ;;  %1292 = vmatpush.msrb.mxu0 %v1253_v45 }
 0x42c   :  { %v2907_v42 = vand.u32 2147483647, %v2906_v30  ;;  %v2914_v59 = vcvt.s32.f32 %v2913_v53  ;;  %v2916_v49 = vand.u32 2147483648, %v4092_v55  ;;  %v2919_v63 = vand.u32 2147483647, %v4096_v39  ;;  %v1252_v30 = vld [vmem:[%s4974_s2 + $0x120] sm:$0xff]  ;;  %1171 = vmatpush.msra.mxu2 %v1134_v6 }
 0x42d   :  { %v2893_v56 = vor.u32 %v2892_v41, %v2891_v48  ;;  %v2901_v0 = vor.u32 %v2900_v50, %v2899_v8  ;;  %vm4117_vm12 = vcmp.lt.f32.partialorder %v2911_v28, 8388608.0  ;;  %v2922_v51 = vcvt.s32.f32 %v2921_v47  ;;  %v3116_v44 = vld [vmem:[%s4975_s3 + $0x4] ss:$0 sm:$0xff]  ;;  %v3117_v53 = vld [vmem:[%s4975_s3 + $0x5] ss:$0 sm:$0xff]  ;;  %v1119_v47 = vld [vmem:[%s4974_s2 + $0xa8] sm:$0xff]  ;;  %1293 = vmatpush.msrb.mxu0 %v1252_v30 }
 0x42e   :  { %v2909_v1 = vor.u32 %v2908_v57, %v2907_v42  ;;  %v2915_v2 = vand.u32 2147483647, %v2914_v59  ;;  %v2927_v12 = vand.u32 2147483647, %v4098_v52  ;;  %v2929_v46 = vcvt.f32.s32 %v4098_v52 }
 0x42f   :  { %v2894_v14 = vsel %vm4100_vm9, %v2893_v56, %v1023_v32  ;;  %v2902_v3 = vsel %vm4105_vm10, %v2901_v0, %v1024_v34  ;;  %v2923_v5 = vand.u32 2147483647, %v2922_v51  ;;  %v2924_v7 = vand.u32 2147483648, %v4096_v39  ;;  %v1118_v51 = vld [vmem:[%s4974_s2 + $0xa0] sm:$0xff] }
 0x430   :  { %v2910_v4 = vsel %vm4110_vm11, %v2909_v1, %v1025_v35  ;;  %v2917_v13 = vor.u32 %v2916_v49, %v2915_v2  ;;  %v2930_v15 = vcvt.s32.f32 %v2929_v46  ;;  %v1035_v16 = vmax.f32 %v2894_v14, 0.0 }
 0x431   :  { %v1036_v17 = vmax.f32 %v2902_v3, 0.0  ;;  %vm4145_vm13 = vcmp.lt.f32.partialorder %v2919_v63, 8388608.0  ;;  %v2925_v21 = vor.u32 %v2924_v7, %v2923_v5  ;;  %v2932_v22 = vand.u32 2147483648, %v4098_v52 }
 0x432   :  { %v1037_v25 = vmax.f32 %v2910_v4, 0.0  ;;  %v2918_v31 = vsel %vm4117_vm12, %v2917_v13, %v4092_v55  ;;  %v2931_v32 = vand.u32 2147483647, %v2930_v15  ;;  %v1041_v34 = vmin.f32 %v1035_v16, 255.0  ;;  %v1121_v55 = vld [vmem:[%s4974_s2 + $0xb8] sm:$0xff] }
 0x433   :  { %v1042_v35 = vmin.f32 %v1036_v17, 255.0  ;;  %v2926_v37 = vsel %vm4145_vm13, %v2925_v21, %v4096_v39  ;;  %v1038_v43 = vmax.f32 %v2918_v31, 0.0  ;;  %vm2928_vm14 = vcmp.lt.f32.partialorder %v2927_v12, 8388608.0  ;;  %1223 = vmatpush.msrb.mxu3 %v1121_v55 }
 0x434   :  { %v1043_v38 = vmin.f32 %v1037_v25, 255.0  ;;  %v2933_v62 = vor.u32 %v2932_v22, %v2931_v32  ;;  %v1039_v40 = vmax.f32 %v2926_v37, 0.0  ;;  %v1048_v23 = vmul.f32 %v1041_v34, %v4073_v29 }
 0x435   :  { %v1049_v39 = vmul.f32 %v1042_v35, %v4073_v29  ;;  %v1044_v41 = vmin.f32 %v1038_v43, 255.0  ;;  %1224 = vmatpush.msrb.mxu3 %v1120_v9 }
 0x436   :  { %v1050_v50 = vmul.f32 %v1043_v38, %v4073_v29  ;;  %v2934_v28 = vsel %vm2928_vm14, %v2933_v62, %v4098_v52  ;;  %v1045_v48 = vmin.f32 %v1039_v40, 255.0  ;;  %v1054_v61 = vadd.f32 %v1048_v23, %v4080_v24  ;;  %v1133_v52 = vld [vmem:[%s4974_s2 + $0xe8] sm:$0xff] }
 0x437   :  { %v1055_v57 = vadd.f32 %v1049_v39, %v4080_v24  ;;  %v1040_v8 = vmax.f32 %v2934_v28, 0.0  ;;  %v1051_v58 = vmul.f32 %v1044_v41, %v4073_v29  ;;  %1172 = vmatpush.msra.mxu2 %v1133_v52  ;;  %1225 = vmatpush.msrb.mxu3 %v1119_v47 }
 0x438   :  { %v1056_v42 = vadd.f32 %v1050_v50, %v4080_v24  ;;  %v1052_v56 = vmul.f32 %v1045_v48, %v4073_v29  ;;  %v1062_v59 = vmul.f32 %v3116_v44, %v1054_v61 }
 0x439   :  { %v1063_v49 = vmul.f32 %v3116_v44, %v1055_v57  ;;  %v1046_v63 = vmin.f32 %v1040_v8, 255.0  ;;  %v1057_v0 = vadd.f32 %v1051_v58, %v4080_v24  ;;  %1173 = vmatpush.msra.mxu2 %v1132_v20  ;;  %1226 = vmatpush.msrb.mxu3 %v1118_v51 }
 0x43a   :  { %v1064_v1 = vmul.f32 %v3116_v44, %v1056_v42  ;;  %v1058_v14 = vadd.f32 %v1052_v56, %v4080_v24  ;;  %v1070_v2 = vadd.f32 %v3117_v53, %v1062_v59 }
 0x43b   :  { %v1071_v12 = vadd.f32 %v3117_v53, %v1063_v49  ;;  %v1053_v46 = vmul.f32 %v1046_v63, %v4073_v29  ;;  %v1065_v3 = vmul.f32 %v3116_v44, %v1057_v0 }
 0x43c   :  { %v1072_v4 = vadd.f32 %v3117_v53, %v1064_v1  ;;  %v1066_v5 = vmul.f32 %v3116_v44, %v1058_v14  ;;  %v1082_v7 = vmul.f32 1.442695, %v1070_v2  ;;  %vm1076_vm15 = vcmp.gt.f32.partialorder %v1070_v2, 0.0 }
 0x43d   :  { %v1059_v10 = vadd.f32 %v1053_v46, %v4080_v24  ;;  %v1073_v33 = vadd.f32 %v3117_v53, %v1065_v3  ;;  %v1084_v11 = vmul.f32 1.442695, %v1071_v12  ;;  %vm1077_vm0 = vcmp.gt.f32.partialorder %v1071_v12, 0.0 }
 0x43e   :  { %v1074_v13 = vadd.f32 %v3117_v53, %v1066_v5  ;;  %3159 = vpow2.f32 %v1082_v7  ;;  %v1086_v15 = vmul.f32 1.442695, %v1072_v4  ;;  %vm1078_vm1 = vcmp.gt.f32.partialorder %v1072_v4, 0.0 }
 0x43f   :  { %v1067_v16 = vmul.f32 %v3116_v44, %v1059_v10  ;;  %3161 = vpow2.f32 %v1084_v11  ;;  %v1088_v17 = vmul.f32 1.442695, %v1073_v33  ;;  %vm1079_vm3 = vcmp.gt.f32.partialorder %v1073_v33, 0.0 }
 0x440   :  { %3163 = vpow2.f32 %v1086_v15  ;;  %v1090_v60 = vmul.f32 1.442695, %v1074_v13  ;;  %vm1080_vm5 = vcmp.gt.f32.partialorder %v1074_v13, 0.0 }
 0x441   :  { %v1075_v18 = vadd.f32 %v3117_v53, %v1067_v16  ;;  %3165 = vpow2.f32 %v1088_v17 }
 0x442   :  { %3167 = vpow2.f32 %v1090_v60 }
 0x443   :  { %v1092_v29 = vmul.f32 1.442695, %v1075_v18  ;;  %vm1081_vm6 = vcmp.gt.f32.partialorder %v1075_v18, 0.0 }
 0x444   :  { %v3160_v19 = vpop.eup %3159 }
 0x445   :  { %v3162_v21 = vpop.eup %3161  ;;  %3169 = vpow2.f32 %v1092_v29  ;;  %v2656_v22 = vadd.f32 -1.0, %v3160_v19 }
 0x446   :  { %v3164_v25 = vpop.eup %3163  ;;  %v2657_v24 = vadd.f32 -1.0, %v3162_v21 }
 0x447   :  { %v3166_v36 = vpop.eup %3165  ;;  %v2658_v26 = vadd.f32 -1.0, %v3164_v25  ;;  %v1100_v27 = vsel %vm1076_vm15, %v1070_v2, %v2656_v22  ;;  %v3118_v2 = vld [vmem:[%s4975_s3 + $0x6] ss:$0 sm:$0xff] }
 0x448   :  { %v3168_v31 = vpop.eup %3167  ;;  %v2659_v32 = vadd.f32 -1.0, %v3166_v36  ;;  %v1101_v34 = vsel %vm1077_vm0, %v1071_v12, %v2657_v24  ;;  %1106 = vst.msk [vmem:[#allocation3] sm:$0xff] %vm32_vm4, %v1100_v27 }
 0x449   :  { %v2660_v35 = vadd.f32 -1.0, %v3168_v31  ;;  %v1102_v37 = vsel %vm1078_vm1, %v1072_v4, %v2658_v26  ;;  %1107 = vst.msk [vmem:[#allocation3 + $0x8] sm:$0xff] %vm32_vm4, %v1101_v34 }
 0x44a   :  { %v1103_v43 = vsel %vm1079_vm3, %v1073_v33, %v2659_v32  ;;  %1108 = vst.msk [vmem:[#allocation3 + $0x10] sm:$0xff] %vm32_vm4, %v1102_v37 }
 0x44b   :  { %v3170_v38 = vpop.eup %3169  ;;  %v1104_v54 = vsel %vm1080_vm5, %v1074_v13, %v2660_v35  ;;  %1109 = vst.msk [vmem:[#allocation3 + $0x18] sm:$0xff] %vm32_vm4, %v1103_v43 }
 0x44c   :  { %v2661_v55 = vadd.f32 -1.0, %v3170_v38  ;;  %1110 = vst.msk [vmem:[#allocation3 + $0x20] sm:$0xff] %vm32_vm4, %v1104_v54 }
 0x44e   :  { %v1105_v45 = vsel %vm1081_vm6, %v1075_v18, %v2661_v55 }
 0x44f   :  { %1111 = vst.msk [vmem:[#allocation3 + $0x28] sm:$0xff] %vm32_vm4, %v1105_v45  ;;  %v1112_v62 = vld [vmem:[#allocation3] sm:$0xff] }
 0x450   :  { %v1126_v40 = vld [vmem:[#allocation3 + $0x1] sm:$0xff]  ;;  %2668 = vmatmul.msk.f32.vlgmr.msrb.gmra.mxu3 %vm32_vm4, %v1112_v62 }
 0x451   :  { %v1246_v23 = vld [vmem:[#allocation3 + $0x2] sm:$0xff]  ;;  %2662 = vmatmul.msk.f32.vlgmr.msra.gmra.mxu2 %vm32_vm4, %v1126_v40  ;;  %v1247_v41 = vld [vmem:[#allocation3 + $0xa] sm:$0xff] }
 0x452   :  { %2674 = vmatmul.msk.f32.vlgmr.msrb.gmra.mxu0 %vm32_vm4, %v1246_v23  ;;  %v1113_v39 = vld [vmem:[#allocation3 + $0x8] sm:$0xff]  ;;  %v1114_v50 = vld [vmem:[#allocation3 + $0x10] sm:$0xff]  ;;  %v1115_v30 = vld [vmem:[#allocation3 + $0x18] sm:$0xff] }
 0x453   :  { %v1127_v44 = vld [vmem:[#allocation3 + $0x9] sm:$0xff]  ;;  %v1128_v6 = vld [vmem:[#allocation3 + $0x11] sm:$0xff]  ;;  %v1129_v28 = vld [vmem:[#allocation3 + $0x19] sm:$0xff] }
 0x454   :  { %v1248_v9 = vld [vmem:[#allocation3 + $0x12] sm:$0xff]  ;;  %v1249_v48 = vld [vmem:[#allocation3 + $0x1a] sm:$0xff] }
 0x455   :  { %v1116_v61 = vld [vmem:[#allocation3 + $0x20] sm:$0xff] }
 0x456   :  { %v1130_v57 = vld [vmem:[#allocation3 + $0x21] sm:$0xff]  ;;  %v1131_v58 = vld [vmem:[#allocation3 + $0x29] sm:$0xff] }
 0x457   :  { %v1250_v53 = vld [vmem:[#allocation3 + $0x22] sm:$0xff]  ;;  %v1251_v42 = vld [vmem:[#allocation3 + $0x2a] sm:$0xff] }
 0x458   :  { %2669 = vmatmul.msk.f32.gmra.mxu3 %vm32_vm4, %v1113_v39  ;;  %v1117_v8 = vld [vmem:[#allocation3 + $0x28] sm:$0xff] }
 0x459   :  { %2663 = vmatmul.msk.f32.gmra.mxu2 %vm32_vm4, %v1127_v44 }
 0x45a   :  { %2675 = vmatmul.msk.f32.gmra.mxu0 %vm32_vm4, %v1247_v41 }
 0x460   :  { %2670 = vmatmul.msk.f32.gmra.mxu3 %vm32_vm4, %v1114_v50 }
 0x461   :  { %2664 = vmatmul.msk.f32.gmra.mxu2 %vm32_vm4, %v1128_v6 }
 0x462   :  { %2676 = vmatmul.msk.f32.gmra.mxu0 %vm32_vm4, %v1248_v9 }
 0x468   :  { %2671 = vmatmul.msk.f32.gmra.mxu3 %vm32_vm4, %v1115_v30 }
 0x469   :  { %2665 = vmatmul.msk.f32.gmra.mxu2 %vm32_vm4, %v1129_v28 }
 0x46a   :  { %2677 = vmatmul.msk.f32.gmra.mxu0 %vm32_vm4, %v1249_v48 }
 0x470   :  { %2672 = vmatmul.msk.f32.gmra.mxu3 %vm32_vm4, %v1116_v61 }
 0x471   :  { %2666 = vmatmul.msk.f32.gmra.mxu2 %vm32_vm4, %v1130_v57 }
 0x472   :  { %2678 = vmatmul.msk.f32.gmra.mxu0 %vm32_vm4, %v1250_v53 }
 0x478   :  { %2673 = vmatmul.msk.f32.gmra.mxu3 %vm32_vm4, %v1117_v8 }
 0x479   :  { %2667 = vmatmul.msk.f32.gmra.mxu2 %vm32_vm4, %v1131_v58 }
 0x47a   :  { %2679 = vmatmul.msk.f32.gmra.mxu0 %vm32_vm4, %v1251_v42 }
 0x4cf   :  { %v1295_v52 = vpop.f32.mrf.mxu0 }
 0x4d3   :  { %v1228_v47 = vpop.f32.mrf.mxu3 }
 0x4d4   :  { %v1175_v56 = vpop.f32.mrf.mxu2 }
 0x4d5   :  { %v1229_v0 = vadd.f32 %v1228_v47, %v1175_v56 }
 0x4d7   :  { %v1298_v59 = vpop.f32.mrf.mxu0  ;;  %v1313_v14 = vadd.f32 %v1295_v52, %v1229_v0 }
 0x4d9   :  { %v4243_v4 = vadd.f32 %v3118_v2, %v1313_v14 }
 0x4db   :  { %v1231_v49 = vpop.f32.mrf.mxu3  ;;  %v1356_v13 = vsel %vm32_vm4, %v4243_v4, -inf  ;;  %v1327_v15 = vsel %vm32_vm4, %v4243_v4, inf }
 0x4dc   :  { %v1178_v63 = vpop.f32.mrf.mxu2 }
 0x4dd   :  { %v1232_v1 = vadd.f32 %v1231_v49, %v1178_v63 }
 0x4df   :  { %v1314_v20 = vadd.f32 %v1298_v59, %v1232_v1  ;;  %v1301_v51 = vpop.f32.mrf.mxu0 }
 0x4e1   :  { %v4241_v12 = vadd.f32 %v3118_v2, %v1314_v20 }
 0x4e3   :  { %v1234_v46 = vpop.f32.mrf.mxu3  ;;  %v1357_v10 = vsel %vm32_vm4, %v4241_v12, -inf  ;;  %v1328_v33 = vsel %vm32_vm4, %v4241_v12, inf }
 0x4e4   :  { %v1181_v3 = vpop.f32.mrf.mxu2  ;;  %v1359_v17 = vmax.f32 %v1356_v13, %v1357_v10  ;;  %v1331_v60 = vmin.f32 %v1327_v15, %v1328_v33 }
 0x4e5   :  { %v1235_v5 = vadd.f32 %v1234_v46, %v1181_v3 }
 0x4e7   :  { %v1315_v7 = vadd.f32 %v1301_v51, %v1235_v5  ;;  %v1304_v16 = vpop.f32.mrf.mxu0 }
 0x4e9   :  { %v4249_v11 = vadd.f32 %v3118_v2, %v1315_v7 }
 0x4eb   :  { %v1237_v18 = vpop.f32.mrf.mxu3  ;;  %v1358_v29 = vsel %vm1329_vm7, %v4249_v11, -inf  ;;  %v1330_v19 = vsel %vm1329_vm7, %v4249_v11, inf }
 0x4ec   :  { %v1184_v21 = vpop.f32.mrf.mxu2  ;;  %v1360_v22 = vmax.f32 %v1359_v17, %v1358_v29  ;;  %v1332_v25 = vmin.f32 %v1331_v60, %v1330_v19  ;;  %v1524_v17 = vld [vmem:[%s4974_s2 + $0x198] sm:$0xff] }
 0x4ed   :  { %v1238_v27 = vadd.f32 %v1237_v18, %v1184_v21  ;;  %v1658_v60 = vld [vmem:[%s4974_s2 + $0x218] sm:$0xff]  ;;  %1618 = vmatpush.msrb.mxu2 %v1524_v17  ;;  %v1522_v17 = vld [vmem:[%s4974_s2 + $0x188] sm:$0xff] }
 0x4ee   :  { %1361 = vmax.xlane.f32.xlu2 %v1360_v22  ;;  %1333 = vmin.xlane.f32.xlu0 %v1332_v25 }
 0x4ef   :  { %v1307_v36 = vpop.f32.mrf.mxu0  ;;  %v1316_v34 = vadd.f32 %v1304_v16, %v1238_v27  ;;  %1685 = vmatpush.msra.mxu3 %v1658_v60  ;;  %v1656_v60 = vld [vmem:[%s4974_s2 + $0x208] sm:$0xff] }
 0x4f1   :  { %v4261_v38 = vadd.f32 %v3118_v2, %v1316_v34 }
 0x4f3   :  { %v1240_v24 = vpop.f32.mrf.mxu3  ;;  %v1342_v39 = vsel %vm32_vm4, %v4261_v38, inf  ;;  %v1370_v44 = vsel %vm32_vm4, %v4261_v38, -inf }
 0x4f4   :  { %v1187_v26 = vpop.f32.mrf.mxu2 }
 0x4f5   :  { %v1241_v31 = vadd.f32 %v1240_v24, %v1187_v26 }
 0x4f7   :  { %v1317_v32 = vadd.f32 %v1307_v36, %v1241_v31  ;;  %v1310_v55 = vpop.f32.mrf.mxu0 }
 0x4f9   :  { %v4259_v35 = vadd.f32 %v3118_v2, %v1317_v32 }
 0x4fb   :  { %v1243_v37 = vpop.f32.mrf.mxu3  ;;  %v1343_v62 = vsel %vm32_vm4, %v4259_v35, inf  ;;  %v1371_v40 = vsel %vm32_vm4, %v4259_v35, -inf }
 0x4fc   :  { %v1190_v43 = vpop.f32.mrf.mxu2  ;;  %v1345_v41 = vmin.f32 %v1342_v39, %v1343_v62  ;;  %v1373_v50 = vmax.f32 %v1370_v44, %v1371_v40 }
 0x4fd   :  { %v1244_v54 = vadd.f32 %v1243_v37, %v1190_v43 }
 0x4ff   :  { %v1318_v45 = vadd.f32 %v1310_v55, %v1244_v54 }
 0x501   :  { %v4267_v23 = vadd.f32 %v3118_v2, %v1318_v45 }
 0x503   :  { %v1344_v6 = vsel %vm1329_vm7, %v4267_v23, inf  ;;  %v1372_v9 = vsel %vm1329_vm7, %v4267_v23, -inf }
 0x504   :  { %v1346_v30 = vmin.f32 %v1345_v41, %v1344_v6  ;;  %v1374_v28 = vmax.f32 %v1373_v50, %v1372_v9 }
 0x506   :  { %1347 = vmin.xlane.f32.xlu1 %v1346_v30  ;;  %1375 = vmax.xlane.f32.xlu0 %v1374_v28 }
 0x561   :  { %v1334_v48 = vpop.xlane.xlu0 %1333  ;;  %v1362_v52 = vpop.xlane.xlu2 %1361 }
 0x562   :  { %v1335_v61 = vrot.slane %v1334_v48, 4  ;;  %v1363_v47 = vrot.slane %v1362_v52, 4 }
 0x564   :  { %v1336_v57 = vmin.f32 %v1334_v48, %v1335_v61  ;;  %v1364_v56 = vmax.f32 %v1362_v52, %v1363_v47  ;;  %v1538_v47 = vld [vmem:[%s4974_s2 + $0x1d8] sm:$0xff] }
 0x565   :  { %1565 = vmatpush.msra.mxu1 %v1538_v47 }
 0x566   :  { %v1337_v53 = vrot.slane %v1336_v57, 2  ;;  %v1365_v59 = vrot.slane %v1364_v56, 2 }
 0x568   :  { %v1338_v8 = vmin.f32 %v1336_v57, %v1337_v53  ;;  %v1366_v14 = vmax.f32 %v1364_v56, %v1365_v59 }
 0x56a   :  { %v1339_v58 = vrot.slane %v1338_v8, 1  ;;  %v1367_v7 = vrot.slane %v1366_v14, 1 }
 0x56c   :  { %v1340_v42 = vmin.f32 %v1338_v8, %v1339_v58  ;;  %v1368_v16 = vmax.f32 %v1366_v14, %v1367_v7  ;;  %v1523_v14 = vld [vmem:[%s4974_s2 + $0x190] sm:$0xff] }
 0x56d   :  { %1619 = vmatpush.msrb.mxu2 %v1523_v14  ;;  %v1531_v14 = vld [vmem:[%s4974_s2 + $0x1a0] sm:$0xff] }
 0x56e   :  { %2935 = vpush %v1340_v42 }
 0x56f   :  { %1620 = vmatpush.msrb.mxu2 %v1522_v17 }
 0x579   :  { %v1348_v49 = vpop.xlane.xlu1 %1347  ;;  %v1376_v63 = vpop.xlane.xlu0 %1375 }
 0x57a   :  { %v1349_v0 = vrot.slane %v1348_v49, 4  ;;  %v1377_v1 = vrot.slane %v1376_v63, 4 }
 0x57c   :  { %v1350_v20 = vmin.f32 %v1348_v49, %v1349_v0  ;;  %v1378_v51 = vmax.f32 %v1376_v63, %v1377_v1  ;;  %v1651_v1 = vld [vmem:[%s4974_s2 + $0x1e0] sm:$0xff] }
 0x57e   :  { %v1351_v2 = vrot.slane %v1350_v20, 2  ;;  %v1379_v46 = vrot.slane %v1378_v51, 2 }
 0x580   :  { %v1352_v3 = vmin.f32 %v1350_v20, %v1351_v2  ;;  %v1380_v5 = vmax.f32 %v1378_v51, %v1379_v46  ;;  %v1657_v2 = vld [vmem:[%s4974_s2 + $0x210] sm:$0xff] }
 0x581   :  { %v1537_v46 = vld [vmem:[%s4974_s2 + $0x1d0] sm:$0xff]  ;;  %1686 = vmatpush.msra.mxu3 %v1657_v2 }
 0x582   :  { %v1353_v10 = vrot.slane %v1352_v3, 1  ;;  %v1381_v33 = vrot.slane %v1380_v5, 1  ;;  %1566 = vmatpush.msra.mxu1 %v1537_v46 }
 0x583   :  { %1687 = vmatpush.msra.mxu3 %v1656_v60 }
 0x584   :  { %v1354_v13 = vmin.f32 %v1352_v3, %v1353_v10  ;;  %v1382_v15 = vmax.f32 %v1380_v5, %v1381_v33 }
 0x586   :  { %2937 = vpush %v1354_v13 }
 0x587   :  { %2939 = vpush %v1368_v16 }
 0x588   :  { %2941 = vpush %v1382_v15 }
 0x59f   :  { %s2936_s16 = spop %2935 }
 0x5b7   :  { %s2938_s17 = spop %2937 }
 0x5b8   :  { %s1384_s18 = smin.f32 %s2938_s17, %s2936_s16  ;;  %s2940_s19 = spop %2939 }
 0x5b9   :  { %s2942_s20 = spop %2941  ;;  %v4291_v32 = vstv %s1384_s18 }
 0x5ba   :  { %s1385_s0 = smax.f32 %s2942_s20, %s2940_s19  ;;  %v1415_v34 = vsub.f32 %v4243_v4, %v4291_v32  ;;  %v1416_v37 = vsub.f32 %v4241_v12, %v4291_v32  ;;  %v1417_v43 = vsub.f32 %v4249_v11, %v4291_v32  ;;  %v1418_v54 = vsub.f32 %v4261_v38, %v4291_v32 }
 0x5bb   :  { %s1386_s21 = ssub.f32 %s1385_s0, %s1384_s18  ;;  %v1419_v45 = vsub.f32 %v4259_v35, %v4291_v32  ;;  %v1420_v4 = vsub.f32 %v4267_v23, %v4291_v32 }
 0x5bd   :  { %p1387_p2 = scmp.ne.f32.partialorder %s1386_s21, 0.0  ;;  %s1396_s22 = smul.f32 %s3506_s8, %s1386_s21 }
 0x5bf   :  { %s5046_s22 = smov (!%p1387_p2, %s1396_s22), 1.0 }
 0x5c0   :  { %v4284_v18 = vstv %s5046_s22 }
 0x5c1   :  { %3171 = vrcp.f32 %v4284_v18  ;;  %v1410_v22 = vand.u32 2147483648, %v4284_v18  ;;  %v1408_v24 = vand.u32 2147483647, %v4284_v18  ;;  %vm1404_vm9 = vweird.f32 %v4284_v18 }
 0x5c3   :  { %v1411_v26 = vor.u32 1.1754944e-38, %v1410_v22  ;;  %vm1409_vm11 = vcmp.eq.f32.partialorder %v1408_v24, 8.507059e+37  ;;  %v1521_v24 = vld [vmem:[%s4974_s2 + $0x180] sm:$0xff] }
 0x5c4   :  { %1621 = vmatpush.msrb.mxu2 %v1521_v24 }
 0x5c7   :  { %v3172_v29 = vpop.eup %3171 }
 0x5c8   :  { %v1400_v19 = vmul.f32 %v3172_v29, %v4284_v18  ;;  %vm1405_vm8 = vweird.f32 %v3172_v29 }
 0x5c9   :  { %vm1406_vm10 = vmor %vm1404_vm9, %vm1405_vm8 }
 0x5ca   :  { %v1401_v21 = vsub.f32 1.0, %v1400_v19 }
 0x5cc   :  { %v1402_v25 = vmul.f32 %v3172_v29, %v1401_v21 }
 0x5ce   :  { %v1403_v36 = vadd.f32 %v3172_v29, %v1402_v25 }
 0x5d0   :  { %v1407_v27 = vsel %vm1406_vm10, %v3172_v29, %v1403_v36  ;;  %v1536_v29 = vld [vmem:[%s4974_s2 + $0x1c8] sm:$0xff]  ;;  %v1655_v36 = vld [vmem:[%s4974_s2 + $0x200] sm:$0xff]  ;;  %vm1727_vm10 = vcmask 522240  }
 0x5d1   :  { %v1412_v31 = vsel %vm1409_vm11, %v1411_v26, %v1407_v27  ;;  %v1535_v26 = vld [vmem:[%s4974_s2 + $0x1c0] sm:$0xff]  ;;  %1567 = vmatpush.msra.mxu1 %v1536_v29  ;;  %1688 = vmatpush.msra.mxu3 %v1655_v36 }
 0x5d2   :  { %2943 = vpush %v1412_v31 }
 0x5d3   :  { %1568 = vmatpush.msra.mxu1 %v1535_v26 }
 0x603   :  { %s2944_s23 = spop %2943 }
 0x604   :  { %v1421_v55 = vstv %s2944_s23 }
 0x605   :  { %v1422_v62 = vmul.f32 %v1421_v55, %v1415_v34  ;;  %v1423_v40 = vmul.f32 %v1421_v55, %v1416_v37  ;;  %v4303_v39 = vmul.f32 %v1421_v55, %v1417_v43  ;;  %v4307_v44 = vmul.f32 %v1421_v55, %v1418_v54  ;;  %v1520_v43 = vld [vmem:[%s4974_s2 + $0x178] sm:$0xff] }
 0x606   :  { %v4309_v12 = vmul.f32 %v1421_v55, %v1419_v45  ;;  %v4311_v6 = vmul.f32 %v1421_v55, %v1420_v4  ;;  %v1654_v54 = vld [vmem:[%s4974_s2 + $0x1f8] sm:$0xff]  ;;  %1622 = vmatpush.msrb.mxu2 %v1520_v43 }
 0x607   :  { %v2945_v41 = vand.u32 2147483647, %v1422_v62  ;;  %v2947_v11 = vcvt.f32.s32 %v1422_v62  ;;  %v2953_v50 = vand.u32 2147483647, %v1423_v40  ;;  %v2955_v38 = vcvt.f32.s32 %v1423_v40  ;;  %1689 = vmatpush.msra.mxu3 %v1654_v54 }
 0x608   :  { %v2963_v9 = vcvt.f32.s32 %v4303_v39  ;;  %v2950_v30 = vand.u32 2147483648, %v1422_v62  ;;  %v2958_v28 = vand.u32 2147483648, %v1423_v40  ;;  %v2961_v48 = vand.u32 2147483647, %v4303_v39 }
 0x609   :  { %v2948_v35 = vcvt.s32.f32 %v2947_v11  ;;  %vm4315_vm12 = vcmp.lt.f32.partialorder %v2945_v41, 8388608.0  ;;  %v2956_v23 = vcvt.s32.f32 %v2955_v38  ;;  %v2969_v53 = vand.u32 2147483647, %v4307_v44  ;;  %v1519_v38 = vld [vmem:[%s4974_s2 + $0x170] sm:$0xff] }
 0x60a   :  { %v2964_v57 = vcvt.s32.f32 %v2963_v9  ;;  %vm4320_vm13 = vcmp.lt.f32.partialorder %v2953_v50, 8388608.0  ;;  %v2971_v42 = vcvt.f32.s32 %v4307_v44  ;;  %v2977_v52 = vand.u32 2147483647, %v4309_v12  ;;  %v1653_v9 = vld [vmem:[%s4974_s2 + $0x1f0] sm:$0xff]  ;;  %1623 = vmatpush.msrb.mxu2 %v1519_v38 }
 0x60b   :  { %v2949_v8 = vand.u32 2147483647, %v2948_v35  ;;  %v2957_v56 = vand.u32 2147483647, %v2956_v23  ;;  %v2966_v49 = vand.u32 2147483648, %v4303_v39  ;;  %v2979_v63 = vcvt.f32.s32 %v4309_v12  ;;  %1690 = vmatpush.msra.mxu3 %v1653_v9 }
 0x60c   :  { %v2965_v59 = vand.u32 2147483647, %v2964_v57  ;;  %vm4331_vm14 = vcmp.lt.f32.partialorder %v2961_v48, 8388608.0  ;;  %v2972_v20 = vcvt.s32.f32 %v2971_v42  ;;  %v2974_v51 = vand.u32 2147483648, %v4307_v44 }
 0x60d   :  { %v2951_v0 = vor.u32 %v2950_v30, %v2949_v8  ;;  %v2959_v3 = vor.u32 %v2958_v28, %v2957_v56  ;;  %vm4345_vm15 = vcmp.lt.f32.partialorder %v2969_v53, 8388608.0  ;;  %v2980_v10 = vcvt.s32.f32 %v2979_v63  ;;  %v3119_v53 = vld [vmem:[%s4975_s3 + $0x7] ss:$0 sm:$0xff]  ;;  %v1652_v8 = vld [vmem:[%s4974_s2 + $0x1e8] sm:$0xff] }
 0x60e   :  { %v2967_v5 = vor.u32 %v2966_v49, %v2965_v59  ;;  %v2973_v13 = vand.u32 2147483647, %v2972_v20  ;;  %vm4351_vm0 = vcmp.lt.f32.partialorder %v2977_v52, 8388608.0  ;;  %v2987_v16 = vcvt.f32.s32 %v4311_v6  ;;  %v1532_v52 = vld [vmem:[%s4974_s2 + $0x1a8] sm:$0xff]  ;;  %1691 = vmatpush.msra.mxu3 %v1652_v8 }
 0x60f   :  { %v2952_v33 = vsel %vm4315_vm12, %v2951_v0, %v1422_v62  ;;  %v2960_v19 = vsel %vm4320_vm13, %v2959_v3, %v1423_v40  ;;  %v2981_v22 = vand.u32 2147483647, %v2980_v10  ;;  %v2982_v25 = vand.u32 2147483648, %v4309_v12  ;;  %v3120_v63 = vld [vmem:[%s4975_s3 + $0x8] ss:$0 sm:$0xff]  ;;  %v1517_v0 = vld [vmem:[%s4974_s2 + $0x160] sm:$0xff] }
 0x610   :  { %v2968_v21 = vsel %vm4331_vm14, %v2967_v5, %v4303_v39  ;;  %v2975_v27 = vor.u32 %v2974_v51, %v2973_v13  ;;  %v2988_v31 = vcvt.s32.f32 %v2987_v16  ;;  %v1434_v34 = vmax.f32 %v2952_v33, 0.0  ;;  %v1534_v39 = vld [vmem:[%s4974_s2 + $0x1b8] sm:$0xff]  ;;  %1692 = vmatpush.msra.mxu3 %v1651_v1 }
 0x611   :  { %v1435_v37 = vmax.f32 %v2960_v19, 0.0  ;;  %v2983_v55 = vor.u32 %v2982_v25, %v2981_v22  ;;  %v2985_v45 = vand.u32 2147483647, %v4311_v6  ;;  %v2990_v62 = vand.u32 2147483648, %v4311_v6  ;;  %1569 = vmatpush.msra.mxu1 %v1534_v39 }
 0x612   :  { %v1436_v40 = vmax.f32 %v2968_v21, 0.0  ;;  %v2976_v4 = vsel %vm4345_vm15, %v2975_v27, %v4307_v44  ;;  %v2989_v41 = vand.u32 2147483647, %v2988_v31  ;;  %v1440_v11 = vmin.f32 %v1434_v34, 255.0  ;;  %v1533_v44 = vld [vmem:[%s4974_s2 + $0x1b0] sm:$0xff] }
 0x613   :  { %v1441_v50 = vmin.f32 %v1435_v37, 255.0  ;;  %v2984_v35 = vsel %vm4351_vm0, %v2983_v55, %v4309_v12  ;;  %v1437_v30 = vmax.f32 %v2976_v4, 0.0  ;;  %v1518_v12 = vld [vmem:[%s4974_s2 + $0x168] sm:$0xff]  ;;  %vm2986_vm1 = vcmp.lt.f32.partialorder %v2985_v45, 8388608.0  ;;  %1570 = vmatpush.msra.mxu1 %v1533_v44 }
 0x614   :  { %v1442_v28 = vmin.f32 %v1436_v40, 255.0  ;;  %v2991_v48 = vor.u32 %v2990_v62, %v2989_v41  ;;  %v1438_v61 = vmax.f32 %v2984_v35, 0.0  ;;  %v1447_v23 = vmul.f32 %v1440_v11, %v4284_v18  ;;  %1624 = vmatpush.msrb.mxu2 %v1518_v12 }
 0x615   :  { %v1448_v57 = vmul.f32 %v1441_v50, %v4284_v18  ;;  %v1443_v58 = vmin.f32 %v1437_v30, 255.0  ;;  %1571 = vmatpush.msra.mxu1 %v1532_v52 }
 0x616   :  { %v1449_v42 = vmul.f32 %v1442_v28, %v4284_v18  ;;  %v2992_v47 = vsel %vm2986_vm1, %v2991_v48, %v4311_v6  ;;  %v1444_v56 = vmin.f32 %v1438_v61, 255.0  ;;  %v1453_v59 = vadd.f32 %v1447_v23, %v4291_v32  ;;  %1625 = vmatpush.msrb.mxu2 %v1517_v0 }
 0x617   :  { %v1454_v49 = vadd.f32 %v1448_v57, %v4291_v32  ;;  %v1439_v20 = vmax.f32 %v2992_v47, 0.0  ;;  %v1450_v6 = vmul.f32 %v1443_v58, %v4284_v18  ;;  %1572 = vmatpush.msra.mxu1 %v1531_v14 }
 0x618   :  { %v1455_v51 = vadd.f32 %v1449_v42, %v4291_v32  ;;  %v1451_v2 = vmul.f32 %v1444_v56, %v4284_v18  ;;  %v1461_v46 = vmul.f32 %v3119_v53, %v1453_v59 }
 0x619   :  { %v1462_v3 = vmul.f32 %v3119_v53, %v1454_v49  ;;  %v1445_v5 = vmin.f32 %v1439_v20, 255.0  ;;  %v1456_v7 = vadd.f32 %v1450_v6, %v4291_v32 }
 0x61a   :  { %v1463_v10 = vmul.f32 %v3119_v53, %v1455_v51  ;;  %v1457_v33 = vadd.f32 %v1451_v2, %v4291_v32  ;;  %v1469_v13 = vadd.f32 %v3120_v63, %v1461_v46 }
 0x61b   :  { %v1470_v15 = vadd.f32 %v3120_v63, %v1462_v3  ;;  %v1452_v16 = vmul.f32 %v1445_v5, %v4284_v18  ;;  %v1464_v17 = vmul.f32 %v3119_v53, %v1456_v7  ;;  %v4470_v3 = vld [vmem:[%s4975_s3 + $0x9] ss:$0 sm:$0xff] }
 0x61c   :  { %v1471_v60 = vadd.f32 %v3120_v63, %v1463_v10  ;;  %v1465_v29 = vmul.f32 %v3119_v53, %v1457_v33  ;;  %v1481_v19 = vmul.f32 1.442695, %v1469_v13  ;;  %vm1475_vm3 = vcmp.gt.f32.partialorder %v1469_v13, 0.0 }
 0x61d   :  { %v1458_v21 = vadd.f32 %v1452_v16, %v4291_v32  ;;  %v1472_v22 = vadd.f32 %v3120_v63, %v1464_v17  ;;  %v1483_v25 = vmul.f32 1.442695, %v1470_v15  ;;  %vm1476_vm5 = vcmp.gt.f32.partialorder %v1470_v15, 0.0 }
 0x61e   :  { %v1473_v24 = vadd.f32 %v3120_v63, %v1465_v29  ;;  %3173 = vpow2.f32 %v1481_v19  ;;  %v1485_v36 = vmul.f32 1.442695, %v1471_v60  ;;  %vm1477_vm6 = vcmp.gt.f32.partialorder %v1471_v60, 0.0 }
 0x61f   :  { %v1466_v26 = vmul.f32 %v3119_v53, %v1458_v21  ;;  %3175 = vpow2.f32 %v1483_v25  ;;  %v1487_v27 = vmul.f32 1.442695, %v1472_v22  ;;  %vm1478_vm7 = vcmp.gt.f32.partialorder %v1472_v22, 0.0 }
 0x620   :  { %3177 = vpow2.f32 %v1485_v36  ;;  %v1489_v31 = vmul.f32 1.442695, %v1473_v24  ;;  %vm1479_vm8 = vcmp.gt.f32.partialorder %v1473_v24, 0.0 }
 0x621   :  { %v1474_v34 = vadd.f32 %v3120_v63, %v1466_v26  ;;  %3179 = vpow2.f32 %v1487_v27 }
 0x622   :  { %3181 = vpow2.f32 %v1489_v31 }
 0x623   :  { %v1491_v18 = vmul.f32 1.442695, %v1474_v34  ;;  %vm1480_vm9 = vcmp.gt.f32.partialorder %v1474_v34, 0.0 }
 0x624   :  { %v3174_v37 = vpop.eup %3173 }
 0x625   :  { %v3176_v43 = vpop.eup %3175  ;;  %3183 = vpow2.f32 %v1491_v18  ;;  %v2680_v54 = vadd.f32 -1.0, %v3174_v37 }
 0x626   :  { %v3178_v55 = vpop.eup %3177  ;;  %v2681_v32 = vadd.f32 -1.0, %v3176_v43 }
 0x627   :  { %v3180_v45 = vpop.eup %3179  ;;  %v2682_v62 = vadd.f32 -1.0, %v3178_v55  ;;  %v1499_v40 = vsel %vm1475_vm3, %v1469_v13, %v2680_v54 }
 0x628   :  { %v3182_v39 = vpop.eup %3181  ;;  %v2683_v4 = vadd.f32 -1.0, %v3180_v45  ;;  %v1500_v41 = vsel %vm1476_vm5, %v1470_v15, %v2681_v32  ;;  %1505 = vst.msk [vmem:[#allocation4] sm:$0xff] %vm32_vm4, %v1499_v40 }
 0x629   :  { %v2684_v11 = vadd.f32 -1.0, %v3182_v39  ;;  %v1501_v50 = vsel %vm1477_vm6, %v1471_v60, %v2682_v62  ;;  %1506 = vst.msk [vmem:[#allocation4 + $0x8] sm:$0xff] %vm32_vm4, %v1500_v41 }
 0x62a   :  { %v1502_v38 = vsel %vm1478_vm7, %v1472_v22, %v2683_v4  ;;  %1507 = vst.msk [vmem:[#allocation4 + $0x10] sm:$0xff] %vm32_vm4, %v1501_v50 }
 0x62b   :  { %v3184_v9 = vpop.eup %3183  ;;  %v1503_v35 = vsel %vm1479_vm8, %v1473_v24, %v2684_v11  ;;  %1508 = vst.msk [vmem:[#allocation4 + $0x18] sm:$0xff] %vm32_vm4, %v1502_v38 }
 0x62c   :  { %v2685_v30 = vadd.f32 -1.0, %v3184_v9  ;;  %1509 = vst.msk [vmem:[#allocation4 + $0x20] sm:$0xff] %vm32_vm4, %v1503_v35 }
 0x62e   :  { %v1504_v28 = vsel %vm1480_vm9, %v1474_v34, %v2685_v30 }
 0x62f   :  { %1510 = vst.msk [vmem:[#allocation4 + $0x28] sm:$0xff] %vm32_vm4, %v1504_v28  ;;  %v1511_v44 = vld [vmem:[#allocation4] sm:$0xff] }
 0x630   :  { %v1525_v48 = vld [vmem:[#allocation4 + $0x1] sm:$0xff]  ;;  %2692 = vmatmul.msk.f32.vlgmr.msrb.gmra.mxu2 %vm32_vm4, %v1511_v44 }
 0x631   :  { %v1645_v61 = vld [vmem:[#allocation4 + $0x2] sm:$0xff]  ;;  %2686 = vmatmul.msk.f32.vlgmr.msra.gmra.mxu1 %vm32_vm4, %v1525_v48  ;;  %v1646_v53 = vld [vmem:[#allocation4 + $0xa] sm:$0xff] }
 0x632   :  { %2698 = vmatmul.msk.f32.vlgmr.msra.gmra.mxu3 %vm32_vm4, %v1645_v61  ;;  %v1512_v23 = vld [vmem:[#allocation4 + $0x8] sm:$0xff]  ;;  %v1513_v12 = vld [vmem:[#allocation4 + $0x10] sm:$0xff]  ;;  %v1514_v42 = vld [vmem:[#allocation4 + $0x18] sm:$0xff] }
 0x633   :  { %v1526_v57 = vld [vmem:[#allocation4 + $0x9] sm:$0xff]  ;;  %v1527_v8 = vld [vmem:[#allocation4 + $0x11] sm:$0xff]  ;;  %v1528_v52 = vld [vmem:[#allocation4 + $0x19] sm:$0xff] }
 0x634   :  { %v1647_v58 = vld [vmem:[#allocation4 + $0x12] sm:$0xff]  ;;  %v1648_v47 = vld [vmem:[#allocation4 + $0x1a] sm:$0xff] }
 0x635   :  { %v1515_v56 = vld [vmem:[#allocation4 + $0x20] sm:$0xff] }
 0x636   :  { %v1529_v59 = vld [vmem:[#allocation4 + $0x21] sm:$0xff]  ;;  %v1530_v0 = vld [vmem:[#allocation4 + $0x29] sm:$0xff] }
 0x637   :  { %v1649_v49 = vld [vmem:[#allocation4 + $0x22] sm:$0xff]  ;;  %v1650_v1 = vld [vmem:[#allocation4 + $0x2a] sm:$0xff] }
 0x638   :  { %2693 = vmatmul.msk.f32.gmra.mxu2 %vm32_vm4, %v1512_v23  ;;  %v1516_v63 = vld [vmem:[#allocation4 + $0x28] sm:$0xff] }
 0x639   :  { %2687 = vmatmul.msk.f32.gmra.mxu1 %vm32_vm4, %v1526_v57 }
 0x63a   :  { %2699 = vmatmul.msk.f32.gmra.mxu3 %vm32_vm4, %v1646_v53 }
 0x640   :  { %2694 = vmatmul.msk.f32.gmra.mxu2 %vm32_vm4, %v1513_v12 }
 0x641   :  { %2688 = vmatmul.msk.f32.gmra.mxu1 %vm32_vm4, %v1527_v8 }
 0x642   :  { %2700 = vmatmul.msk.f32.gmra.mxu3 %vm32_vm4, %v1647_v58 }
 0x648   :  { %2695 = vmatmul.msk.f32.gmra.mxu2 %vm32_vm4, %v1514_v42 }
 0x649   :  { %2689 = vmatmul.msk.f32.gmra.mxu1 %vm32_vm4, %v1528_v52 }
 0x64a   :  { %2701 = vmatmul.msk.f32.gmra.mxu3 %vm32_vm4, %v1648_v47 }
 0x650   :  { %2696 = vmatmul.msk.f32.gmra.mxu2 %vm32_vm4, %v1515_v56 }
 0x651   :  { %2690 = vmatmul.msk.f32.gmra.mxu1 %vm32_vm4, %v1529_v59 }
 0x652   :  { %2702 = vmatmul.msk.f32.gmra.mxu3 %vm32_vm4, %v1649_v49 }
 0x658   :  { %2697 = vmatmul.msk.f32.gmra.mxu2 %vm32_vm4, %v1516_v63 }
 0x659   :  { %2691 = vmatmul.msk.f32.gmra.mxu1 %vm32_vm4, %v1530_v0 }
 0x65a   :  { %2703 = vmatmul.msk.f32.gmra.mxu3 %vm32_vm4, %v1650_v1 }
 0x6ae   :  { %v1574_v20 = vpop.f32.mrf.mxu1 }
 0x6b3   :  { %v1627_v6 = vpop.f32.mrf.mxu2 }
 0x6b4   :  { %v1628_v14 = vadd.f32 %v1627_v6, %v1574_v20 }
 0x6b5   :  { %v1694_v51 = vpop.f32.mrf.mxu3 }
 0x6b6   :  { %v1577_v2 = vpop.f32.mrf.mxu1  ;;  %v1712_v46 = vadd.f32 %v1694_v51, %v1628_v14 }
 0x6b8   :  { %v4473_v33 = vadd.f32 %v4470_v3, %v1712_v46 }
 0x6ba   :  { %v1751_v17 = vsel %vm32_vm4, %v4473_v33, -inf  ;;  %v1726_v29 = vsel %vm32_vm4, %v4473_v33, inf }
 0x6bb   :  { %v1630_v5 = vpop.f32.mrf.mxu2 }
 0x6bc   :  { %v1631_v7 = vadd.f32 %v1630_v5, %v1577_v2 }
 0x6bd   :  { %v1697_v10 = vpop.f32.mrf.mxu3 }
 0x6be   :  { %v1713_v13 = vadd.f32 %v1697_v10, %v1631_v7  ;;  %v1580_v15 = vpop.f32.mrf.mxu1 }
 0x6c0   :  { %v4476_v16 = vadd.f32 %v4470_v3, %v1713_v13 }
 0x6c2   :  { %v1752_v60 = vsel %vm1727_vm10, %v4476_v16, -inf  ;;  %v1728_v19 = vsel %vm1727_vm10, %v4476_v16, inf }
 0x6c3   :  { %v1633_v21 = vpop.f32.mrf.mxu2  ;;  %v1753_v22 = vmax.f32 %v1751_v17, %v1752_v60  ;;  %v1729_v25 = vmin.f32 %v1726_v29, %v1728_v19 }
 0x6c4   :  { %v1634_v24 = vadd.f32 %v1633_v21, %v1580_v15 }
 0x6c5   :  { %v1700_v36 = vpop.f32.mrf.mxu3  ;;  %1754 = vmax.xlane.f32.xlu0 %v1753_v22  ;;  %1730 = vmin.xlane.f32.xlu1 %v1729_v25 }
 0x6c6   :  { %v1714_v26 = vadd.f32 %v1700_v36, %v1634_v24  ;;  %v1583_v31 = vpop.f32.mrf.mxu1 }
 0x6c8   :  { %v4487_v27 = vadd.f32 %v4470_v3, %v1714_v26 }
 0x6cb   :  { %v1636_v34 = vpop.f32.mrf.mxu2 }
 0x6cc   :  { %v1637_v37 = vadd.f32 %v1636_v34, %v1583_v31 }
 0x6cd   :  { %v1703_v18 = vpop.f32.mrf.mxu3 }
 0x6ce   :  { %v1715_v43 = vadd.f32 %v1703_v18, %v1637_v37  ;;  %v1586_v54 = vpop.f32.mrf.mxu1 }
 0x6d0   :  { %v4490_v62 = vadd.f32 %v4470_v3, %v1715_v43 }
 0x6d2   :  { %v1739_v4 = vsel %vm32_vm4, %v4490_v62, inf  ;;  %v1763_v11 = vsel %vm32_vm4, %v4490_v62, -inf }
 0x6d3   :  { %v1639_v55 = vpop.f32.mrf.mxu2 }
 0x6d4   :  { %v1640_v32 = vadd.f32 %v1639_v55, %v1586_v54 }
 0x6d5   :  { %v1706_v45 = vpop.f32.mrf.mxu3 }
 0x6d6   :  { %v1716_v40 = vadd.f32 %v1706_v45, %v1640_v32  ;;  %v1589_v10 = vpop.f32.mrf.mxu1 }
 0x6d8   :  { %v4493_v39 = vadd.f32 %v4470_v3, %v1716_v40 }
 0x6da   :  { %v1740_v41 = vsel %vm1727_vm10, %v4493_v39, inf  ;;  %v1764_v50 = vsel %vm1727_vm10, %v4493_v39, -inf }
 0x6db   :  { %v1741_v38 = vmin.f32 %v1739_v4, %v1740_v41  ;;  %v1765_v9 = vmax.f32 %v1763_v11, %v1764_v50  ;;  %v1642_v7 = vpop.f32.mrf.mxu2 }
 0x6dc   :  { %v1643_v13 = vadd.f32 %v1642_v7, %v1589_v10 }
 0x6dd   :  { %1742 = vmin.xlane.f32.xlu2 %v1741_v38  ;;  %1766 = vmax.xlane.f32.xlu1 %v1765_v9  ;;  %v1709_v15 = vpop.f32.mrf.mxu3 }
 0x6de   :  { %v1717_v17 = vadd.f32 %v1709_v15, %v1643_v13 }
 0x6e0   :  { %v1725_v60 = vadd.f32 %v4470_v3, %v1717_v17 }
 0x738   :  { %v1731_v35 = vpop.xlane.xlu1 %1730  ;;  %v1755_v57 = vpop.xlane.xlu0 %1754 }
 0x739   :  { %v1732_v30 = vrot.slane %v1731_v35, 4  ;;  %v1756_v53 = vrot.slane %v1755_v57, 4 }
 0x73b   :  { %v1733_v28 = vmin.f32 %v1731_v35, %v1732_v30  ;;  %v1757_v12 = vmax.f32 %v1755_v57, %v1756_v53 }
 0x73d   :  { %v1734_v44 = vrot.slane %v1733_v28, 2  ;;  %v1758_v8 = vrot.slane %v1757_v12, 2 }
 0x73f   :  { %v1735_v48 = vmin.f32 %v1733_v28, %v1734_v44  ;;  %v1759_v49 = vmax.f32 %v1757_v12, %v1758_v8 }
 0x741   :  { %v1736_v61 = vrot.slane %v1735_v48, 1  ;;  %v1760_v6 = vrot.slane %v1759_v49, 1 }
 0x743   :  { %v1737_v23 = vmin.f32 %v1735_v48, %v1736_v61  ;;  %v1761_v5 = vmax.f32 %v1759_v49, %v1760_v6  ;;  %v1942_v49 = vld [vmem:[%s4974_s2 + $0x240] sm:$0xff] }
 0x745   :  { %2993 = vpush %v1737_v23 }
 0x750   :  { %v1743_v58 = vpop.xlane.xlu2 %1742  ;;  %v1767_v42 = vpop.xlane.xlu1 %1766 }
 0x751   :  { %v1744_v52 = vrot.slane %v1743_v58, 4  ;;  %v1768_v47 = vrot.slane %v1767_v42, 4 }
 0x753   :  { %v1745_v56 = vmin.f32 %v1743_v58, %v1744_v52  ;;  %v1769_v59 = vmax.f32 %v1767_v42, %v1768_v47 }
 0x755   :  { %v1746_v63 = vrot.slane %v1745_v56, 2  ;;  %v1770_v0 = vrot.slane %v1769_v59, 2 }
 0x757   :  { %v1747_v1 = vmin.f32 %v1745_v56, %v1746_v63  ;;  %v1771_v20 = vmax.f32 %v1769_v59, %v1770_v0 }
 0x759   :  { %v1748_v51 = vrot.slane %v1747_v1, 1  ;;  %v1772_v14 = vrot.slane %v1771_v20, 1 }
 0x75b   :  { %v1749_v2 = vmin.f32 %v1747_v1, %v1748_v51  ;;  %v1773_v46 = vmax.f32 %v1771_v20, %v1772_v14 }
 0x75d   :  { %2995 = vpush %v1749_v2 }
 0x75e   :  { %2997 = vpush %v1761_v5 }
 0x75f   :  { %2999 = vpush %v1773_v46  ;;  %v1941_v46 = vld [vmem:[%s4974_s2 + $0x238] sm:$0xff] }
 0x776   :  { %s2994_s0 = spop %2993 }
 0x78e   :  { %s2996_s21 = spop %2995 }
 0x78f   :  { %s1775_s22 = smin.f32 %s2996_s21, %s2994_s0  ;;  %s2998_s23 = spop %2997 }
 0x790   :  { %v4504_v29 = vstv %s1775_s22  ;;  %s3000_s24 = spop %2999 }
 0x791   :  { %s1776_s25 = smax.f32 %s3000_s24, %s2998_s23  ;;  %v1808_v19 = vsub.f32 %v4487_v27, %v4504_v29  ;;  %v1811_v21 = vsub.f32 %v1725_v60, %v4504_v29  ;;  %v1806_v43 = vsub.f32 %v4473_v33, %v4504_v29  ;;  %v1807_v54 = vsub.f32 %v4476_v16, %v4504_v29 }
 0x792   :  { %s1777_s26 = ssub.f32 %s1776_s25, %s1775_s22  ;;  %v1809_v55 = vsub.f32 %v4490_v62, %v4504_v29  ;;  %v1810_v45 = vsub.f32 %v4493_v39, %v4504_v29  ;;  %s3253_s25 = smov [#allocation7]  }
 0x794   :  { %p1778_p3 = scmp.ne.f32.partialorder %s1777_s26, 0.0  ;;  %s1787_s27 = smul.f32 %s3506_s8, %s1777_s26 }
 0x795   :  { %s2590_s26 = sshll.u32 %s3253_s25, 4  ;;  %s2591_s26 = int_to_ptr.vmem [resolvable:$true] %s2590_s26 }
 0x796   :  { %s5048_s27 = smov (!%p1778_p3, %s1787_s27), 1.0 }
 0x797   :  { %v4510_v22 = vstv %s5048_s27 }
 0x798   :  { %3185 = vrcp.f32 %v4510_v22  ;;  %v1801_v36 = vand.u32 2147483648, %v4510_v22  ;;  %v1799_v27 = vand.u32 2147483647, %v4510_v22  ;;  %vm1795_vm12 = vweird.f32 %v4510_v22 }
 0x79a   :  { %v1802_v34 = vor.u32 1.1754944e-38, %v1801_v36  ;;  %vm1800_vm14 = vcmp.eq.f32.partialorder %v1799_v27, 8.507059e+37 }
 0x79e   :  { %v3186_v25 = vpop.eup %3185 }
 0x79f   :  { %v1791_v3 = vmul.f32 %v3186_v25, %v4510_v22  ;;  %vm1796_vm11 = vweird.f32 %v3186_v25 }
 0x7a0   :  { %vm1797_vm13 = vmor %vm1795_vm12, %vm1796_vm11 }
 0x7a1   :  { %v1792_v24 = vsub.f32 1.0, %v1791_v3 }
 0x7a3   :  { %v1793_v26 = vmul.f32 %v3186_v25, %v1792_v24 }
 0x7a5   :  { %v1794_v31 = vadd.f32 %v3186_v25, %v1793_v26 }
 0x7a7   :  { %v1798_v18 = vsel %vm1797_vm13, %v3186_v25, %v1794_v31 }
 0x7a8   :  { %v1803_v37 = vsel %vm1800_vm14, %v1802_v34, %v1798_v18 }
 0x7a9   :  { %3001 = vpush %v1803_v37 }
 0x7da   :  { %s3002_s28 = spop %3001 }
 0x7db   :  { %v1812_v32 = vstv %s3002_s28 }
 0x7dc   :  { %v1813_v40 = vmul.f32 %v1812_v32, %v1806_v43  ;;  %v1814_v4 = vmul.f32 %v1812_v32, %v1807_v54  ;;  %v1815_v41 = vmul.f32 %v1812_v32, %v1808_v19  ;;  %v1816_v11 = vmul.f32 %v1812_v32, %v1809_v55  ;;  %v2079_v54 = vld [vmem:[%s4974_s2 + $0x2d8] sm:$0xff] }
 0x7dd   :  { %v1817_v50 = vmul.f32 %v1812_v32, %v1810_v45  ;;  %v4525_v30 = vmul.f32 %v1812_v32, %v1811_v21  ;;  %v1959_v55 = vld [vmem:[%s4974_s2 + $0x298] sm:$0xff]  ;;  %2106 = vmatpush.msra.mxu2 %v2079_v54 }
 0x7de   :  { %v3003_v38 = vand.u32 2147483647, %v1813_v40  ;;  %v3005_v9 = vcvt.f32.s32 %v1813_v40  ;;  %v3011_v35 = vand.u32 2147483647, %v1814_v4  ;;  %v3013_v33 = vcvt.f32.s32 %v1814_v4  ;;  %v1945_v32 = vld [vmem:[%s4974_s2 + $0x258] sm:$0xff]  ;;  %1986 = vmatpush.msra.mxu0 %v1959_v55 }
 0x7df   :  { %v3021_v28 = vcvt.f32.s32 %v1815_v41  ;;  %v3008_v44 = vand.u32 2147483648, %v1813_v40  ;;  %v3016_v48 = vand.u32 2147483648, %v1814_v4  ;;  %v3019_v62 = vand.u32 2147483647, %v1815_v41  ;;  %2039 = vmatpush.msrb.mxu1 %v1945_v32 }
 0x7e0   :  { %v3006_v16 = vcvt.s32.f32 %v3005_v9  ;;  %vm4527_vm15 = vcmp.lt.f32.partialorder %v3003_v38, 8388608.0  ;;  %v3014_v39 = vcvt.s32.f32 %v3013_v33  ;;  %v3027_v57 = vand.u32 2147483647, %v1816_v11  ;;  %v2078_v9 = vld [vmem:[%s4974_s2 + $0x2d0] sm:$0xff] }
 0x7e1   :  { %v3022_v23 = vcvt.s32.f32 %v3021_v28  ;;  %vm4531_vm0 = vcmp.lt.f32.partialorder %v3011_v35, 8388608.0  ;;  %v3029_v8 = vcvt.f32.s32 %v1816_v11  ;;  %v3035_v58 = vand.u32 2147483647, %v1817_v50  ;;  %v1958_v35 = vld [vmem:[%s4974_s2 + $0x290] sm:$0xff]  ;;  %2107 = vmatpush.msra.mxu2 %v2078_v9 }
 0x7e2   :  { %v3007_v53 = vand.u32 2147483647, %v3006_v16  ;;  %v3015_v42 = vand.u32 2147483647, %v3014_v39  ;;  %v3024_v47 = vand.u32 2147483648, %v1815_v41  ;;  %v3037_v56 = vcvt.f32.s32 %v1817_v50  ;;  %v1944_v33 = vld [vmem:[%s4974_s2 + $0x250] sm:$0xff]  ;;  %1987 = vmatpush.msra.mxu0 %v1958_v35 }
 0x7e3   :  { %v3023_v52 = vand.u32 2147483647, %v3022_v23  ;;  %vm4535_vm1 = vcmp.lt.f32.partialorder %v3019_v62, 8388608.0  ;;  %v3030_v63 = vcvt.s32.f32 %v3029_v8  ;;  %v3032_v0 = vand.u32 2147483648, %v1816_v11  ;;  %v4592_v62 = vld [vmem:[%s4975_s3 + $0xb] ss:$0 sm:$0xff]  ;;  %2040 = vmatpush.msrb.mxu1 %v1944_v33 }
 0x7e4   :  { %v3009_v59 = vor.u32 %v3008_v44, %v3007_v53  ;;  %v3017_v1 = vor.u32 %v3016_v48, %v3015_v42  ;;  %vm4539_vm3 = vcmp.lt.f32.partialorder %v3027_v57, 8388608.0  ;;  %v3038_v51 = vcvt.s32.f32 %v3037_v56  ;;  %v1957_v57 = vld [vmem:[%s4974_s2 + $0x288] sm:$0xff]  ;;  %v2076_v56 = vld [vmem:[%s4974_s2 + $0x2c0] sm:$0xff] }
 0x7e5   :  { %v3025_v20 = vor.u32 %v3024_v47, %v3023_v52  ;;  %v3031_v2 = vand.u32 2147483647, %v3030_v63  ;;  %vm4545_vm5 = vcmp.lt.f32.partialorder %v3035_v58, 8388608.0  ;;  %v3045_v5 = vcvt.f32.s32 %v4525_v30  ;;  %v1943_v53 = vld [vmem:[%s4974_s2 + $0x248] sm:$0xff]  ;;  %1988 = vmatpush.msra.mxu0 %v1957_v57 }
 0x7e6   :  { %v3010_v14 = vsel %vm4527_vm15, %v3009_v59, %v1813_v40  ;;  %v3018_v7 = vsel %vm4531_vm0, %v3017_v1, %v1814_v4  ;;  %v3039_v13 = vand.u32 2147483647, %v3038_v51  ;;  %v3040_v15 = vand.u32 2147483648, %v1817_v50  ;;  %2041 = vmatpush.msrb.mxu1 %v1943_v53  ;;  %v1956_v59 = vld [vmem:[%s4974_s2 + $0x280] sm:$0xff] }
 0x7e7   :  { %v3026_v10 = vsel %vm4535_vm1, %v3025_v20, %v1815_v41  ;;  %v3033_v17 = vor.u32 %v3032_v0, %v3031_v2  ;;  %v3046_v60 = vcvt.s32.f32 %v3045_v5  ;;  %v1825_v19 = vmax.f32 %v3010_v14, 0.0  ;;  %1989 = vmatpush.msra.mxu0 %v1956_v59  ;;  %v2075_v14 = vld [vmem:[%s4974_s2 + $0x2b8] sm:$0xff] }
 0x7e8   :  { %v1826_v21 = vmax.f32 %v3018_v7, 0.0  ;;  %v3041_v25 = vor.u32 %v3040_v15, %v3039_v13  ;;  %v3043_v3 = vand.u32 2147483647, %v4525_v30  ;;  %v3048_v24 = vand.u32 2147483648, %v4525_v30  ;;  %2042 = vmatpush.msrb.mxu1 %v1942_v49  ;;  %v1955_v2 = vld [vmem:[%s4974_s2 + $0x278] sm:$0xff]  ;;  %v2074_v7 = vld [vmem:[%s4974_s2 + $0x2b0] sm:$0xff] }
 0x7e9   :  { %v1827_v36 = vmax.f32 %v3026_v10, 0.0  ;;  %v3034_v26 = vsel %vm4539_vm3, %v3033_v17, %v1816_v11  ;;  %v3047_v27 = vand.u32 2147483647, %v3046_v60  ;;  %v1831_v31 = vmin.f32 %v1825_v19, 255.0  ;;  %v4574_v11 = vld [vmem:[%s4975_s3 + $0xa] ss:$0 sm:$0xff]  ;;  %1990 = vmatpush.msra.mxu0 %v1955_v2 }
 0x7ea   :  { %v1832_v34 = vmin.f32 %v1826_v21, 255.0  ;;  %v3042_v18 = vsel %vm4545_vm5, %v3041_v25, %v1817_v50  ;;  %v1828_v37 = vmax.f32 %v3034_v26, 0.0  ;;  %vm3044_vm6 = vcmp.lt.f32.partialorder %v3043_v3, 8388608.0  ;;  %v1954_v10 = vld [vmem:[%s4974_s2 + $0x270] sm:$0xff]  ;;  %2043 = vmatpush.msrb.mxu1 %v1941_v46  ;;  %v2073_v19 = vld [vmem:[%s4974_s2 + $0x2a8] sm:$0xff]  ;;  %v2072_v26 = vld [vmem:[%s4974_s2 + $0x2a0] sm:$0xff] }
 0x7eb   :  { %v1833_v43 = vmin.f32 %v1827_v36, 255.0  ;;  %v3049_v45 = vor.u32 %v3048_v24, %v3047_v27  ;;  %v1829_v40 = vmax.f32 %v3042_v18, 0.0  ;;  %v1838_v4 = vmul.f32 %v1831_v31, %v4510_v22  ;;  %v1940_v60 = vld [vmem:[%s4974_s2 + $0x230] sm:$0xff]  ;;  %v1953_v21 = vld [vmem:[%s4974_s2 + $0x268] sm:$0xff]  ;;  %1991 = vmatpush.msra.mxu0 %v1954_v10  ;;  %v1952_v27 = vld [vmem:[%s4974_s2 + $0x260] sm:$0xff] }
 0x7ec   :  { %v1839_v41 = vmul.f32 %v1832_v34, %v4510_v22  ;;  %v1834_v50 = vmin.f32 %v1828_v37, 255.0  ;;  %v1939_v3 = vld [vmem:[%s4974_s2 + $0x228] sm:$0xff]  ;;  %2044 = vmatpush.msrb.mxu1 %v1940_v60  ;;  %v1938_v34 = vld [vmem:[%s4974_s2 + $0x220] sm:$0xff]  ;;  %vm2148_vm5 = vcmask 520192  }
 0x7ed   :  { %v1840_v38 = vmul.f32 %v1833_v43, %v4510_v22  ;;  %v3050_v28 = vsel %vm3044_vm6, %v3049_v45, %v4525_v30  ;;  %v1835_v16 = vmin.f32 %v1829_v40, 255.0  ;;  %v1844_v44 = vadd.f32 %v1838_v4, %v4504_v29  ;;  %v2077_v30 = vld [vmem:[%s4974_s2 + $0x2c8] sm:$0xff]  ;;  %1992 = vmatpush.msra.mxu0 %v1953_v21 }
 0x7ee   :  { %v1845_v48 = vadd.f32 %v1839_v41, %v4504_v29  ;;  %v1830_v61 = vmax.f32 %v3050_v28, 0.0  ;;  %v1841_v39 = vmul.f32 %v1834_v50, %v4510_v22  ;;  %2108 = vmatpush.msra.mxu2 %v2077_v30  ;;  %2045 = vmatpush.msrb.mxu1 %v1939_v3 }
 0x7ef   :  { %v1846_v23 = vadd.f32 %v1840_v38, %v4504_v29  ;;  %v1842_v12 = vmul.f32 %v1835_v16, %v4510_v22  ;;  %v1852_v8 = vmul.f32 %v4574_v11, %v1844_v44  ;;  %1993 = vmatpush.msra.mxu0 %v1952_v27 }
 0x7f0   :  { %v1853_v58 = vmul.f32 %v4574_v11, %v1845_v48  ;;  %v1836_v42 = vmin.f32 %v1830_v61, 255.0  ;;  %v1847_v52 = vadd.f32 %v1841_v39, %v4504_v29  ;;  %2109 = vmatpush.msra.mxu2 %v2076_v56  ;;  %2046 = vmatpush.msrb.mxu1 %v1938_v34 }
 0x7f1   :  { %v1854_v47 = vmul.f32 %v4574_v11, %v1846_v23  ;;  %v1848_v63 = vadd.f32 %v1842_v12, %v4504_v29  ;;  %v1860_v0 = vadd.f32 %v4592_v62, %v1852_v8 }
 0x7f2   :  { %v4622_v1 = vadd.f32 %v4592_v62, %v1853_v58  ;;  %v1843_v20 = vmul.f32 %v1836_v42, %v4510_v22  ;;  %v1855_v6 = vmul.f32 %v4574_v11, %v1847_v52  ;;  %2110 = vmatpush.msra.mxu2 %v2075_v14 }
 0x7f3   :  { %v1862_v51 = vadd.f32 %v4592_v62, %v1854_v47  ;;  %v1856_v5 = vmul.f32 %v4574_v11, %v1848_v63  ;;  %v1872_v22 = vmul.f32 1.442695, %v1860_v0  ;;  %vm1866_vm7 = vcmp.gt.f32.partialorder %v1860_v0, 0.0 }
 0x7f4   :  { %v1849_v13 = vadd.f32 %v1843_v20, %v4504_v29  ;;  %v1863_v15 = vadd.f32 %v4592_v62, %v1855_v6  ;;  %v1874_v17 = vmul.f32 1.442695, %v4622_v1  ;;  %2111 = vmatpush.msra.mxu2 %v2074_v7  ;;  %vm1867_vm8 = vcmp.gt.f32.partialorder %v4622_v1, 0.0 }
 0x7f5   :  { %v1864_v25 = vadd.f32 %v4592_v62, %v1856_v5  ;;  %3187 = vpow2.f32 %v1872_v22  ;;  %v1876_v29 = vmul.f32 1.442695, %v1862_v51  ;;  %vm1868_vm9 = vcmp.gt.f32.partialorder %v1862_v51, 0.0 }
 0x7f6   :  { %v1857_v24 = vmul.f32 %v4574_v11, %v1849_v13  ;;  %3189 = vpow2.f32 %v1874_v17  ;;  %v1878_v36 = vmul.f32 1.442695, %v1863_v15  ;;  %2112 = vmatpush.msra.mxu2 %v2073_v19  ;;  %vm1869_vm10 = vcmp.gt.f32.partialorder %v1863_v15, 0.0 }
 0x7f7   :  { %3191 = vpow2.f32 %v1876_v29  ;;  %v1880_v31 = vmul.f32 1.442695, %v1864_v25  ;;  %vm1870_vm11 = vcmp.gt.f32.partialorder %v1864_v25, 0.0 }
 0x7f8   :  { %v1865_v18 = vadd.f32 %v4592_v62, %v1857_v24  ;;  %3193 = vpow2.f32 %v1878_v36  ;;  %2113 = vmatpush.msra.mxu2 %v2072_v26 }
 0x7f9   :  { %3195 = vpow2.f32 %v1880_v31 }
 0x7fa   :  { %v1882_v37 = vmul.f32 1.442695, %v1865_v18  ;;  %vm1871_vm12 = vcmp.gt.f32.partialorder %v1865_v18, 0.0 }
 0x7fb   :  { %v3188_v43 = vpop.eup %3187 }
 0x7fc   :  { %v3190_v54 = vpop.eup %3189  ;;  %3197 = vpow2.f32 %v1882_v37  ;;  %v2704_v55 = vadd.f32 -1.0, %v3188_v43 }
 0x7fd   :  { %v3192_v32 = vpop.eup %3191  ;;  %v2705_v45 = vadd.f32 -1.0, %v3190_v54 }
 0x7fe   :  { %v3194_v40 = vpop.eup %3193  ;;  %v2706_v4 = vadd.f32 -1.0, %v3192_v32  ;;  %v1890_v41 = vsel %vm1866_vm7, %v1860_v0, %v2704_v55  ;;  %v4699_v32 = vld [vmem:[%s4975_s3 + $0xc] ss:$0 sm:$0xff] }
 0x7ff   :  { %v3196_v11 = vpop.eup %3195  ;;  %v2707_v50 = vadd.f32 -1.0, %v3194_v40  ;;  %v1891_v38 = vsel %vm1867_vm8, %v4622_v1, %v2705_v45  ;;  %v1902_v9 = vmul.f32 1.442695, %v1890_v41  ;;  %vm1896_vm13 = vcmp.gt.f32.partialorder %v1890_v41, 0.0 }
 0x800   :  { %v2708_v35 = vadd.f32 -1.0, %v3196_v11  ;;  %v1892_v33 = vsel %vm1868_vm9, %v1862_v51, %v2706_v4  ;;  %v1904_v28 = vmul.f32 1.442695, %v1891_v38  ;;  %vm1897_vm14 = vcmp.gt.f32.partialorder %v1891_v38, 0.0 }
 0x801   :  { %v1893_v16 = vsel %vm1869_vm10, %v1863_v15, %v2707_v50  ;;  %3199 = vpow2.f32 %v1902_v9  ;;  %v1906_v44 = vmul.f32 1.442695, %v1892_v33  ;;  %vm1898_vm15 = vcmp.gt.f32.partialorder %v1892_v33, 0.0 }
 0x802   :  { %v3198_v48 = vpop.eup %3197  ;;  %v1894_v62 = vsel %vm1870_vm11, %v1864_v25, %v2708_v35  ;;  %3201 = vpow2.f32 %v1904_v28  ;;  %v1908_v61 = vmul.f32 1.442695, %v1893_v16  ;;  %vm1899_vm0 = vcmp.gt.f32.partialorder %v1893_v16, 0.0 }
 0x803   :  { %v2709_v39 = vadd.f32 -1.0, %v3198_v48  ;;  %3203 = vpow2.f32 %v1906_v44  ;;  %v1910_v23 = vmul.f32 1.442695, %v1894_v62  ;;  %vm1900_vm1 = vcmp.gt.f32.partialorder %v1894_v62, 0.0 }
 0x804   :  { %3205 = vpow2.f32 %v1908_v61 }
 0x805   :  { %v1895_v30 = vsel %vm1871_vm12, %v1865_v18, %v2709_v39  ;;  %3207 = vpow2.f32 %v1910_v23 }
 0x806   :  { %v1912_v57 = vmul.f32 1.442695, %v1895_v30  ;;  %vm1901_vm3 = vcmp.gt.f32.partialorder %v1895_v30, 0.0 }
 0x807   :  { %v3200_v53 = vpop.eup %3199 }
 0x808   :  { %v3202_v12 = vpop.eup %3201  ;;  %3209 = vpow2.f32 %v1912_v57  ;;  %v2710_v8 = vadd.f32 -1.0, %v3200_v53 }
 0x809   :  { %v3204_v58 = vpop.eup %3203  ;;  %v2711_v42 = vadd.f32 -1.0, %v3202_v12 }
 0x80a   :  { %v3206_v52 = vpop.eup %3205  ;;  %v2712_v47 = vadd.f32 -1.0, %v3204_v58  ;;  %v1920_v56 = vsel %vm1896_vm13, %v1890_v41, %v2710_v8 }
 0x80b   :  { %v3208_v59 = vpop.eup %3207  ;;  %v2713_v49 = vadd.f32 -1.0, %v3206_v52  ;;  %v1921_v63 = vsel %vm1897_vm14, %v1891_v38, %v2711_v42  ;;  %1926 = vst.msk [vmem:[#allocation5] sm:$0xff] %vm32_vm4, %v1920_v56 }
 0x80c   :  { %v2714_v0 = vadd.f32 -1.0, %v3208_v59  ;;  %v1922_v1 = vsel %vm1898_vm15, %v1892_v33, %v2712_v47  ;;  %1927 = vst.msk [vmem:[#allocation5 + $0x8] sm:$0xff] %vm32_vm4, %v1921_v63 }
 0x80d   :  { %v1923_v20 = vsel %vm1899_vm0, %v1893_v16, %v2713_v49  ;;  %1928 = vst.msk [vmem:[#allocation5 + $0x10] sm:$0xff] %vm32_vm4, %v1922_v1 }
 0x80e   :  { %v3210_v6 = vpop.eup %3209  ;;  %v1924_v51 = vsel %vm1900_vm1, %v1894_v62, %v2714_v0  ;;  %1929 = vst.msk [vmem:[#allocation5 + $0x18] sm:$0xff] %vm32_vm4, %v1923_v20 }
 0x80f   :  { %v2715_v14 = vadd.f32 -1.0, %v3210_v6  ;;  %1930 = vst.msk [vmem:[#allocation5 + $0x20] sm:$0xff] %vm32_vm4, %v1924_v51 }
 0x811   :  { %v1925_v2 = vsel %vm1901_vm3, %v1895_v30, %v2715_v14 }
 0x812   :  { %1931 = vst.msk [vmem:[#allocation5 + $0x28] sm:$0xff] %vm32_vm4, %v1925_v2  ;;  %v1932_v46 = vld [vmem:[#allocation5] sm:$0xff] }
 0x813   :  { %v1946_v5 = vld [vmem:[#allocation5 + $0x1] sm:$0xff]  ;;  %2722 = vmatmul.msk.f32.vlgmr.msrb.gmra.mxu1 %vm32_vm4, %v1932_v46 }
 0x814   :  { %v2066_v22 = vld [vmem:[#allocation5 + $0x2] sm:$0xff]  ;;  %2716 = vmatmul.msk.f32.vlgmr.msra.gmra.mxu0 %vm32_vm4, %v1946_v5  ;;  %v2067_v13 = vld [vmem:[#allocation5 + $0xa] sm:$0xff] }
 0x815   :  { %2728 = vmatmul.msk.f32.vlgmr.msra.gmra.mxu2 %vm32_vm4, %v2066_v22  ;;  %v1933_v7 = vld [vmem:[#allocation5 + $0x8] sm:$0xff]  ;;  %v1934_v15 = vld [vmem:[#allocation5 + $0x10] sm:$0xff]  ;;  %v1935_v19 = vld [vmem:[#allocation5 + $0x18] sm:$0xff] }
 0x816   :  { %v1947_v10 = vld [vmem:[#allocation5 + $0x9] sm:$0xff]  ;;  %v1948_v17 = vld [vmem:[#allocation5 + $0x11] sm:$0xff]  ;;  %v1949_v21 = vld [vmem:[#allocation5 + $0x19] sm:$0xff] }
 0x817   :  { %v2068_v60 = vld [vmem:[#allocation5 + $0x12] sm:$0xff]  ;;  %v2069_v25 = vld [vmem:[#allocation5 + $0x1a] sm:$0xff] }
 0x818   :  { %v1936_v29 = vld [vmem:[#allocation5 + $0x20] sm:$0xff] }
 0x819   :  { %v1950_v3 = vld [vmem:[#allocation5 + $0x21] sm:$0xff]  ;;  %v1951_v26 = vld [vmem:[#allocation5 + $0x29] sm:$0xff] }
 0x81a   :  { %v2070_v24 = vld [vmem:[#allocation5 + $0x22] sm:$0xff]  ;;  %v2071_v27 = vld [vmem:[#allocation5 + $0x2a] sm:$0xff] }
 0x81b   :  { %2723 = vmatmul.msk.f32.gmra.mxu1 %vm32_vm4, %v1933_v7  ;;  %v1937_v36 = vld [vmem:[#allocation5 + $0x28] sm:$0xff] }
 0x81c   :  { %2717 = vmatmul.msk.f32.gmra.mxu0 %vm32_vm4, %v1947_v10 }
 0x81d   :  { %2729 = vmatmul.msk.f32.gmra.mxu2 %vm32_vm4, %v2067_v13 }
 0x823   :  { %2724 = vmatmul.msk.f32.gmra.mxu1 %vm32_vm4, %v1934_v15 }
 0x824   :  { %2718 = vmatmul.msk.f32.gmra.mxu0 %vm32_vm4, %v1948_v17 }
 0x825   :  { %2730 = vmatmul.msk.f32.gmra.mxu2 %vm32_vm4, %v2068_v60 }
 0x82b   :  { %2725 = vmatmul.msk.f32.gmra.mxu1 %vm32_vm4, %v1935_v19 }
 0x82c   :  { %2719 = vmatmul.msk.f32.gmra.mxu0 %vm32_vm4, %v1949_v21 }
 0x82d   :  { %2731 = vmatmul.msk.f32.gmra.mxu2 %vm32_vm4, %v2069_v25 }
 0x833   :  { %2726 = vmatmul.msk.f32.gmra.mxu1 %vm32_vm4, %v1936_v29 }
 0x834   :  { %2720 = vmatmul.msk.f32.gmra.mxu0 %vm32_vm4, %v1950_v3 }
 0x835   :  { %2732 = vmatmul.msk.f32.gmra.mxu2 %vm32_vm4, %v2070_v24 }
 0x83b   :  { %2727 = vmatmul.msk.f32.gmra.mxu1 %vm32_vm4, %v1937_v36 }
 0x83c   :  { %2721 = vmatmul.msk.f32.gmra.mxu0 %vm32_vm4, %v1951_v26 }
 0x83d   :  { %2733 = vmatmul.msk.f32.gmra.mxu2 %vm32_vm4, %v2071_v27 }
 0x890   :  { %v2048_v31 = vpop.f32.mrf.mxu1 }
 0x891   :  { %v1995_v34 = vpop.f32.mrf.mxu0 }
 0x892   :  { %v2049_v54 = vadd.f32 %v2048_v31, %v1995_v34 }
 0x898   :  { %v2115_v18 = vpop.f32.mrf.mxu2  ;;  %v2051_v37 = vpop.f32.mrf.mxu1 }
 0x899   :  { %v1998_v43 = vpop.f32.mrf.mxu0  ;;  %v2133_v55 = vadd.f32 %v2115_v18, %v2049_v54 }
 0x89a   :  { %v2052_v45 = vadd.f32 %v2051_v37, %v1998_v43 }
 0x89b   :  { %v4702_v4 = vadd.f32 %v4699_v32, %v2133_v55 }
 0x89d   :  { %v2172_v35 = vsel %vm32_vm4, %v4702_v4, -inf  ;;  %v2147_v28 = vsel %vm32_vm4, %v4702_v4, inf }
 0x8a0   :  { %v2118_v40 = vpop.f32.mrf.mxu2  ;;  %v2054_v11 = vpop.f32.mrf.mxu1 }
 0x8a1   :  { %v2134_v41 = vadd.f32 %v2118_v40, %v2052_v45  ;;  %v2001_v50 = vpop.f32.mrf.mxu0 }
 0x8a2   :  { %v2055_v9 = vadd.f32 %v2054_v11, %v2001_v50  ;;  %v2350_v50 = vld [vmem:[%s4974_s2 + $0x358] sm:$0xff] }
 0x8a3   :  { %v4705_v38 = vadd.f32 %v4699_v32, %v2134_v41  ;;  %2377 = vmatpush.msrb.mxu3 %v2350_v50 }
 0x8a5   :  { %v2173_v33 = vsel %vm2148_vm5, %v4705_v38, -inf  ;;  %v2149_v16 = vsel %vm2148_vm5, %v4705_v38, inf }
 0x8a6   :  { %v2174_v44 = vmax.f32 %v2172_v35, %v2173_v33  ;;  %v2150_v48 = vmin.f32 %v2147_v28, %v2149_v16 }
 0x8a8   :  { %v2121_v62 = vpop.f32.mrf.mxu2  ;;  %2175 = vmax.xlane.f32.xlu1 %v2174_v44  ;;  %2151 = vmin.xlane.f32.xlu2 %v2150_v48  ;;  %v2057_v23 = vpop.f32.mrf.mxu1 }
 0x8a9   :  { %v2135_v61 = vadd.f32 %v2121_v62, %v2055_v9  ;;  %v2004_v39 = vpop.f32.mrf.mxu0 }
 0x8aa   :  { %v2058_v53 = vadd.f32 %v2057_v23, %v2004_v39 }
 0x8ab   :  { %v4716_v30 = vadd.f32 %v4699_v32, %v2135_v61 }
 0x8b0   :  { %v2124_v57 = vpop.f32.mrf.mxu2  ;;  %v2060_v8 = vpop.f32.mrf.mxu1 }
 0x8b1   :  { %v2007_v12 = vpop.f32.mrf.mxu0  ;;  %v2136_v58 = vadd.f32 %v2124_v57, %v2058_v53 }
 0x8b2   :  { %v2061_v42 = vadd.f32 %v2060_v8, %v2007_v12 }
 0x8b3   :  { %v4719_v47 = vadd.f32 %v4699_v32, %v2136_v58 }
 0x8b5   :  { %v2160_v49 = vsel %vm32_vm4, %v4719_v47, inf  ;;  %v2184_v0 = vsel %vm32_vm4, %v4719_v47, -inf }
 0x8b8   :  { %v2127_v52 = vpop.f32.mrf.mxu2  ;;  %v2063_v40 = vpop.f32.mrf.mxu1 }
 0x8b9   :  { %v2137_v56 = vadd.f32 %v2127_v52, %v2061_v42  ;;  %v2010_v45 = vpop.f32.mrf.mxu0 }
 0x8ba   :  { %v2064_v11 = vadd.f32 %v2063_v40, %v2010_v45  ;;  %v2464_v45 = vld [vmem:[%s4974_s2 + $0x388] sm:$0xff] }
 0x8bb   :  { %v4722_v59 = vadd.f32 %v4699_v32, %v2137_v56 }
 0x8bd   :  { %v2161_v63 = vsel %vm2148_vm5, %v4722_v59, inf  ;;  %v2185_v1 = vsel %vm2148_vm5, %v4722_v59, -inf }
 0x8be   :  { %v2162_v20 = vmin.f32 %v2160_v49, %v2161_v63  ;;  %v2186_v6 = vmax.f32 %v2184_v0, %v2185_v1 }
 0x8c0   :  { %2163 = vmin.xlane.f32.xlu0 %v2162_v20  ;;  %2187 = vmax.xlane.f32.xlu2 %v2186_v6  ;;  %v2130_v41 = vpop.f32.mrf.mxu2 }
 0x8c1   :  { %v2138_v9 = vadd.f32 %v2130_v41, %v2064_v11 }
 0x8c3   :  { %v2146_v35 = vadd.f32 %v4699_v32, %v2138_v9  ;;  %v2347_v9 = vld [vmem:[%s4974_s2 + $0x340] sm:$0xff] }
 0x91b   :  { %v2152_v51 = vpop.xlane.xlu2 %2151  ;;  %v2176_v10 = vpop.xlane.xlu1 %2175 }
 0x91c   :  { %v2153_v14 = vrot.slane %v2152_v51, 4  ;;  %v2177_v13 = vrot.slane %v2176_v10, 4 }
 0x91e   :  { %v2154_v2 = vmin.f32 %v2152_v51, %v2153_v14  ;;  %v2178_v15 = vmax.f32 %v2176_v10, %v2177_v13  ;;  %v2336_v14 = vld [vmem:[%s4974_s2 + $0x318] sm:$0xff] }
 0x91f   :  { %2428 = vmatpush.msrb.mxu0 %v2336_v14 }
 0x920   :  { %v2155_v46 = vrot.slane %v2154_v2, 2  ;;  %v2179_v17 = vrot.slane %v2178_v15, 2 }
 0x922   :  { %v2156_v5 = vmin.f32 %v2154_v2, %v2155_v46  ;;  %v2180_v24 = vmax.f32 %v2178_v15, %v2179_v17  ;;  %v2466_v2 = vld [vmem:[%s4974_s2 + $0x398] sm:$0xff] }
 0x923   :  { %2493 = vmatpush.msra.mxu1 %v2466_v2 }
 0x924   :  { %v2157_v22 = vrot.slane %v2156_v5, 1  ;;  %v2181_v34 = vrot.slane %v2180_v24, 1 }
 0x926   :  { %v2158_v7 = vmin.f32 %v2156_v5, %v2157_v22  ;;  %v2182_v55 = vmax.f32 %v2180_v24, %v2181_v34  ;;  %v2348_v34 = vld [vmem:[%s4974_s2 + $0x348] sm:$0xff] }
 0x928   :  { %3051 = vpush %v2158_v7 }
 0x933   :  { %v2164_v60 = vpop.xlane.xlu0 %2163  ;;  %v2188_v19 = vpop.xlane.xlu2 %2187 }
 0x934   :  { %v2165_v21 = vrot.slane %v2164_v60, 4  ;;  %v2189_v25 = vrot.slane %v2188_v19, 4 }
 0x936   :  { %v2166_v29 = vmin.f32 %v2164_v60, %v2165_v21  ;;  %v2190_v3 = vmax.f32 %v2188_v19, %v2189_v25  ;;  %v2349_v60 = vld [vmem:[%s4974_s2 + $0x350] sm:$0xff] }
 0x937   :  { %v2335_v19 = vld [vmem:[%s4974_s2 + $0x310] sm:$0xff]  ;;  %2378 = vmatpush.msrb.mxu3 %v2349_v60 }
 0x938   :  { %v2167_v36 = vrot.slane %v2166_v29, 2  ;;  %v2191_v26 = vrot.slane %v2190_v3, 2  ;;  %v2465_v21 = vld [vmem:[%s4974_s2 + $0x390] sm:$0xff]  ;;  %2429 = vmatpush.msrb.mxu0 %v2335_v19 }
 0x939   :  { %2494 = vmatpush.msra.mxu1 %v2465_v21  ;;  %2379 = vmatpush.msrb.mxu3 %v2348_v34  ;;  %v3125_v21 = vld [vmem:[%s4975_s3 + $0xd] ss:$0 sm:$0xff] }
 0x93a   :  { %v2168_v27 = vmin.f32 %v2166_v29, %v2167_v36  ;;  %v2192_v31 = vmax.f32 %v2190_v3, %v2191_v26 }
 0x93b   :  { %2495 = vmatpush.msra.mxu1 %v2464_v45  ;;  %2380 = vmatpush.msrb.mxu3 %v2347_v9 }
 0x93c   :  { %v2169_v18 = vrot.slane %v2168_v27, 1  ;;  %v2193_v37 = vrot.slane %v2192_v31, 1 }
 0x93e   :  { %v2170_v43 = vmin.f32 %v2168_v27, %v2169_v18  ;;  %v2194_v54 = vmax.f32 %v2192_v31, %v2193_v37 }
 0x940   :  { %3053 = vpush %v2170_v43 }
 0x941   :  { %3055 = vpush %v2182_v55  ;;  %v2334_v55 = vld [vmem:[%s4974_s2 + $0x308] sm:$0xff] }
 0x942   :  { %3057 = vpush %v2194_v54  ;;  %2430 = vmatpush.msrb.mxu0 %v2334_v55 }
 0x959   :  { %s3052_s5 = spop %3051 }
 0x971   :  { %s3054_s6 = spop %3053 }
 0x972   :  { %s2196_s7 = smin.f32 %s3054_s6, %s3052_s5  ;;  %s3056_s9 = spop %3055 }
 0x973   :  { %v4736_v33 = vstv %s2196_s7  ;;  %s3058_s10 = spop %3057 }
 0x974   :  { %s2197_s11 = smax.f32 %s3058_s10, %s3056_s9  ;;  %v2229_v28 = vsub.f32 %v4716_v30, %v4736_v33  ;;  %v2232_v16 = vsub.f32 %v2146_v35, %v4736_v33  ;;  %v2227_v8 = vsub.f32 %v4702_v4, %v4736_v33  ;;  %v2228_v58 = vsub.f32 %v4705_v38, %v4736_v33  ;;  %v2333_v35 = vld [vmem:[%s4974_s2 + $0x300] sm:$0xff] }
 0x975   :  { %s2198_s12 = ssub.f32 %s2197_s11, %s2196_s7  ;;  %v2230_v42 = vsub.f32 %v4719_v47, %v4736_v33  ;;  %v2231_v56 = vsub.f32 %v4722_v59, %v4736_v33  ;;  %2431 = vmatpush.msrb.mxu0 %v2333_v35 }
 0x977   :  { %p2199_p4 = scmp.ne.f32.partialorder %s2198_s12, 0.0  ;;  %s2208_s1 = smul.f32 %s3506_s8, %s2198_s12 }
 0x979   :  { %s5050_s1 = smov (!%p2199_p4, %s2208_s1), 1.0 }
 0x97a   :  { %v4742_v44 = vstv %s5050_s1 }
 0x97b   :  { %3211 = vrcp.f32 %v4742_v44  ;;  %v2222_v61 = vand.u32 2147483648, %v4742_v44  ;;  %v2220_v23 = vand.u32 2147483647, %v4742_v44  ;;  %vm2216_vm7 = vweird.f32 %v4742_v44 }
 0x97d   :  { %v2223_v57 = vor.u32 1.1754944e-38, %v2222_v61  ;;  %vm2221_vm9 = vcmp.eq.f32.partialorder %v2220_v23, 8.507059e+37 }
 0x981   :  { %v3212_v48 = vpop.eup %3211 }
 0x982   :  { %v2212_v32 = vmul.f32 %v3212_v48, %v4742_v44  ;;  %vm2217_vm6 = vweird.f32 %v3212_v48 }
 0x983   :  { %vm2218_vm8 = vmor %vm2216_vm7, %vm2217_vm6 }
 0x984   :  { %v2213_v62 = vsub.f32 1.0, %v2212_v32 }
 0x986   :  { %v2214_v39 = vmul.f32 %v3212_v48, %v2213_v62 }
 0x988   :  { %v2215_v30 = vadd.f32 %v3212_v48, %v2214_v39 }
 0x98a   :  { %v2219_v53 = vsel %vm2218_vm8, %v3212_v48, %v2215_v30  ;;  %vm2548_vm8 = vcmask 1040384  }
 0x98b   :  { %v2224_v12 = vsel %vm2221_vm9, %v2223_v57, %v2219_v53  ;;  %v2346_v57 = vld [vmem:[%s4974_s2 + $0x338] sm:$0xff]  ;;  %v2345_v53 = vld [vmem:[%s4974_s2 + $0x330] sm:$0xff] }
 0x98c   :  { %3059 = vpush %v2224_v12  ;;  %v2332_v12 = vld [vmem:[%s4974_s2 + $0x2f8] sm:$0xff]  ;;  %2381 = vmatpush.msrb.mxu3 %v2346_v57 }
 0x98d   :  { %2432 = vmatpush.msrb.mxu0 %v2332_v12 }
 0x98e   :  { %2382 = vmatpush.msrb.mxu3 %v2345_v53 }
 0x9bd   :  { %s3060_s8 = spop %3059 }
 0x9be   :  { %v2233_v52 = vstv %s3060_s8 }
 0x9bf   :  { %v4757_v49 = vmul.f32 %v2233_v52, %v2227_v8  ;;  %v4759_v63 = vmul.f32 %v2233_v52, %v2228_v58  ;;  %v4761_v0 = vmul.f32 %v2233_v52, %v2229_v28  ;;  %v4763_v1 = vmul.f32 %v2233_v52, %v2230_v42  ;;  %v2463_v28 = vld [vmem:[%s4974_s2 + $0x380] sm:$0xff] }
 0x9c0   :  { %v4765_v20 = vmul.f32 %v2233_v52, %v2231_v56  ;;  %v4770_v6 = vmul.f32 %v2233_v52, %v2232_v16  ;;  %2496 = vmatpush.msra.mxu1 %v2463_v28  ;;  %v2462_v56 = vld [vmem:[%s4974_s2 + $0x378] sm:$0xff] }
 0x9c1   :  { %v3061_v4 = vand.u32 2147483647, %v4757_v49  ;;  %v3063_v38 = vcvt.f32.s32 %v4757_v49  ;;  %v3069_v47 = vand.u32 2147483647, %v4759_v63  ;;  %v3071_v59 = vcvt.f32.s32 %v4759_v63 }
 0x9c2   :  { %v3079_v51 = vcvt.f32.s32 %v4761_v0  ;;  %v3066_v5 = vand.u32 2147483648, %v4757_v49  ;;  %v3074_v22 = vand.u32 2147483648, %v4759_v63  ;;  %v3077_v7 = vand.u32 2147483647, %v4761_v0  ;;  %2497 = vmatpush.msra.mxu1 %v2462_v56 }
 0x9c3   :  { %v3064_v46 = vcvt.s32.f32 %v3063_v38  ;;  %vm4783_vm10 = vcmp.lt.f32.partialorder %v3061_v4, 8388608.0  ;;  %v3072_v13 = vcvt.s32.f32 %v3071_v59  ;;  %v3085_v17 = vand.u32 2147483647, %v4763_v1  ;;  %v2461_v59 = vld [vmem:[%s4974_s2 + $0x370] sm:$0xff] }
 0x9c4   :  { %v3080_v15 = vcvt.s32.f32 %v3079_v51  ;;  %vm4797_vm11 = vcmp.lt.f32.partialorder %v3069_v47, 8388608.0  ;;  %v3087_v3 = vcvt.f32.s32 %v4763_v1  ;;  %v3093_v24 = vand.u32 2147483647, %v4765_v20  ;;  %v2344_v47 = vld [vmem:[%s4974_s2 + $0x328] sm:$0xff]  ;;  %2498 = vmatpush.msra.mxu1 %v2461_v59 }
 0x9c5   :  { %v3065_v25 = vand.u32 2147483647, %v3064_v46  ;;  %v3073_v36 = vand.u32 2147483647, %v3072_v13  ;;  %v3082_v27 = vand.u32 2147483648, %v4761_v0  ;;  %v3095_v31 = vcvt.f32.s32 %v4765_v20  ;;  %2383 = vmatpush.msrb.mxu3 %v2344_v47 }
 0x9c6   :  { %v3081_v26 = vand.u32 2147483647, %v3080_v15  ;;  %vm4808_vm12 = vcmp.lt.f32.partialorder %v3077_v7, 8388608.0  ;;  %v3088_v43 = vcvt.s32.f32 %v3087_v3  ;;  %v3090_v54 = vand.u32 2147483648, %v4763_v1 }
 0x9c7   :  { %v3067_v18 = vor.u32 %v3066_v5, %v3065_v25  ;;  %v3075_v40 = vor.u32 %v3074_v22, %v3073_v36  ;;  %vm4819_vm13 = vcmp.lt.f32.partialorder %v3085_v17, 8388608.0  ;;  %v3096_v50 = vcvt.s32.f32 %v3095_v31  ;;  %v2330_v5 = vld [vmem:[%s4974_s2 + $0x2e8] sm:$0xff]  ;;  %v2459_v25 = vld [vmem:[%s4974_s2 + $0x360] sm:$0xff] }
 0x9c8   :  { %v3083_v41 = vor.u32 %v3082_v27, %v3081_v26  ;;  %v3089_v48 = vand.u32 2147483647, %v3088_v43  ;;  %vm4835_vm14 = vcmp.lt.f32.partialorder %v3093_v24, 8388608.0  ;;  %v3103_v62 = vcvt.f32.s32 %v4770_v6  ;;  %v2460_v22 = vld [vmem:[%s4974_s2 + $0x368] sm:$0xff] }
 0x9c9   :  { %v3068_v16 = vsel %vm4783_vm10, %v3067_v18, %v4757_v49  ;;  %v3076_v61 = vsel %vm4797_vm11, %v3075_v40, %v4759_v63  ;;  %v3097_v23 = vand.u32 2147483647, %v3096_v50  ;;  %v3098_v30 = vand.u32 2147483648, %v4765_v20  ;;  %v2331_v49 = vld [vmem:[%s4974_s2 + $0x2f0] sm:$0xff]  ;;  %2499 = vmatpush.msra.mxu1 %v2460_v22  ;;  %v3126_v31 = vld [vmem:[%s4975_s3 + $0xe] ss:$0 sm:$0xff] }
 0x9ca   :  { %v3084_v39 = vsel %vm4808_vm12, %v3083_v41, %v4761_v0  ;;  %v3091_v8 = vor.u32 %v3090_v54, %v3089_v48  ;;  %v3104_v58 = vcvt.s32.f32 %v3103_v62  ;;  %v2246_v42 = vmax.f32 %v3068_v16, 0.0  ;;  %2433 = vmatpush.msrb.mxu0 %v2331_v49 }
 0x9cb   :  { %v2247_v52 = vmax.f32 %v3076_v61, 0.0  ;;  %v3099_v63 = vor.u32 %v3098_v30, %v3097_v23  ;;  %v3101_v0 = vand.u32 2147483647, %v4770_v6  ;;  %v3106_v4 = vand.u32 2147483648, %v4770_v6  ;;  %2500 = vmatpush.msra.mxu1 %v2459_v25 }
 0x9cc   :  { %v2248_v38 = vmax.f32 %v3084_v39, 0.0  ;;  %v3092_v51 = vsel %vm4819_vm13, %v3091_v8, %v4763_v1  ;;  %v3105_v14 = vand.u32 2147483647, %v3104_v58  ;;  %v2252_v2 = vmin.f32 %v2246_v42, 255.0  ;;  %v2343_v1 = vld [vmem:[%s4974_s2 + $0x320] sm:$0xff]  ;;  %2434 = vmatpush.msrb.mxu0 %v2330_v5 }
 0x9cd   :  { %v2253_v46 = vmin.f32 %v2247_v52, 255.0  ;;  %v3100_v7 = vsel %vm4835_vm14, %v3099_v63, %v4765_v20  ;;  %v2249_v10 = vmax.f32 %v3092_v51, 0.0  ;;  %v2329_v20 = vld [vmem:[%s4974_s2 + $0x2e0] sm:$0xff]  ;;  %vm3102_vm15 = vcmp.lt.f32.partialorder %v3101_v0, 8388608.0  ;;  %2384 = vmatpush.msrb.mxu3 %v2343_v1 }
 0x9ce   :  { %v2254_v13 = vmin.f32 %v2248_v38, 255.0  ;;  %v3107_v15 = vor.u32 %v3106_v4, %v3105_v14  ;;  %v2250_v17 = vmax.f32 %v3100_v7, 0.0  ;;  %v2259_v60 = vmul.f32 %v2252_v2, %v4742_v44  ;;  %2435 = vmatpush.msrb.mxu0 %v2329_v20 }
 0x9cf   :  { %v2260_v19 = vmul.f32 %v2253_v46, %v4742_v44  ;;  %v2255_v29 = vmin.f32 %v2249_v10, 255.0 }
 0x9d0   :  { %v2261_v3 = vmul.f32 %v2254_v13, %v4742_v44  ;;  %v3108_v24 = vsel %vm3102_vm15, %v3107_v15, %v4770_v6  ;;  %v2256_v36 = vmin.f32 %v2250_v17, 255.0  ;;  %v2265_v26 = vadd.f32 %v2259_v60, %v4736_v33 }
 0x9d1   :  { %v2266_v27 = vadd.f32 %v2260_v19, %v4736_v33  ;;  %v2251_v34 = vmax.f32 %v3108_v24, 0.0  ;;  %v2262_v18 = vmul.f32 %v2255_v29, %v4742_v44 }
 0x9d2   :  { %v2267_v37 = vadd.f32 %v2261_v3, %v4736_v33  ;;  %v2263_v43 = vmul.f32 %v2256_v36, %v4742_v44  ;;  %v2273_v6 = vmul.f32 %v3125_v21, %v2265_v26 }
 0x9d3   :  { %v2274_v54 = vmul.f32 %v3125_v21, %v2266_v27  ;;  %v2257_v55 = vmin.f32 %v2251_v34, 255.0  ;;  %v2268_v45 = vadd.f32 %v2262_v18, %v4736_v33  ;;  %v2557_v18 = vld [vmem:[%s4974_s2 + $0x3d8] sm:$0xff] }
 0x9d4   :  { %v2275_v40 = vmul.f32 %v3125_v21, %v2267_v37  ;;  %v2269_v41 = vadd.f32 %v2263_v43, %v4736_v33  ;;  %v2281_v11 = vadd.f32 %v3126_v31, %v2273_v6  ;;  %v2556_v37 = vld [vmem:[%s4974_s2 + $0x3d0] sm:$0xff]  ;;  %2571 = vmatpush.msrb.mxu2 %v2557_v18  ;;  %v2555_v43 = vld [vmem:[%s4974_s2 + $0x3c8] sm:$0xff]  ;;  %v2554_v6 = vld [vmem:[%s4974_s2 + $0x3c0] sm:$0xff] }
 0x9d5   :  { %v2282_v50 = vadd.f32 %v3126_v31, %v2274_v54  ;;  %v2264_v9 = vmul.f32 %v2257_v55, %v4742_v44  ;;  %v2276_v35 = vmul.f32 %v3125_v21, %v2268_v45 }
 0x9d6   :  { %v2283_v28 = vadd.f32 %v3126_v31, %v2275_v40  ;;  %v2277_v16 = vmul.f32 %v3125_v21, %v2269_v41  ;;  %v2293_v48 = vmul.f32 1.442695, %v2281_v11  ;;  %vm2287_vm0 = vcmp.gt.f32.partialorder %v2281_v11, 0.0  ;;  %2572 = vmatpush.msrb.mxu2 %v2556_v37 }
 0x9d7   :  { %v2270_v32 = vadd.f32 %v2264_v9, %v4736_v33  ;;  %v2284_v62 = vadd.f32 %v3126_v31, %v2276_v35  ;;  %v2295_v61 = vmul.f32 1.442695, %v2282_v50  ;;  %vm2288_vm1 = vcmp.gt.f32.partialorder %v2282_v50, 0.0 }
 0x9d8   :  { %v2285_v39 = vadd.f32 %v3126_v31, %v2277_v16  ;;  %3213 = vpow2.f32 %v2293_v48  ;;  %v2297_v23 = vmul.f32 1.442695, %v2283_v28  ;;  %vm2289_vm3 = vcmp.gt.f32.partialorder %v2283_v28, 0.0  ;;  %2573 = vmatpush.msrb.mxu2 %v2555_v43  ;;  %v3127_v48 = vld [vmem:[%s4975_s3 + $0xf] ss:$0 sm:$0xff] }
 0x9d9   :  { %v2278_v30 = vmul.f32 %v3125_v21, %v2270_v32  ;;  %3215 = vpow2.f32 %v2295_v61  ;;  %v2299_v57 = vmul.f32 1.442695, %v2284_v62  ;;  %vm2290_vm5 = vcmp.gt.f32.partialorder %v2284_v62, 0.0  ;;  %v2553_v61 = vld [vmem:[%s4974_s2 + $0x3b8] sm:$0xff] }
 0x9da   :  { %3217 = vpow2.f32 %v2297_v23  ;;  %v2301_v53 = vmul.f32 1.442695, %v2285_v39  ;;  %vm2291_vm6 = vcmp.gt.f32.partialorder %v2285_v39, 0.0  ;;  %2574 = vmatpush.msrb.mxu2 %v2554_v6 }
 0x9db   :  { %v2286_v12 = vadd.f32 %v3126_v31, %v2278_v30  ;;  %3219 = vpow2.f32 %v2299_v57  ;;  %v2551_v30 = vld [vmem:[%s4974_s2 + $0x3a8] sm:$0xff] }
 0x9dc   :  { %3221 = vpow2.f32 %v2301_v53  ;;  %2575 = vmatpush.msrb.mxu2 %v2553_v61  ;;  %v2550_v53 = vld [vmem:[%s4974_s2 + $0x3a0] sm:$0xff] }
 0x9dd   :  { %v2303_v44 = vmul.f32 1.442695, %v2286_v12  ;;  %vm2292_vm7 = vcmp.gt.f32.partialorder %v2286_v12, 0.0 }
 0x9de   :  { %v3214_v8 = vpop.eup %3213 }
 0x9df   :  { %v3216_v58 = vpop.eup %3215  ;;  %3223 = vpow2.f32 %v2303_v44  ;;  %v2734_v42 = vadd.f32 -1.0, %v3214_v8 }
 0x9e0   :  { %v3218_v52 = vpop.eup %3217  ;;  %v2735_v33 = vadd.f32 -1.0, %v3216_v58 }
 0x9e1   :  { %v3220_v56 = vpop.eup %3219  ;;  %v2736_v49 = vadd.f32 -1.0, %v3218_v52  ;;  %v2311_v63 = vsel %vm2287_vm0, %v2281_v11, %v2734_v42 }
 0x9e2   :  { %v3222_v0 = vpop.eup %3221  ;;  %v2737_v4 = vadd.f32 -1.0, %v3220_v56  ;;  %v2312_v38 = vsel %vm2288_vm1, %v2282_v50, %v2735_v33  ;;  %2317 = vst.msk [vmem:[#allocation6] sm:$0xff] %vm32_vm4, %v2311_v63 }
 0x9e3   :  { %v2738_v47 = vadd.f32 -1.0, %v3222_v0  ;;  %v2313_v59 = vsel %vm2289_vm3, %v2283_v28, %v2736_v49  ;;  %2318 = vst.msk [vmem:[#allocation6 + $0x8] sm:$0xff] %vm32_vm4, %v2312_v38 }
 0x9e4   :  { %v2314_v51 = vsel %vm2290_vm5, %v2284_v62, %v2737_v4  ;;  %2319 = vst.msk [vmem:[#allocation6 + $0x10] sm:$0xff] %vm32_vm4, %v2313_v59 }
 0x9e5   :  { %v3224_v14 = vpop.eup %3223  ;;  %v2315_v2 = vsel %vm2291_vm6, %v2285_v39, %v2738_v47  ;;  %2320 = vst.msk [vmem:[#allocation6 + $0x18] sm:$0xff] %vm32_vm4, %v2314_v51  ;;  %v2552_v39 = vld [vmem:[%s4974_s2 + $0x3b0] sm:$0xff] }
 0x9e6   :  { %v2739_v46 = vadd.f32 -1.0, %v3224_v14  ;;  %2321 = vst.msk [vmem:[#allocation6 + $0x20] sm:$0xff] %vm32_vm4, %v2315_v2  ;;  %2576 = vmatpush.msrb.mxu2 %v2552_v39 }
 0x9e8   :  { %v2316_v5 = vsel %vm2292_vm7, %v2286_v12, %v2739_v46  ;;  %2577 = vmatpush.msrb.mxu2 %v2551_v30 }
 0x9e9   :  { %2322 = vst.msk [vmem:[#allocation6 + $0x28] sm:$0xff] %vm32_vm4, %v2316_v5  ;;  %v2323_v22 = vld [vmem:[#allocation6] sm:$0xff] }
 0x9ea   :  { %v2337_v7 = vld [vmem:[#allocation6 + $0x1] sm:$0xff]  ;;  %2746 = vmatmul.msk.f32.vlgmr.msrb.gmra.mxu0 %vm32_vm4, %v2323_v22  ;;  %2578 = vmatpush.msrb.mxu2 %v2550_v53 }
 0x9eb   :  { %v2453_v10 = vld [vmem:[#allocation6 + $0x2] sm:$0xff]  ;;  %2740 = vmatmul.msk.f32.vlgmr.msrb.gmra.mxu3 %vm32_vm4, %v2337_v7  ;;  %v2454_v15 = vld [vmem:[#allocation6 + $0xa] sm:$0xff] }
 0x9ec   :  { %2752 = vmatmul.msk.f32.vlgmr.msra.gmra.mxu1 %vm32_vm4, %v2453_v10  ;;  %v2324_v13 = vld [vmem:[#allocation6 + $0x8] sm:$0xff]  ;;  %v2325_v17 = vld [vmem:[#allocation6 + $0x10] sm:$0xff]  ;;  %v2326_v21 = vld [vmem:[#allocation6 + $0x18] sm:$0xff] }
 0x9ed   :  { %v2338_v1 = vld [vmem:[#allocation6 + $0x9] sm:$0xff]  ;;  %v2339_v60 = vld [vmem:[#allocation6 + $0x11] sm:$0xff]  ;;  %v2340_v20 = vld [vmem:[#allocation6 + $0x19] sm:$0xff] }
 0x9ee   :  { %v2455_v19 = vld [vmem:[#allocation6 + $0x12] sm:$0xff]  ;;  %v2456_v25 = vld [vmem:[#allocation6 + $0x1a] sm:$0xff] }
 0x9ef   :  { %v2327_v29 = vld [vmem:[#allocation6 + $0x20] sm:$0xff] }
 0x9f0   :  { %v2341_v3 = vld [vmem:[#allocation6 + $0x21] sm:$0xff]  ;;  %v2342_v26 = vld [vmem:[#allocation6 + $0x29] sm:$0xff] }
 0x9f1   :  { %v2457_v24 = vld [vmem:[#allocation6 + $0x22] sm:$0xff]  ;;  %v2458_v27 = vld [vmem:[#allocation6 + $0x2a] sm:$0xff] }
 0x9f2   :  { %2747 = vmatmul.msk.f32.gmra.mxu0 %vm32_vm4, %v2324_v13  ;;  %v2328_v36 = vld [vmem:[#allocation6 + $0x28] sm:$0xff] }
 0x9f3   :  { %2741 = vmatmul.msk.f32.gmra.mxu3 %vm32_vm4, %v2338_v1 }
 0x9f4   :  { %2753 = vmatmul.msk.f32.gmra.mxu1 %vm32_vm4, %v2454_v15 }
 0x9fa   :  { %2748 = vmatmul.msk.f32.gmra.mxu0 %vm32_vm4, %v2325_v17 }
 0x9fb   :  { %2742 = vmatmul.msk.f32.gmra.mxu3 %vm32_vm4, %v2339_v60 }
 0x9fc   :  { %2754 = vmatmul.msk.f32.gmra.mxu1 %vm32_vm4, %v2455_v19 }
 0xa02   :  { %2749 = vmatmul.msk.f32.gmra.mxu0 %vm32_vm4, %v2326_v21 }
 0xa03   :  { %2743 = vmatmul.msk.f32.gmra.mxu3 %vm32_vm4, %v2340_v20 }
 0xa04   :  { %2755 = vmatmul.msk.f32.gmra.mxu1 %vm32_vm4, %v2456_v25 }
 0xa0a   :  { %2750 = vmatmul.msk.f32.gmra.mxu0 %vm32_vm4, %v2327_v29 }
 0xa0b   :  { %2744 = vmatmul.msk.f32.gmra.mxu3 %vm32_vm4, %v2341_v3 }
 0xa0c   :  { %2756 = vmatmul.msk.f32.gmra.mxu1 %vm32_vm4, %v2457_v24  ;;  %v3128_v24 = vld [vmem:[%s4975_s3 + $0x10] ss:$0 sm:$0xff] }
 0xa12   :  { %2751 = vmatmul.msk.f32.gmra.mxu0 %vm32_vm4, %v2328_v36 }
 0xa13   :  { %2745 = vmatmul.msk.f32.gmra.mxu3 %vm32_vm4, %v2342_v26 }
 0xa14   :  { %2757 = vmatmul.msk.f32.gmra.mxu1 %vm32_vm4, %v2458_v27 }
 0xa67   :  { %v2437_v31 = vpop.f32.mrf.mxu0 }
 0xa69   :  { %v2502_v34 = vpop.f32.mrf.mxu1 }
 0xa6e   :  { %v2386_v54 = vpop.f32.mrf.mxu3 }
 0xa6f   :  { %v2440_v55 = vpop.f32.mrf.mxu0  ;;  %v2438_v9 = vadd.f32 %v2437_v31, %v2386_v54 }
 0xa71   :  { %v2505_v45 = vpop.f32.mrf.mxu1  ;;  %v2518_v16 = vadd.f32 %v2502_v34, %v2438_v9 }
 0xa73   :  { %v2524_v57 = vadd.f32 %v3127_v48, %v2518_v16 }
 0xa75   :  { %v2528_v8 = vsel %vm32_vm4, %v2524_v57, 0.0 }
 0xa76   :  { %v2389_v40 = vpop.f32.mrf.mxu3 }
 0xa77   :  { %v2443_v41 = vpop.f32.mrf.mxu0  ;;  %v2441_v50 = vadd.f32 %v2440_v55, %v2389_v40 }
 0xa79   :  { %v2508_v11 = vpop.f32.mrf.mxu1  ;;  %v2519_v35 = vadd.f32 %v2505_v45, %v2441_v50 }
 0xa7b   :  { %v2525_v23 = vadd.f32 %v3127_v48, %v2519_v35 }
 0xa7d   :  { %v2529_v12 = vsel %vm930_vm2, %v2525_v23, 0.0 }
 0xa7e   :  { %v2392_v28 = vpop.f32.mrf.mxu3  ;;  %v2530_v42 = vadd.f32 %v2529_v12, %v2528_v8 }
 0xa7f   :  { %v2445_v32 = vpop.f32.mrf.mxu0 }
 0xa80   :  { %v2531_v56 = vrot.slane %v2530_v42, 4 }
 0xa81   :  { %v2510_v62 = vpop.f32.mrf.mxu1 }
 0xa82   :  { %v2532_v38 = vadd.f32 %v2531_v56, %v2530_v42 }
 0xa84   :  { %v2533_v2 = vrot.slane %v2532_v38, 2 }
 0xa86   :  { %v2394_v44 = vpop.f32.mrf.mxu3  ;;  %v2534_v10 = vadd.f32 %v2533_v2, %v2532_v38 }
 0xa87   :  { %v2448_v58 = vpop.f32.mrf.mxu0  ;;  %v2446_v33 = vadd.f32 %v2445_v32, %v2394_v44 }
 0xa88   :  { %v2535_v15 = vrot.slane %v2534_v10, 1 }
 0xa89   :  { %v2513_v52 = vpop.f32.mrf.mxu1  ;;  %v2520_v49 = vadd.f32 %v2510_v62, %v2446_v33 }
 0xa8a   :  { %v2536_v21 = vadd.f32 %v2535_v15, %v2534_v10 }
 0xa8b   :  { %v2526_v59 = vadd.f32 %v3127_v48, %v2520_v49 }
 0xa8c   :  { %v2537_v25 = vmul.f32 0.09090909, %v2536_v21 }
 0xa8d   :  { %v2538_v46 = vsel %vm32_vm4, %v2526_v59, 0.0 }
 0xa8e   :  { %v2397_v63 = vpop.f32.mrf.mxu3 }
 0xa8f   :  { %v2449_v0 = vadd.f32 %v2448_v58, %v2397_v63  ;;  %v2451_v4 = vpop.f32.mrf.mxu0 }
 0xa91   :  { %v2516_v47 = vpop.f32.mrf.mxu1  ;;  %v2521_v51 = vadd.f32 %v2513_v52, %v2449_v0 }
 0xa93   :  { %v2527_v14 = vadd.f32 %v3127_v48, %v2521_v51 }
 0xa95   :  { %v2539_v5 = vsel %vm930_vm2, %v2527_v14, 0.0  ;;  %vm2583_vm2 = vcmask 58368  }
 0xa96   :  { %v2540_v22 = vadd.f32 %v2539_v5, %v2538_v46  ;;  %v2400_v7 = vpop.f32.mrf.mxu3 }
 0xa98   :  { %v2541_v13 = vrot.slane %v2540_v22, 4 }
 0xa9a   :  { %v2542_v1 = vadd.f32 %v2541_v13, %v2540_v22 }
 0xa9c   :  { %v2543_v17 = vrot.slane %v2542_v1, 2 }
 0xa9e   :  { %v2544_v60 = vadd.f32 %v2543_v17, %v2542_v1 }
 0xaa0   :  { %v2545_v19 = vrot.slane %v2544_v60, 1 }
 0xaa2   :  { %v2546_v20 = vadd.f32 %v2545_v19, %v2544_v60 }
 0xaa4   :  { %v2547_v29 = vmul.f32 0.09090909, %v2546_v20 }
 0xaa6   :  { %v2549_v3 = vsel %vm2548_vm8, %v2537_v25, %v2547_v29 }
 0xaa7   :  { %2758 = vmatmul.msk.f32.vlgmr.msrb.gmra.mxu2 %vm32_vm4, %v2549_v3 }
 0xb2a   :  { %v2580_v36 = vpop.f32.mrf.mxu2 }
 0xb2b   :  { %v2581_v26 = vadd.f32 %v3128_v24, %v2580_v36 }
 0xb2d   :  { %2584 = vst.msk [vmem:[#allocation7] sm:$0x3] %vm2583_vm2, %v2581_v26 }
 0xb2e   :  { %2595 = dma.vmem_to_hbm [thread:$0]  %s2591_s26, 32, %s2593_s29, [#allocation8]  }
 0xb2f   :  { %3249 = dma.done.wait [#allocation8], 32  }
 0xb30   :  { %3250 = vsyncadd [#allocation8], 4294967264 }
 0xb31   :  { %2600 = vsyncpa [#allocation8], 1 }

</bundles_post_ra>
